<compile_context>
chip_gen: v7x
topology: tpu7x:2x2x1
jax: 0.10.0
libtpu: 0.0.40
codegen_flags: <defaults>
</compile_context>

<pallas_src>
import math
from functools import partial

import jax
import jax.numpy as jnp
from jax.experimental import pallas as pl
from jax.experimental.pallas import tpu as pltpu

_VMEM_LIMIT = 48 * 1024 * 1024      # fits v7x (64 MiB) with headroom; fine on v5e/v6e
_MXU_DTYPE = jnp.bfloat16           # MXU operands; accumulation is always f32


# ----------------------------------------------------------------------------
# helpers
# ----------------------------------------------------------------------------
def _pick_tile(total, cap):
    """Largest multiple of 8 that divides `total` and is <= cap (else full)."""
    best = 0
    for c in range(8, min(total, cap) + 1, 8):
        if total % c == 0:
            best = c
    return best if best > 0 else total


def _resident(arr):
    """BlockSpec for a weight that stays VMEM-resident (constant block index)."""
    nd = arr.ndim
    return pl.BlockSpec(arr.shape, lambda *_, _nd=nd: (0,) * _nd)


def _sigmoid(x):
    return 1.0 / (1.0 + jnp.exp(-x))


def _silu(x):
    return x * _sigmoid(x)


def _softplus(x):
    return jnp.maximum(x, 0.0) + jnp.log(1.0 + jnp.exp(-jnp.abs(x)))


def _erf(x):
    # Abramowitz & Stegun 7.1.26, |err| <= 1.5e-7 (below f32 resolution).
    # TODO(synk): replace with lax.erf once Mosaic guarantees a lowering.
    a1, a2, a3, a4, a5 = (0.254829592, -0.284496736, 1.421413741,
                          -1.453152027, 1.061405429)
    p = 0.3275911
    s = jnp.where(x >= 0.0, 1.0, -1.0)
    ax = jnp.abs(x)
    t = 1.0 / (1.0 + p * ax)
    poly = ((((a5 * t + a4) * t + a3) * t + a2) * t + a1) * t
    return s * (1.0 - poly * jnp.exp(-ax * ax))


def _gelu_exact(x):
    return 0.5 * x * (1.0 + _erf(x * 0.7071067811865476))


# ----------------------------------------------------------------------------
# MambaBlock kernel
# ----------------------------------------------------------------------------
def _mamba_kernel(x_ref, w_in_ref, conv_w_ref, conv_b_ref, w_delta_ref,
                  b_dt_ref, w_bc_ref, a_t_ref, d_ref, w_out_ref, o_ref,
                  h_sc, tail_sc, delta_sc, du_sc, bc_sc, y_sc,
                  *, TL, D, Di, n, d_conv, CH):
    t = pl.program_id(1)

    # reset the recurrent state and conv look-back at the start of a sequence
    @pl.when(t == 0)
    def _():
        h_sc[...] = jnp.zeros((n, Di), jnp.float32)
        tail_sc[...] = jnp.zeros((d_conv - 1, Di), jnp.float32)

    x = x_ref[...]                                               # (TL, D) f32

    # in_proj (no bias): bf16 MXU, f32 accumulate
    xr = jnp.dot(x.astype(_MXU_DTYPE), w_in_ref[...],
                 preferred_element_type=jnp.float32)             # (TL, 2*Di)
    xa = xr[:, :Di]
    res = xr[:, Di:]

    # depthwise causal Conv1d along tokens; look-back carried across tiles
    xpad = jnp.concatenate([tail_sc[...], xa], axis=0)           # (TL+K-1, Di)
    cw = conv_w_ref[...]                                         # (K, Di)
    acc = xpad[0:TL, :] * cw[0:1, :]
    for k in range(1, d_conv):                                   # K tiny & static
        acc = acc + xpad[k:k + TL, :] * cw[k:k + 1, :]
    tail_sc[...] = xa[TL - (d_conv - 1):, :]                     # carry forward
    xc = _silu(acc + conv_b_ref[...])                            # (TL, Di)

    # x_proj: delta (w_dt folded into w_x offline) and B/C columns
    xc_b = xc.astype(_MXU_DTYPE)
    delta = _softplus(jnp.dot(xc_b, w_delta_ref[...],
                              preferred_element_type=jnp.float32)
                      + b_dt_ref[...])                           # (TL, Di)
    bc = jnp.dot(xc_b, w_bc_ref[...],
                 preferred_element_type=jnp.float32)             # (TL, 2n)

    delta_sc[...] = delta
    du_sc[...] = delta * xc
    bc_sc[...] = bc

    # selective scan: state h is (n, Di) -> Di on the 128-lane axis (lane-dense)
    a_t = a_t_ref[...]                                           # (n, Di) = A^T
    two_n = 2 * n
    diag = (jax.lax.broadcasted_iota(jnp.int32, (two_n, two_n), 0)
            == jax.lax.broadcasted_iota(jnp.int32, (two_n, two_n), 1))

    @pl.loop(0, TL // CH)
    def _chunk(c):
        base = pl.multiple_of(c * CH, CH)
        d_ch = delta_sc[pl.ds(base, CH), :]                      # (CH, Di)
        du_ch = du_sc[pl.ds(base, CH), :]                        # (CH, Di)
        bc_ch = bc_sc[pl.ds(base, CH), :]                        # (CH, 2n)
        h = h_sc[...]                                            # (n, Di)
        ys = []
        for j in range(CH):                                      # static unroll
            # relayout the (1, 2n) lane-row of [B_l | C_l] into a (2n, 1)
            # sublane column via a diagonal mask + lane-reduce (XLU slot).
            row = bc_ch[j:j + 1, :]
            col = jnp.sum(jnp.where(diag,
                                    jnp.broadcast_to(row, (two_n, two_n)), 0.0),
                          axis=1, keepdims=True)                 # (2n, 1)
            b_l = col[:n, :]                                     # (n, 1)
            c_l = col[n:, :]                                     # (n, 1)
            da = jnp.exp(d_ch[j:j + 1, :] * a_t)                 # (n, Di)
            h = da * h + du_ch[j:j + 1, :] * b_l                 # (n, Di)
            ys.append(jnp.sum(h * c_l, axis=0, keepdims=True))   # (1, Di)
        h_sc[...] = h
        y_sc[pl.ds(base, CH), :] = jnp.concatenate(ys, axis=0)   # 8-row store

    y = y_sc[...] + xc * d_ref[...]                              # + u * D
    y = y * _silu(res)
    o_ref[...] = jnp.dot(y.astype(_MXU_DTYPE), w_out_ref[...],
                         preferred_element_type=jnp.float32)     # (TL, D)


def mamba_forward(p, x):
    B, L, D = x.shape
    Di = p["w_in"].shape[1] // 2
    n = p["a_log"].shape[1]
    dt_rank = p["w_dt"].shape[0]
    d_conv = p["conv_w"].shape[0]
    assert d_conv >= 2

    TL = _pick_tile(L, 128)
    CH = 8 if TL % 8 == 0 else 1
    assert L % TL == 0 and TL >= d_conv
    nLt = L // TL

    # one-time parameter prep (exact rewrites; MXU weights cast to bf16):
    #   * fold the dt_rank bottleneck: W_delta = w_x[:, :R] @ w_dt
    #   * keep only the B/C columns of w_x
    #   * A = -exp(A_log), transposed so the scan keeps Di on the lane axis
    w_in = p["w_in"].astype(_MXU_DTYPE)
    w_delta = jnp.dot(p["w_x"][:, :dt_rank], p["w_dt"]).astype(_MXU_DTYPE)
    w_bc = p["w_x"][:, dt_rank:].astype(_MXU_DTYPE)
    w_out = p["w_out"].astype(_MXU_DTYPE)
    a_t = jnp.transpose(-jnp.exp(p["a_log"].astype(jnp.float32)))    # (n, Di)

    x2 = x.reshape(B * L, D)
    weights = (w_in, p["conv_w"], p["conv_b"], w_delta, p["b_dt"], w_bc,
               a_t, p["d"], w_out)

    out = pl.pallas_call(
        partial(_mamba_kernel, TL=TL, D=D, Di=Di, n=n, d_conv=d_conv, CH=CH),
        out_shape=jax.ShapeDtypeStruct((B * L, D), jnp.float32),
        grid_spec=pltpu.PrefetchScalarGridSpec(
            num_scalar_prefetch=0,
            grid=(B, nLt),
            in_specs=[pl.BlockSpec((TL, D), lambda b, t: (b * nLt + t, 0))]
                     + [_resident(w) for w in weights],
            out_specs=pl.BlockSpec((TL, D), lambda b, t: (b * nLt + t, 0)),
            scratch_shapes=[
                pltpu.VMEM((n, Di), jnp.float32),              # h (scan carry)
                pltpu.VMEM((d_conv - 1, Di), jnp.float32),     # conv look-back
                pltpu.VMEM((TL, Di), jnp.float32),             # delta
                pltpu.VMEM((TL, Di), jnp.float32),             # delta * u
                pltpu.VMEM((TL, 2 * n), jnp.float32),          # [B | C]
                pltpu.VMEM((TL, Di), jnp.float32),             # scan output y
            ],
        ),
        compiler_params=pltpu.CompilerParams(
            dimension_semantics=("parallel", "arbitrary"),
            vmem_limit_bytes=_VMEM_LIMIT),
    )(x2, *weights)
    return out.reshape(B, L, D)


# ----------------------------------------------------------------------------
# SwitchMoE kernels
# ----------------------------------------------------------------------------
def _gate_softmax_kernel(x_ref, wg_ref, bg_ref, gs_ref):
    logits = jnp.dot(x_ref[...].astype(_MXU_DTYPE), wg_ref[...],
                     preferred_element_type=jnp.float32) + bg_ref[...]
    z = logits - jnp.max(logits, axis=-1, keepdims=True)
    ez = jnp.exp(z)
    gs_ref[...] = ez * pl.reciprocal(jnp.sum(ez, axis=-1, keepdims=True),
                                     approx=True)


def _gate_mask_kernel(gs_ref, gate_ref, hot_ref, *, B, L, E, capacity, eps):
    gs = gs_ref[...]                                             # (B, L, E)

    # torch.topk(1, dim=-1): first max index per token
    mx = jnp.max(gs, axis=-1, keepdims=True)
    eidx = jax.lax.broadcasted_iota(jnp.int32, (B, L, E), 2)
    idx = jnp.min(jnp.where(gs == mx, eidx, E), axis=-1)         # (B, L) int32

    # exact `zeros_like(gs).scatter_(dim=1, top_k_indices, 1)`: only expert
    # channel 0 is written and the index addresses the *sequence* axis,
    # i.e. mask[b, j, 0] = 1 iff some token's top-1 index equals j.
    # Built in O(B*L*E) (no (B, L, L) intermediate).
    l_iota = jax.lax.broadcasted_iota(jnp.int32, (B, L), 1)
    mask0 = jnp.zeros((B, L), jnp.float32)
    for j in range(E):                                           # E small, static
        hit_j = jnp.max(jnp.where(idx == j, 1.0, 0.0), axis=1, keepdims=True)
        mask0 = mask0 + jnp.where(l_iota == j, hit_j, 0.0)
    ch0 = jax.lax.broadcasted_iota(jnp.int32, (B, L, E), 2) == 0
    masked = jnp.where(ch0, gs * mask0[:, :, None], 0.0)

    denom = jnp.sum(masked, axis=0, keepdims=True) + eps         # sum over batch
    gate = masked / denom * capacity
    gate = jnp.where(gate != gate, 0.0, gate)                    # torch NaN guard
    gate_ref[...] = gate

    # per-expert activity flags (drive expert skipping / DMA suppression)
    cm = jnp.max(jnp.max(gate, axis=0), axis=0, keepdims=True)   # (1, E)
    hot_ref[...] = (cm > 0.0).astype(jnp.int32)


def _moe_expert_kernel(hot_ref, x_ref, gate_ref, w1_ref, b1_ref, w2_ref,
                       b2_ref, o_ref, *, TM, D, H, E):
    e = pl.program_id(1)

    @pl.when(e == 0)
    def _():
        o_ref[...] = jnp.zeros((TM, D), jnp.float32)

    # Skip experts whose gate column is identically zero: their contribution
    # to sum_e gate[:, e] * expert_e(x) is exactly 0 (the reference's NaN
    # fixup on expert outputs is a provable no-op for finite inputs).
    @pl.when(hot_ref[e] > 0)
    def _():
        xb = x_ref[...].astype(_MXU_DTYPE)                       # (TM, D)
        h = jnp.dot(xb, w1_ref[0],
                    preferred_element_type=jnp.float32) + b1_ref[0]
        h = _gelu_exact(h)
        y = jnp.dot(h.astype(_MXU_DTYPE), w2_ref[0],
                    preferred_element_type=jnp.float32) + b2_ref[0]
        lane = jax.lax.broadcasted_iota(jnp.int32, (TM, E), 1)
        gcol = jnp.sum(jnp.where(lane == e, gate_ref[...], 0.0),
                       axis=1, keepdims=True)                    # (TM, 1)
        o_ref[...] += gcol * y


def moe_forward(p, x):
    B, L, D = x.shape
    E = p["wg"].shape[1]
    H = p["w1"].shape[2]
    assert E <= L, "SwitchGate's scatter on dim=1 requires num_experts <= seq_len"
    capacity = float(int(1.0 * B))            # capacity_factor=1.0, x.size(0)=B
    BL = B * L
    TM = _pick_tile(BL, 512)
    nT = BL // TM

    x2 = x.reshape(BL, D)
    wg = p["wg"].astype(_MXU_DTYPE)
    bg = p["bg"]

    # pass 1: gate logits + softmax (token-tiled, weights resident)
    gs = pl.pallas_call(
        _gate_softmax_kernel,
        out_shape=jax.ShapeDtypeStruct((BL, E), jnp.float32),
        grid_spec=pltpu.PrefetchScalarGridSpec(
            num_scalar_prefetch=0, grid=(nT,),
            in_specs=[pl.BlockSpec((TM, D), lambda t: (t, 0)),
                      _resident(wg), _resident(bg)],
            out_specs=pl.BlockSpec((TM, E), lambda t: (t, 0))),
        compiler_params=pltpu.CompilerParams(
            dimension_semantics=("parallel",),
            vmem_limit_bytes=_VMEM_LIMIT),
    )(x2, wg, bg)

    # pass 2: exact SwitchGate masking + batch-sum normalization (tiny tensor)
    gate3, hot = pl.pallas_call(
        partial(_gate_mask_kernel, B=B, L=L, E=E, capacity=capacity, eps=1e-6),
        out_shape=(jax.ShapeDtypeStruct((B, L, E), jnp.float32),
                   jax.ShapeDtypeStruct((1, E), jnp.int32)),
        grid_spec=pltpu.PrefetchScalarGridSpec(
            num_scalar_prefetch=0, grid=(1,),
            in_specs=[pl.BlockSpec((B, L, E), lambda i: (0, 0, 0))],
            out_specs=(pl.BlockSpec((B, L, E), lambda i: (0, 0, 0)),
                       pl.BlockSpec((1, E), lambda i: (0, 0)))),
        compiler_params=pltpu.CompilerParams(
            dimension_semantics=("arbitrary",),
            vmem_limit_bytes=_VMEM_LIMIT),
    )(gs.reshape(B, L, E))

    gate2 = gate3.reshape(BL, E)
    hot_flags = hot.reshape(E)

    # pass 3: experts.  Token axis "parallel", expert axis streamed
    # ("arbitrary"; output block is the accumulator).  Inactive experts are
    # skipped via pl.when and their weight DMA avoided (index -> block 0).
    w1 = p["w1"].astype(_MXU_DTYPE)           # (E, D, H)
    w2 = p["w2"].astype(_MXU_DTYPE)           # (E, H, D)
    b1 = p["b1"].reshape(E, 1, H)
    b2 = p["b2"].reshape(E, 1, D)

    out = pl.pallas_call(
        partial(_moe_expert_kernel, TM=TM, D=D, H=H, E=E),
        out_shape=jax.ShapeDtypeStruct((BL, D), jnp.float32),
        grid_spec=pltpu.PrefetchScalarGridSpec(
            num_scalar_prefetch=1,
            grid=(nT, E),
            in_specs=[
                pl.BlockSpec((TM, D), lambda t, e, hf: (t, 0)),
                pl.BlockSpec((TM, E), lambda t, e, hf: (t, 0)),
                pl.BlockSpec((1, D, H), lambda t, e, hf: (e * hf[e], 0, 0)),
                pl.BlockSpec((1, 1, H), lambda t, e, hf: (e * hf[e], 0, 0)),
                pl.BlockSpec((1, H, D), lambda t, e, hf: (e * hf[e], 0, 0)),
                pl.BlockSpec((1, 1, D), lambda t, e, hf: (e * hf[e], 0, 0)),
            ],
            out_specs=pl.BlockSpec((TM, D), lambda t, e, hf: (t, 0))),
        compiler_params=pltpu.CompilerParams(
            dimension_semantics=("parallel", "arbitrary"),
            vmem_limit_bytes=_VMEM_LIMIT),
    )(hot_flags, x2, gate2, w1, b1, w2, b2)
    return out.reshape(B, L, D)


def moe_mamba_block_forward(params, x):
    for layer in params["layers"]:
        x = mamba_forward(layer["mamba"], x)
        x = moe_forward(layer["moe"], x)
    return x


# ----------------------------------------------------------------------------
# deterministic parameter init (shapes follow the torch module __init__s)
# ----------------------------------------------------------------------------
def init_moe_mamba_block(key, dim, depth, d_state, num_experts,
                         mamba_expand=2, d_conv=4, mult=4):
    Di = dim * mamba_expand
    dt_rank = math.ceil(dim / 16)
    H = dim * mult

    def u(k, shape, fan_in):
        b = 1.0 / math.sqrt(fan_in)
        return jax.random.uniform(k, shape, jnp.float32, -b, b)

    layers = []
    for _ in range(depth):
        keys = jax.random.split(key, 16)
        key = keys[0]
        mamba = dict(
            w_in=u(keys[1], (dim, 2 * Di), dim),              # Linear(dim, 2*Di)
            conv_w=u(keys[2], (d_conv, Di), d_conv),          # depthwise Conv1d
            conv_b=u(keys[3], (1, Di), d_conv),
            w_x=u(keys[4], (Di, dt_rank + 2 * d_state), Di),  # Linear(Di, R+2n)
            w_dt=u(keys[5], (dt_rank, Di), dt_rank),
            b_dt=u(keys[6], (1, Di), dt_rank),
            a_log=jnp.log(jnp.tile(
                jnp.arange(1, d_state + 1, dtype=jnp.float32)[None, :], (Di, 1))),
            d=jnp.ones((1, Di), jnp.float32),
            w_out=u(keys[7], (Di, dim), Di),                  # Linear(Di, dim)
        )
        moe = dict(
            wg=u(keys[8], (dim, num_experts), dim),           # SwitchGate Linear
            bg=u(keys[9], (1, num_experts), dim),
            w1=u(keys[10], (num_experts, dim, H), dim),       # expert Linear 1
            b1=u(keys[11], (num_experts, H), dim),
            w2=u(keys[12], (num_experts, H, dim), H),         # expert Linear 2
            b2=u(keys[13], (num_experts, dim), H),
        )
        layers.append(dict(mamba=mamba, moe=moe))
    return dict(layers=layers)


if __name__ == "__main__":
    B, L = 2, 8
    dim, depth, d_state, num_experts = 32, 2, 16, 4

    params = init_moe_mamba_block(jax.random.PRNGKey(0), dim=dim, depth=depth,
                                  d_state=d_state, num_experts=num_experts)
    x = jax.random.normal(jax.random.PRNGKey(1), (B, L, dim), jnp.float32)

    y = jax.jit(moe_mamba_block_forward)(params, x)
    y = jax.block_until_ready(y)
    assert y.shape == (B, L, dim)
    assert bool(jnp.all(jnp.isfinite(y)))
    print("KERNEL_OK")
</pallas_src>

<mosaic_0001>
module attributes {stable_mosaic.version = 11 : i64} {
  func.func @_mamba_kernel(%arg0: i32, %arg1: i32, %arg2: memref<8x32xf32, #tpu.memory_space<vmem>>, %arg3: memref<32x128xbf16, #tpu.memory_space<vmem>>, %arg4: memref<4x64xf32, #tpu.memory_space<vmem>>, %arg5: memref<1x64xf32, #tpu.memory_space<vmem>>, %arg6: memref<64x64xbf16, #tpu.memory_space<vmem>>, %arg7: memref<1x64xf32, #tpu.memory_space<vmem>>, %arg8: memref<64x32xbf16, #tpu.memory_space<vmem>>, %arg9: memref<16x64xf32, #tpu.memory_space<vmem>>, %arg10: memref<1x64xf32, #tpu.memory_space<vmem>>, %arg11: memref<64x32xbf16, #tpu.memory_space<vmem>>, %arg12: memref<8x32xf32, #tpu.memory_space<vmem>>, %arg13: memref<16x64xf32, #tpu.memory_space<vmem>>, %arg14: memref<3x64xf32, #tpu.memory_space<vmem>>, %arg15: memref<8x64xf32, #tpu.memory_space<vmem>>, %arg16: memref<8x64xf32, #tpu.memory_space<vmem>>, %arg17: memref<8x32xf32, #tpu.memory_space<vmem>>, %arg18: memref<8x64xf32, #tpu.memory_space<vmem>>) attributes {dimension_semantics = [#tpu.dimension_semantics<parallel>, #tpu.dimension_semantics<arbitrary>], iteration_bounds = array<i64: 2, 1>, scalar_prefetch = 0 : i64, scratch_operands = 6 : i64, tpu.core_type = #tpu.core_type<tc>, window_params = [{transform_indices = @transform_0, window_bounds = array<i64: 8, 32>}, {pipeline_mode = #tpu.pipeline_mode<synchronous>, transform_indices = @transform_1, window_bounds = array<i64: 32, 128>}, {pipeline_mode = #tpu.pipeline_mode<synchronous>, transform_indices = @transform_2, window_bounds = array<i64: 4, 64>}, {pipeline_mode = #tpu.pipeline_mode<synchronous>, transform_indices = @transform_3, window_bounds = array<i64: 1, 64>}, {pipeline_mode = #tpu.pipeline_mode<synchronous>, transform_indices = @transform_4, window_bounds = array<i64: 64, 64>}, {pipeline_mode = #tpu.pipeline_mode<synchronous>, transform_indices = @transform_5, window_bounds = array<i64: 1, 64>}, {pipeline_mode = #tpu.pipeline_mode<synchronous>, transform_indices = @transform_6, window_bounds = array<i64: 64, 32>}, {pipeline_mode = #tpu.pipeline_mode<synchronous>, transform_indices = @transform_7, window_bounds = array<i64: 16, 64>}, {pipeline_mode = #tpu.pipeline_mode<synchronous>, transform_indices = @transform_8, window_bounds = array<i64: 1, 64>}, {pipeline_mode = #tpu.pipeline_mode<synchronous>, transform_indices = @transform_9, window_bounds = array<i64: 64, 32>}, {transform_indices = @transform_10, window_bounds = array<i64: 8, 32>}]} {
    %c0_i32 = arith.constant 0 : i32
    %0 = arith.cmpi eq, %arg1, %c0_i32 : i32
    %1 = arith.extui %0 : i1 to i32
    %c0_i32_0 = arith.constant 0 : i32
    %2 = arith.cmpi ne, %1, %c0_i32_0 : i32
    scf.if %2 {
      %cst_81 = arith.constant 0.000000e+00 : f32
      %287 = vector.broadcast %cst_81 : f32 to vector<16x64xf32>
      %c0_82 = arith.constant 0 : index
      %c0_83 = arith.constant 0 : index
      %288 = vector.load %arg13[%c0_82, %c0_83] : memref<16x64xf32, #tpu.memory_space<vmem>>, vector<16x64xf32>
      tpu.vector_store %arg13[%c0_82, %c0_83], %287 {strides = array<i32>} : memref<16x64xf32, #tpu.memory_space<vmem>>, vector<16x64xf32>,
      %cst_84 = arith.constant 0.000000e+00 : f32
      %289 = vector.broadcast %cst_84 : f32 to vector<3x64xf32>
      %c0_85 = arith.constant 0 : index
      %c0_86 = arith.constant 0 : index
      %290 = vector.load %arg14[%c0_85, %c0_86] : memref<3x64xf32, #tpu.memory_space<vmem>>, vector<3x64xf32>
      tpu.vector_store %arg14[%c0_85, %c0_86], %289 {strides = array<i32>} : memref<3x64xf32, #tpu.memory_space<vmem>>, vector<3x64xf32>,
    } else {
    }
    %c0 = arith.constant 0 : index
    %c0_1 = arith.constant 0 : index
    %3 = vector.load %arg2[%c0, %c0_1] : memref<8x32xf32, #tpu.memory_space<vmem>>, vector<8x32xf32>
    %4 = arith.truncf %3 : vector<8x32xf32> to vector<8x32xbf16>
    %c0_2 = arith.constant 0 : index
    %c0_3 = arith.constant 0 : index
    %5 = vector.load %arg3[%c0_2, %c0_3] : memref<32x128xbf16, #tpu.memory_space<vmem>>, vector<32x128xbf16>
    %cst = arith.constant dense<0.000000e+00> : vector<8x128xf32>
    %6 = tpu.matmul %4, %5, %cst {dimension_numbers = #tpu.dot_dimension_numbers<[1], [0], [0], [1], [0, 0, 1, 1], [], []>} : vector<8x32xbf16>, vector<32x128xbf16>, vector<8x128xf32> -> vector<8x128xf32>
    %7 = vector.extract_strided_slice %6 {offsets = [0, 0], sizes = [8, 64], strides = [1, 1]} : vector<8x128xf32> to vector<8x64xf32>
    %8 = vector.extract_strided_slice %6 {offsets = [0, 64], sizes = [8, 64], strides = [1, 1]} : vector<8x128xf32> to vector<8x64xf32>
    %c0_4 = arith.constant 0 : index
    %c0_5 = arith.constant 0 : index
    %9 = vector.load %arg14[%c0_4, %c0_5] : memref<3x64xf32, #tpu.memory_space<vmem>>, vector<3x64xf32>
    %10 = tpu.concatenate %9, %7 in 0 : vector<3x64xf32>, vector<8x64xf32> -> vector<11x64xf32>
    %c0_6 = arith.constant 0 : index
    %c0_7 = arith.constant 0 : index
    %11 = vector.load %arg4[%c0_6, %c0_7] : memref<4x64xf32, #tpu.memory_space<vmem>>, vector<4x64xf32>
    %12 = vector.extract_strided_slice %10 {offsets = [0, 0], sizes = [8, 64], strides = [1, 1]} : vector<11x64xf32> to vector<8x64xf32>
    %13 = vector.extract_strided_slice %11 {offsets = [0, 0], sizes = [1, 64], strides = [1, 1]} : vector<4x64xf32> to vector<1x64xf32>
    %14 = vector.broadcast %13 : vector<1x64xf32> to vector<8x64xf32>
    %15 = arith.mulf %12, %14 : vector<8x64xf32>
    %16 = vector.extract_strided_slice %10 {offsets = [1, 0], sizes = [8, 64], strides = [1, 1]} : vector<11x64xf32> to vector<8x64xf32>
    %17 = vector.extract_strided_slice %11 {offsets = [1, 0], sizes = [1, 64], strides = [1, 1]} : vector<4x64xf32> to vector<1x64xf32>
    %18 = vector.broadcast %17 : vector<1x64xf32> to vector<8x64xf32>
    %19 = arith.mulf %16, %18 : vector<8x64xf32>
    %20 = arith.addf %15, %19 : vector<8x64xf32>
    %21 = vector.extract_strided_slice %10 {offsets = [2, 0], sizes = [8, 64], strides = [1, 1]} : vector<11x64xf32> to vector<8x64xf32>
    %22 = vector.extract_strided_slice %11 {offsets = [2, 0], sizes = [1, 64], strides = [1, 1]} : vector<4x64xf32> to vector<1x64xf32>
    %23 = vector.broadcast %22 : vector<1x64xf32> to vector<8x64xf32>
    %24 = arith.mulf %21, %23 : vector<8x64xf32>
    %25 = arith.addf %20, %24 : vector<8x64xf32>
    %26 = vector.extract_strided_slice %10 {offsets = [3, 0], sizes = [8, 64], strides = [1, 1]} : vector<11x64xf32> to vector<8x64xf32>
    %27 = vector.extract_strided_slice %11 {offsets = [3, 0], sizes = [1, 64], strides = [1, 1]} : vector<4x64xf32> to vector<1x64xf32>
    %28 = vector.broadcast %27 : vector<1x64xf32> to vector<8x64xf32>
    %29 = arith.mulf %26, %28 : vector<8x64xf32>
    %30 = arith.addf %25, %29 : vector<8x64xf32>
    %31 = vector.extract_strided_slice %7 {offsets = [5, 0], sizes = [3, 64], strides = [1, 1]} : vector<8x64xf32> to vector<3x64xf32>
    %c0_8 = arith.constant 0 : index
    %c0_9 = arith.constant 0 : index
    %32 = vector.load %arg14[%c0_8, %c0_9] : memref<3x64xf32, #tpu.memory_space<vmem>>, vector<3x64xf32>
    tpu.vector_store %arg14[%c0_8, %c0_9], %31 {strides = array<i32>} : memref<3x64xf32, #tpu.memory_space<vmem>>, vector<3x64xf32>,
    %c0_10 = arith.constant 0 : index
    %c0_11 = arith.constant 0 : index
    %33 = vector.load %arg5[%c0_10, %c0_11] : memref<1x64xf32, #tpu.memory_space<vmem>>, vector<1x64xf32>
    %34 = vector.broadcast %33 : vector<1x64xf32> to vector<8x64xf32>
    %35 = arith.addf %30, %34 : vector<8x64xf32>
    %cst_12 = arith.constant 0.000000e+00 : f32
    %36 = vector.broadcast %cst_12 : f32 to vector<8x64xf32>
    %37 = arith.subf %36, %35 : vector<8x64xf32>
    %38 = math.exp %37 : vector<8x64xf32>
    %cst_13 = arith.constant 1.000000e+00 : f32
    %39 = vector.broadcast %cst_13 : f32 to vector<8x64xf32>
    %40 = arith.addf %39, %38 : vector<8x64xf32>
    %cst_14 = arith.constant 1.000000e+00 : f32
    %41 = vector.broadcast %cst_14 : f32 to vector<8x64xf32>
    %42 = arith.divf %41, %40 : vector<8x64xf32>
    %43 = arith.mulf %35, %42 : vector<8x64xf32>
    %44 = arith.truncf %43 : vector<8x64xf32> to vector<8x64xbf16>
    %c0_15 = arith.constant 0 : index
    %c0_16 = arith.constant 0 : index
    %45 = vector.load %arg6[%c0_15, %c0_16] : memref<64x64xbf16, #tpu.memory_space<vmem>>, vector<64x64xbf16>
    %cst_17 = arith.constant dense<0.000000e+00> : vector<8x64xf32>
    %46 = tpu.matmul %44, %45, %cst_17 {dimension_numbers = #tpu.dot_dimension_numbers<[1], [0], [0], [1], [0, 0, 1, 1], [], []>} : vector<8x64xbf16>, vector<64x64xbf16>, vector<8x64xf32> -> vector<8x64xf32>
    %c0_18 = arith.constant 0 : index
    %c0_19 = arith.constant 0 : index
    %47 = vector.load %arg7[%c0_18, %c0_19] : memref<1x64xf32, #tpu.memory_space<vmem>>, vector<1x64xf32>
    %48 = vector.broadcast %47 : vector<1x64xf32> to vector<8x64xf32>
    %49 = arith.addf %46, %48 : vector<8x64xf32>
    %cst_20 = arith.constant 0.000000e+00 : f32
    %50 = vector.broadcast %cst_20 : f32 to vector<8x64xf32>
    %51 = arith.maximumf %49, %50 : vector<8x64xf32>
    %52 = math.absf %49 : vector<8x64xf32>
    %cst_21 = arith.constant 0.000000e+00 : f32
    %53 = vector.broadcast %cst_21 : f32 to vector<8x64xf32>
    %54 = arith.subf %53, %52 : vector<8x64xf32>
    %55 = math.exp %54 : vector<8x64xf32>
    %cst_22 = arith.constant 1.000000e+00 : f32
    %56 = vector.broadcast %cst_22 : f32 to vector<8x64xf32>
    %57 = arith.addf %56, %55 : vector<8x64xf32>
    %58 = math.log %57 : vector<8x64xf32>
    %59 = arith.addf %51, %58 : vector<8x64xf32>
    %c0_23 = arith.constant 0 : index
    %c0_24 = arith.constant 0 : index
    %60 = vector.load %arg8[%c0_23, %c0_24] : memref<64x32xbf16, #tpu.memory_space<vmem>>, vector<64x32xbf16>
    %cst_25 = arith.constant dense<0.000000e+00> : vector<8x32xf32>
    %61 = tpu.matmul %44, %60, %cst_25 {dimension_numbers = #tpu.dot_dimension_numbers<[1], [0], [0], [1], [0, 0, 1, 1], [], []>} : vector<8x64xbf16>, vector<64x32xbf16>, vector<8x32xf32> -> vector<8x32xf32>
    %c0_26 = arith.constant 0 : index
    %c0_27 = arith.constant 0 : index
    %62 = vector.load %arg15[%c0_26, %c0_27] : memref<8x64xf32, #tpu.memory_space<vmem>>, vector<8x64xf32>
    tpu.vector_store %arg15[%c0_26, %c0_27], %59 {strides = array<i32>} : memref<8x64xf32, #tpu.memory_space<vmem>>, vector<8x64xf32>,
    %63 = arith.mulf %59, %43 : vector<8x64xf32>
    %c0_28 = arith.constant 0 : index
    %c0_29 = arith.constant 0 : index
    %64 = vector.load %arg16[%c0_28, %c0_29] : memref<8x64xf32, #tpu.memory_space<vmem>>, vector<8x64xf32>
    tpu.vector_store %arg16[%c0_28, %c0_29], %63 {strides = array<i32>} : memref<8x64xf32, #tpu.memory_space<vmem>>, vector<8x64xf32>,
    %c0_30 = arith.constant 0 : index
    %c0_31 = arith.constant 0 : index
    %65 = vector.load %arg17[%c0_30, %c0_31] : memref<8x32xf32, #tpu.memory_space<vmem>>, vector<8x32xf32>
    tpu.vector_store %arg17[%c0_30, %c0_31], %61 {strides = array<i32>} : memref<8x32xf32, #tpu.memory_space<vmem>>, vector<8x32xf32>,
    %c0_32 = arith.constant 0 : index
    %c0_33 = arith.constant 0 : index
    %66 = vector.load %arg9[%c0_32, %c0_33] : memref<16x64xf32, #tpu.memory_space<vmem>>, vector<16x64xf32>
    %67 = tpu.iota {dimensions = array<i32: 0>} : vector<32x32xi32>
    %68 = tpu.iota {dimensions = array<i32: 1>} : vector<32x32xi32>
    %69 = arith.cmpi eq, %67, %68 : vector<32x32xi32>
    %c0_i32_34 = arith.constant 0 : i32
    %c1_i32 = arith.constant 1 : i32
    %70 = arith.muli %c0_i32_34, %c1_i32 : i32
    %c0_i32_35 = arith.constant 0 : i32
    %71 = arith.addi %c0_i32_35, %70 : i32
    %c8_i32 = arith.constant 8 : i32
    %72 = arith.muli %71, %c8_i32 : i32
    %73 = tpu.assume_multiple %72, 8 : i32
    %74 = arith.index_cast %73 : i32 to index
    %c0_36 = arith.constant 0 : index
    %75 = vector.load %arg15[%74, %c0_36] : memref<8x64xf32, #tpu.memory_space<vmem>>, vector<8x64xf32>
    %76 = arith.index_cast %73 : i32 to index
    %c0_37 = arith.constant 0 : index
    %77 = vector.load %arg16[%76, %c0_37] : memref<8x64xf32, #tpu.memory_space<vmem>>, vector<8x64xf32>
    %78 = arith.index_cast %73 : i32 to index
    %c0_38 = arith.constant 0 : index
    %79 = vector.load %arg17[%78, %c0_38] : memref<8x32xf32, #tpu.memory_space<vmem>>, vector<8x32xf32>
    %c0_39 = arith.constant 0 : index
    %c0_40 = arith.constant 0 : index
    %80 = vector.load %arg13[%c0_39, %c0_40] : memref<16x64xf32, #tpu.memory_space<vmem>>, vector<16x64xf32>
    %81 = vector.extract_strided_slice %79 {offsets = [0, 0], sizes = [1, 32], strides = [1, 1]} : vector<8x32xf32> to vector<1x32xf32>
    %82 = vector.shape_cast %81 : vector<1x32xf32> to vector<1x32xf32>
    %83 = vector.broadcast %82 : vector<1x32xf32> to vector<32x32xf32>
    %cst_41 = arith.constant 0.000000e+00 : f32
    %84 = vector.broadcast %cst_41 : f32 to vector<32x32xf32>
    %85 = arith.select %69, %83, %84 : vector<32x32xi1>, vector<32x32xf32>
    %cst_42 = arith.constant dense<0.000000e+00> : vector<32xf32>
    %86 = vector.multi_reduction <add>, %85, %cst_42 [1] : vector<32x32xf32> to vector<32xf32>
    %87 = vector.shape_cast %86 : vector<32xf32> to vector<32x1xf32>
    %88 = vector.extract_strided_slice %87 {offsets = [0, 0], sizes = [16, 1], strides = [1, 1]} : vector<32x1xf32> to vector<16x1xf32>
    %89 = vector.extract_strided_slice %87 {offsets = [16, 0], sizes = [16, 1], strides = [1, 1]} : vector<32x1xf32> to vector<16x1xf32>
    %90 = vector.extract_strided_slice %75 {offsets = [0, 0], sizes = [1, 64], strides = [1, 1]} : vector<8x64xf32> to vector<1x64xf32>
    %91 = vector.broadcast %90 : vector<1x64xf32> to vector<16x64xf32>
    %92 = arith.mulf %91, %66 : vector<16x64xf32>
    %93 = math.exp %92 : vector<16x64xf32>
    %94 = arith.mulf %93, %80 : vector<16x64xf32>
    %95 = vector.extract_strided_slice %77 {offsets = [0, 0], sizes = [1, 64], strides = [1, 1]} : vector<8x64xf32> to vector<1x64xf32>
    %96 = vector.broadcast %95 : vector<1x64xf32> to vector<16x64xf32>
    %97 = vector.broadcast %88 : vector<16x1xf32> to vector<16x64xf32>
    %98 = arith.mulf %96, %97 : vector<16x64xf32>
    %99 = arith.addf %94, %98 : vector<16x64xf32>
    %100 = vector.broadcast %89 : vector<16x1xf32> to vector<16x64xf32>
    %101 = arith.mulf %99, %100 : vector<16x64xf32>
    %cst_43 = arith.constant dense<0.000000e+00> : vector<64xf32>
    %102 = vector.multi_reduction <add>, %101, %cst_43 [0] : vector<16x64xf32> to vector<64xf32>
    %103 = vector.shape_cast %102 : vector<64xf32> to vector<1x64xf32>
    %104 = vector.extract_strided_slice %79 {offsets = [1, 0], sizes = [1, 32], strides = [1, 1]} : vector<8x32xf32> to vector<1x32xf32>
    %105 = vector.shape_cast %104 : vector<1x32xf32> to vector<1x32xf32>
    %106 = vector.broadcast %105 : vector<1x32xf32> to vector<32x32xf32>
    %cst_44 = arith.constant 0.000000e+00 : f32
    %107 = vector.broadcast %cst_44 : f32 to vector<32x32xf32>
    %108 = arith.select %69, %106, %107 : vector<32x32xi1>, vector<32x32xf32>
    %cst_45 = arith.constant dense<0.000000e+00> : vector<32xf32>
    %109 = vector.multi_reduction <add>, %108, %cst_45 [1] : vector<32x32xf32> to vector<32xf32>
    %110 = vector.shape_cast %109 : vector<32xf32> to vector<32x1xf32>
    %111 = vector.extract_strided_slice %110 {offsets = [0, 0], sizes = [16, 1], strides = [1, 1]} : vector<32x1xf32> to vector<16x1xf32>
    %112 = vector.extract_strided_slice %110 {offsets = [16, 0], sizes = [16, 1], strides = [1, 1]} : vector<32x1xf32> to vector<16x1xf32>
    %113 = vector.extract_strided_slice %75 {offsets = [1, 0], sizes = [1, 64], strides = [1, 1]} : vector<8x64xf32> to vector<1x64xf32>
    %114 = vector.broadcast %113 : vector<1x64xf32> to vector<16x64xf32>
    %115 = arith.mulf %114, %66 : vector<16x64xf32>
    %116 = math.exp %115 : vector<16x64xf32>
    %117 = arith.mulf %116, %99 : vector<16x64xf32>
    %118 = vector.extract_strided_slice %77 {offsets = [1, 0], sizes = [1, 64], strides = [1, 1]} : vector<8x64xf32> to vector<1x64xf32>
    %119 = vector.broadcast %118 : vector<1x64xf32> to vector<16x64xf32>
    %120 = vector.broadcast %111 : vector<16x1xf32> to vector<16x64xf32>
    %121 = arith.mulf %119, %120 : vector<16x64xf32>
    %122 = arith.addf %117, %121 : vector<16x64xf32>
    %123 = vector.broadcast %112 : vector<16x1xf32> to vector<16x64xf32>
    %124 = arith.mulf %122, %123 : vector<16x64xf32>
    %cst_46 = arith.constant dense<0.000000e+00> : vector<64xf32>
    %125 = vector.multi_reduction <add>, %124, %cst_46 [0] : vector<16x64xf32> to vector<64xf32>
    %126 = vector.shape_cast %125 : vector<64xf32> to vector<1x64xf32>
    %127 = vector.extract_strided_slice %79 {offsets = [2, 0], sizes = [1, 32], strides = [1, 1]} : vector<8x32xf32> to vector<1x32xf32>
    %128 = vector.shape_cast %127 : vector<1x32xf32> to vector<1x32xf32>
    %129 = vector.broadcast %128 : vector<1x32xf32> to vector<32x32xf32>
    %cst_47 = arith.constant 0.000000e+00 : f32
    %130 = vector.broadcast %cst_47 : f32 to vector<32x32xf32>
    %131 = arith.select %69, %129, %130 : vector<32x32xi1>, vector<32x32xf32>
    %cst_48 = arith.constant dense<0.000000e+00> : vector<32xf32>
    %132 = vector.multi_reduction <add>, %131, %cst_48 [1] : vector<32x32xf32> to vector<32xf32>
    %133 = vector.shape_cast %132 : vector<32xf32> to vector<32x1xf32>
    %134 = vector.extract_strided_slice %133 {offsets = [0, 0], sizes = [16, 1], strides = [1, 1]} : vector<32x1xf32> to vector<16x1xf32>
    %135 = vector.extract_strided_slice %133 {offsets = [16, 0], sizes = [16, 1], strides = [1, 1]} : vector<32x1xf32> to vector<16x1xf32>
    %136 = vector.extract_strided_slice %75 {offsets = [2, 0], sizes = [1, 64], strides = [1, 1]} : vector<8x64xf32> to vector<1x64xf32>
    %137 = vector.broadcast %136 : vector<1x64xf32> to vector<16x64xf32>
    %138 = arith.mulf %137, %66 : vector<16x64xf32>
    %139 = math.exp %138 : vector<16x64xf32>
    %140 = arith.mulf %139, %122 : vector<16x64xf32>
    %141 = vector.extract_strided_slice %77 {offsets = [2, 0], sizes = [1, 64], strides = [1, 1]} : vector<8x64xf32> to vector<1x64xf32>
    %142 = vector.broadcast %141 : vector<1x64xf32> to vector<16x64xf32>
    %143 = vector.broadcast %134 : vector<16x1xf32> to vector<16x64xf32>
    %144 = arith.mulf %142, %143 : vector<16x64xf32>
    %145 = arith.addf %140, %144 : vector<16x64xf32>
    %146 = vector.broadcast %135 : vector<16x1xf32> to vector<16x64xf32>
    %147 = arith.mulf %145, %146 : vector<16x64xf32>
    %cst_49 = arith.constant dense<0.000000e+00> : vector<64xf32>
    %148 = vector.multi_reduction <add>, %147, %cst_49 [0] : vector<16x64xf32> to vector<64xf32>
    %149 = vector.shape_cast %148 : vector<64xf32> to vector<1x64xf32>
    %150 = vector.extract_strided_slice %79 {offsets = [3, 0], sizes = [1, 32], strides = [1, 1]} : vector<8x32xf32> to vector<1x32xf32>
    %151 = vector.shape_cast %150 : vector<1x32xf32> to vector<1x32xf32>
    %152 = vector.broadcast %151 : vector<1x32xf32> to vector<32x32xf32>
    %cst_50 = arith.constant 0.000000e+00 : f32
    %153 = vector.broadcast %cst_50 : f32 to vector<32x32xf32>
    %154 = arith.select %69, %152, %153 : vector<32x32xi1>, vector<32x32xf32>
    %cst_51 = arith.constant dense<0.000000e+00> : vector<32xf32>
    %155 = vector.multi_reduction <add>, %154, %cst_51 [1] : vector<32x32xf32> to vector<32xf32>
    %156 = vector.shape_cast %155 : vector<32xf32> to vector<32x1xf32>
    %157 = vector.extract_strided_slice %156 {offsets = [0, 0], sizes = [16, 1], strides = [1, 1]} : vector<32x1xf32> to vector<16x1xf32>
    %158 = vector.extract_strided_slice %156 {offsets = [16, 0], sizes = [16, 1], strides = [1, 1]} : vector<32x1xf32> to vector<16x1xf32>
    %159 = vector.extract_strided_slice %75 {offsets = [3, 0], sizes = [1, 64], strides = [1, 1]} : vector<8x64xf32> to vector<1x64xf32>
    %160 = vector.broadcast %159 : vector<1x64xf32> to vector<16x64xf32>
    %161 = arith.mulf %160, %66 : vector<16x64xf32>
    %162 = math.exp %161 : vector<16x64xf32>
    %163 = arith.mulf %162, %145 : vector<16x64xf32>
    %164 = vector.extract_strided_slice %77 {offsets = [3, 0], sizes = [1, 64], strides = [1, 1]} : vector<8x64xf32> to vector<1x64xf32>
    %165 = vector.broadcast %164 : vector<1x64xf32> to vector<16x64xf32>
    %166 = vector.broadcast %157 : vector<16x1xf32> to vector<16x64xf32>
    %167 = arith.mulf %165, %166 : vector<16x64xf32>
    %168 = arith.addf %163, %167 : vector<16x64xf32>
    %169 = vector.broadcast %158 : vector<16x1xf32> to vector<16x64xf32>
    %170 = arith.mulf %168, %169 : vector<16x64xf32>
    %cst_52 = arith.constant dense<0.000000e+00> : vector<64xf32>
    %171 = vector.multi_reduction <add>, %170, %cst_52 [0] : vector<16x64xf32> to vector<64xf32>
    %172 = vector.shape_cast %171 : vector<64xf32> to vector<1x64xf32>
    %173 = vector.extract_strided_slice %79 {offsets = [4, 0], sizes = [1, 32], strides = [1, 1]} : vector<8x32xf32> to vector<1x32xf32>
    %174 = vector.shape_cast %173 : vector<1x32xf32> to vector<1x32xf32>
    %175 = vector.broadcast %174 : vector<1x32xf32> to vector<32x32xf32>
    %cst_53 = arith.constant 0.000000e+00 : f32
    %176 = vector.broadcast %cst_53 : f32 to vector<32x32xf32>
    %177 = arith.select %69, %175, %176 : vector<32x32xi1>, vector<32x32xf32>
    %cst_54 = arith.constant dense<0.000000e+00> : vector<32xf32>
    %178 = vector.multi_reduction <add>, %177, %cst_54 [1] : vector<32x32xf32> to vector<32xf32>
    %179 = vector.shape_cast %178 : vector<32xf32> to vector<32x1xf32>
    %180 = vector.extract_strided_slice %179 {offsets = [0, 0], sizes = [16, 1], strides = [1, 1]} : vector<32x1xf32> to vector<16x1xf32>
    %181 = vector.extract_strided_slice %179 {offsets = [16, 0], sizes = [16, 1], strides = [1, 1]} : vector<32x1xf32> to vector<16x1xf32>
    %182 = vector.extract_strided_slice %75 {offsets = [4, 0], sizes = [1, 64], strides = [1, 1]} : vector<8x64xf32> to vector<1x64xf32>
    %183 = vector.broadcast %182 : vector<1x64xf32> to vector<16x64xf32>
    %184 = arith.mulf %183, %66 : vector<16x64xf32>
    %185 = math.exp %184 : vector<16x64xf32>
    %186 = arith.mulf %185, %168 : vector<16x64xf32>
    %187 = vector.extract_strided_slice %77 {offsets = [4, 0], sizes = [1, 64], strides = [1, 1]} : vector<8x64xf32> to vector<1x64xf32>
    %188 = vector.broadcast %187 : vector<1x64xf32> to vector<16x64xf32>
    %189 = vector.broadcast %180 : vector<16x1xf32> to vector<16x64xf32>
    %190 = arith.mulf %188, %189 : vector<16x64xf32>
    %191 = arith.addf %186, %190 : vector<16x64xf32>
    %192 = vector.broadcast %181 : vector<16x1xf32> to vector<16x64xf32>
    %193 = arith.mulf %191, %192 : vector<16x64xf32>
    %cst_55 = arith.constant dense<0.000000e+00> : vector<64xf32>
    %194 = vector.multi_reduction <add>, %193, %cst_55 [0] : vector<16x64xf32> to vector<64xf32>
    %195 = vector.shape_cast %194 : vector<64xf32> to vector<1x64xf32>
    %196 = vector.extract_strided_slice %79 {offsets = [5, 0], sizes = [1, 32], strides = [1, 1]} : vector<8x32xf32> to vector<1x32xf32>
    %197 = vector.shape_cast %196 : vector<1x32xf32> to vector<1x32xf32>
    %198 = vector.broadcast %197 : vector<1x32xf32> to vector<32x32xf32>
    %cst_56 = arith.constant 0.000000e+00 : f32
    %199 = vector.broadcast %cst_56 : f32 to vector<32x32xf32>
    %200 = arith.select %69, %198, %199 : vector<32x32xi1>, vector<32x32xf32>
    %cst_57 = arith.constant dense<0.000000e+00> : vector<32xf32>
    %201 = vector.multi_reduction <add>, %200, %cst_57 [1] : vector<32x32xf32> to vector<32xf32>
    %202 = vector.shape_cast %201 : vector<32xf32> to vector<32x1xf32>
    %203 = vector.extract_strided_slice %202 {offsets = [0, 0], sizes = [16, 1], strides = [1, 1]} : vector<32x1xf32> to vector<16x1xf32>
    %204 = vector.extract_strided_slice %202 {offsets = [16, 0], sizes = [16, 1], strides = [1, 1]} : vector<32x1xf32> to vector<16x1xf32>
    %205 = vector.extract_strided_slice %75 {offsets = [5, 0], sizes = [1, 64], strides = [1, 1]} : vector<8x64xf32> to vector<1x64xf32>
    %206 = vector.broadcast %205 : vector<1x64xf32> to vector<16x64xf32>
    %207 = arith.mulf %206, %66 : vector<16x64xf32>
    %208 = math.exp %207 : vector<16x64xf32>
    %209 = arith.mulf %208, %191 : vector<16x64xf32>
    %210 = vector.extract_strided_slice %77 {offsets = [5, 0], sizes = [1, 64], strides = [1, 1]} : vector<8x64xf32> to vector<1x64xf32>
    %211 = vector.broadcast %210 : vector<1x64xf32> to vector<16x64xf32>
    %212 = vector.broadcast %203 : vector<16x1xf32> to vector<16x64xf32>
    %213 = arith.mulf %211, %212 : vector<16x64xf32>
    %214 = arith.addf %209, %213 : vector<16x64xf32>
    %215 = vector.broadcast %204 : vector<16x1xf32> to vector<16x64xf32>
    %216 = arith.mulf %214, %215 : vector<16x64xf32>
    %cst_58 = arith.constant dense<0.000000e+00> : vector<64xf32>
    %217 = vector.multi_reduction <add>, %216, %cst_58 [0] : vector<16x64xf32> to vector<64xf32>
    %218 = vector.shape_cast %217 : vector<64xf32> to vector<1x64xf32>
    %219 = vector.extract_strided_slice %79 {offsets = [6, 0], sizes = [1, 32], strides = [1, 1]} : vector<8x32xf32> to vector<1x32xf32>
    %220 = vector.shape_cast %219 : vector<1x32xf32> to vector<1x32xf32>
    %221 = vector.broadcast %220 : vector<1x32xf32> to vector<32x32xf32>
    %cst_59 = arith.constant 0.000000e+00 : f32
    %222 = vector.broadcast %cst_59 : f32 to vector<32x32xf32>
    %223 = arith.select %69, %221, %222 : vector<32x32xi1>, vector<32x32xf32>
    %cst_60 = arith.constant dense<0.000000e+00> : vector<32xf32>
    %224 = vector.multi_reduction <add>, %223, %cst_60 [1] : vector<32x32xf32> to vector<32xf32>
    %225 = vector.shape_cast %224 : vector<32xf32> to vector<32x1xf32>
    %226 = vector.extract_strided_slice %225 {offsets = [0, 0], sizes = [16, 1], strides = [1, 1]} : vector<32x1xf32> to vector<16x1xf32>
    %227 = vector.extract_strided_slice %225 {offsets = [16, 0], sizes = [16, 1], strides = [1, 1]} : vector<32x1xf32> to vector<16x1xf32>
    %228 = vector.extract_strided_slice %75 {offsets = [6, 0], sizes = [1, 64], strides = [1, 1]} : vector<8x64xf32> to vector<1x64xf32>
    %229 = vector.broadcast %228 : vector<1x64xf32> to vector<16x64xf32>
    %230 = arith.mulf %229, %66 : vector<16x64xf32>
    %231 = math.exp %230 : vector<16x64xf32>
    %232 = arith.mulf %231, %214 : vector<16x64xf32>
    %233 = vector.extract_strided_slice %77 {offsets = [6, 0], sizes = [1, 64], strides = [1, 1]} : vector<8x64xf32> to vector<1x64xf32>
    %234 = vector.broadcast %233 : vector<1x64xf32> to vector<16x64xf32>
    %235 = vector.broadcast %226 : vector<16x1xf32> to vector<16x64xf32>
    %236 = arith.mulf %234, %235 : vector<16x64xf32>
    %237 = arith.addf %232, %236 : vector<16x64xf32>
    %238 = vector.broadcast %227 : vector<16x1xf32> to vector<16x64xf32>
    %239 = arith.mulf %237, %238 : vector<16x64xf32>
    %cst_61 = arith.constant dense<0.000000e+00> : vector<64xf32>
    %240 = vector.multi_reduction <add>, %239, %cst_61 [0] : vector<16x64xf32> to vector<64xf32>
    %241 = vector.shape_cast %240 : vector<64xf32> to vector<1x64xf32>
    %242 = vector.extract_strided_slice %79 {offsets = [7, 0], sizes = [1, 32], strides = [1, 1]} : vector<8x32xf32> to vector<1x32xf32>
    %243 = vector.shape_cast %242 : vector<1x32xf32> to vector<1x32xf32>
    %244 = vector.broadcast %243 : vector<1x32xf32> to vector<32x32xf32>
    %cst_62 = arith.constant 0.000000e+00 : f32
    %245 = vector.broadcast %cst_62 : f32 to vector<32x32xf32>
    %246 = arith.select %69, %244, %245 : vector<32x32xi1>, vector<32x32xf32>
    %cst_63 = arith.constant dense<0.000000e+00> : vector<32xf32>
    %247 = vector.multi_reduction <add>, %246, %cst_63 [1] : vector<32x32xf32> to vector<32xf32>
    %248 = vector.shape_cast %247 : vector<32xf32> to vector<32x1xf32>
    %249 = vector.extract_strided_slice %248 {offsets = [0, 0], sizes = [16, 1], strides = [1, 1]} : vector<32x1xf32> to vector<16x1xf32>
    %250 = vector.extract_strided_slice %248 {offsets = [16, 0], sizes = [16, 1], strides = [1, 1]} : vector<32x1xf32> to vector<16x1xf32>
    %251 = vector.extract_strided_slice %75 {offsets = [7, 0], sizes = [1, 64], strides = [1, 1]} : vector<8x64xf32> to vector<1x64xf32>
    %252 = vector.broadcast %251 : vector<1x64xf32> to vector<16x64xf32>
    %253 = arith.mulf %252, %66 : vector<16x64xf32>
    %254 = math.exp %253 : vector<16x64xf32>
    %255 = arith.mulf %254, %237 : vector<16x64xf32>
    %256 = vector.extract_strided_slice %77 {offsets = [7, 0], sizes = [1, 64], strides = [1, 1]} : vector<8x64xf32> to vector<1x64xf32>
    %257 = vector.broadcast %256 : vector<1x64xf32> to vector<16x64xf32>
    %258 = vector.broadcast %249 : vector<16x1xf32> to vector<16x64xf32>
    %259 = arith.mulf %257, %258 : vector<16x64xf32>
    %260 = arith.addf %255, %259 : vector<16x64xf32>
    %261 = vector.broadcast %250 : vector<16x1xf32> to vector<16x64xf32>
    %262 = arith.mulf %260, %261 : vector<16x64xf32>
    %cst_64 = arith.constant dense<0.000000e+00> : vector<64xf32>
    %263 = vector.multi_reduction <add>, %262, %cst_64 [0] : vector<16x64xf32> to vector<64xf32>
    %264 = vector.shape_cast %263 : vector<64xf32> to vector<1x64xf32>
    %c0_65 = arith.constant 0 : index
    %c0_66 = arith.constant 0 : index
    %265 = vector.load %arg13[%c0_65, %c0_66] : memref<16x64xf32, #tpu.memory_space<vmem>>, vector<16x64xf32>
    tpu.vector_store %arg13[%c0_65, %c0_66], %260 {strides = array<i32>} : memref<16x64xf32, #tpu.memory_space<vmem>>, vector<16x64xf32>,
    %266 = tpu.concatenate %103, %126, %149, %172, %195, %218, %241, %264 in 0 : vector<1x64xf32>, vector<1x64xf32>, vector<1x64xf32>, vector<1x64xf32>, vector<1x64xf32>, vector<1x64xf32>, vector<1x64xf32>, vector<1x64xf32> -> vector<8x64xf32>
    %267 = arith.index_cast %73 : i32 to index
    %c0_67 = arith.constant 0 : index
    %268 = vector.load %arg18[%267, %c0_67] : memref<8x64xf32, #tpu.memory_space<vmem>>, vector<8x64xf32>
    tpu.vector_store %arg18[%267, %c0_67], %266 {strides = array<i32>} : memref<8x64xf32, #tpu.memory_space<vmem>>, vector<8x64xf32>,
    %c1_i32_68 = arith.constant 1 : i32
    %c0_69 = arith.constant 0 : index
    %c0_70 = arith.constant 0 : index
    %269 = vector.load %arg18[%c0_69, %c0_70] : memref<8x64xf32, #tpu.memory_space<vmem>>, vector<8x64xf32>
    %c0_71 = arith.constant 0 : index
    %c0_72 = arith.constant 0 : index
    %270 = vector.load %arg10[%c0_71, %c0_72] : memref<1x64xf32, #tpu.memory_space<vmem>>, vector<1x64xf32>
    %271 = vector.broadcast %270 : vector<1x64xf32> to vector<8x64xf32>
    %272 = arith.mulf %43, %271 : vector<8x64xf32>
    %273 = arith.addf %269, %272 : vector<8x64xf32>
    %cst_73 = arith.constant 0.000000e+00 : f32
    %274 = vector.broadcast %cst_73 : f32 to vector<8x64xf32>
    %275 = arith.subf %274, %8 : vector<8x64xf32>
    %276 = math.exp %275 : vector<8x64xf32>
    %cst_74 = arith.constant 1.000000e+00 : f32
    %277 = vector.broadcast %cst_74 : f32 to vector<8x64xf32>
    %278 = arith.addf %277, %276 : vector<8x64xf32>
    %cst_75 = arith.constant 1.000000e+00 : f32
    %279 = vector.broadcast %cst_75 : f32 to vector<8x64xf32>
    %280 = arith.divf %279, %278 : vector<8x64xf32>
    %281 = arith.mulf %8, %280 : vector<8x64xf32>
    %282 = arith.mulf %273, %281 : vector<8x64xf32>
    %283 = arith.truncf %282 : vector<8x64xf32> to vector<8x64xbf16>
    %c0_76 = arith.constant 0 : index
    %c0_77 = arith.constant 0 : index
    %284 = vector.load %arg11[%c0_76, %c0_77] : memref<64x32xbf16, #tpu.memory_space<vmem>>, vector<64x32xbf16>
    %cst_78 = arith.constant dense<0.000000e+00> : vector<8x32xf32>
    %285 = tpu.matmul %283, %284, %cst_78 {dimension_numbers = #tpu.dot_dimension_numbers<[1], [0], [0], [1], [0, 0, 1, 1], [], []>} : vector<8x64xbf16>, vector<64x32xbf16>, vector<8x32xf32> -> vector<8x32xf32>
    %c0_79 = arith.constant 0 : index
    %c0_80 = arith.constant 0 : index
    %286 = vector.load %arg12[%c0_79, %c0_80] : memref<8x32xf32, #tpu.memory_space<vmem>>, vector<8x32xf32>
    tpu.vector_store %arg12[%c0_79, %c0_80], %285 {strides = array<i32>} : memref<8x32xf32, #tpu.memory_space<vmem>>, vector<8x32xf32>,
    return
  }
  func.func @transform_0(%arg0: i32, %arg1: i32) -> (i32, i32) {
    %c1_i32 = arith.constant 1 : i32
    %0 = arith.muli %arg0, %c1_i32 : i32
    %1 = arith.addi %0, %arg1 : i32
    %c0_i32 = arith.constant 0 : i32
    %c0_i32_0 = arith.constant 0 : i32
    return %1, %c0_i32 : i32, i32
  }
  func.func @transform_1(%arg0: i32, %arg1: i32) -> (i32, i32) {
    %c0_i32 = arith.constant 0 : i32
    %c0_i32_0 = arith.constant 0 : i32
    %c0_i32_1 = arith.constant 0 : i32
    return %c0_i32, %c0_i32_0 : i32, i32
  }
  func.func @transform_2(%arg0: i32, %arg1: i32) -> (i32, i32) {
    %c0_i32 = arith.constant 0 : i32
    %c0_i32_0 = arith.constant 0 : i32
    %c0_i32_1 = arith.constant 0 : i32
    return %c0_i32, %c0_i32_0 : i32, i32
  }
  func.func @transform_3(%arg0: i32, %arg1: i32) -> (i32, i32) {
    %c0_i32 = arith.constant 0 : i32
    %c0_i32_0 = arith.constant 0 : i32
    %c0_i32_1 = arith.constant 0 : i32
    return %c0_i32, %c0_i32_0 : i32, i32
  }
  func.func @transform_4(%arg0: i32, %arg1: i32) -> (i32, i32) {
    %c0_i32 = arith.constant 0 : i32
    %c0_i32_0 = arith.constant 0 : i32
    %c0_i32_1 = arith.constant 0 : i32
    return %c0_i32, %c0_i32_0 : i32, i32
  }
  func.func @transform_5(%arg0: i32, %arg1: i32) -> (i32, i32) {
    %c0_i32 = arith.constant 0 : i32
    %c0_i32_0 = arith.constant 0 : i32
    %c0_i32_1 = arith.constant 0 : i32
    return %c0_i32, %c0_i32_0 : i32, i32
  }
  func.func @transform_6(%arg0: i32, %arg1: i32) -> (i32, i32) {
    %c0_i32 = arith.constant 0 : i32
    %c0_i32_0 = arith.constant 0 : i32
    %c0_i32_1 = arith.constant 0 : i32
    return %c0_i32, %c0_i32_0 : i32, i32
  }
  func.func @transform_7(%arg0: i32, %arg1: i32) -> (i32, i32) {
    %c0_i32 = arith.constant 0 : i32
    %c0_i32_0 = arith.constant 0 : i32
    %c0_i32_1 = arith.constant 0 : i32
    return %c0_i32, %c0_i32_0 : i32, i32
  }
  func.func @transform_8(%arg0: i32, %arg1: i32) -> (i32, i32) {
    %c0_i32 = arith.constant 0 : i32
    %c0_i32_0 = arith.constant 0 : i32
    %c0_i32_1 = arith.constant 0 : i32
    return %c0_i32, %c0_i32_0 : i32, i32
  }
  func.func @transform_9(%arg0: i32, %arg1: i32) -> (i32, i32) {
    %c0_i32 = arith.constant 0 : i32
    %c0_i32_0 = arith.constant 0 : i32
    %c0_i32_1 = arith.constant 0 : i32
    return %c0_i32, %c0_i32_0 : i32, i32
  }
  func.func @transform_10(%arg0: i32, %arg1: i32) -> (i32, i32) {
    %c1_i32 = arith.constant 1 : i32
    %0 = arith.muli %arg0, %c1_i32 : i32
    %1 = arith.addi %0, %arg1 : i32
    %c0_i32 = arith.constant 0 : i32
    %c0_i32_0 = arith.constant 0 : i32
    return %1, %c0_i32 : i32, i32
  }
}

module attributes {stable_mosaic.version = 11 : i64} {
  func.func @_gate_softmax_kernel(%arg0: i32, %arg1: memref<16x32xf32, #tpu.memory_space<vmem>>, %arg2: memref<32x4xbf16, #tpu.memory_space<vmem>>, %arg3: memref<1x4xf32, #tpu.memory_space<vmem>>, %arg4: memref<16x4xf32, #tpu.memory_space<vmem>>) attributes {dimension_semantics = [#tpu.dimension_semantics<parallel>], iteration_bounds = array<i64: 1>, scalar_prefetch = 0 : i64, scratch_operands = 0 : i64, tpu.core_type = #tpu.core_type<tc>, window_params = [{transform_indices = @transform_0, window_bounds = array<i64: 16, 32>}, {pipeline_mode = #tpu.pipeline_mode<synchronous>, transform_indices = @transform_1, window_bounds = array<i64: 32, 4>}, {pipeline_mode = #tpu.pipeline_mode<synchronous>, transform_indices = @transform_2, window_bounds = array<i64: 1, 4>}, {transform_indices = @transform_3, window_bounds = array<i64: 16, 4>}]} {
    %c0 = arith.constant 0 : index
    %c0_0 = arith.constant 0 : index
    %0 = vector.load %arg1[%c0, %c0_0] : memref<16x32xf32, #tpu.memory_space<vmem>>, vector<16x32xf32>
    %1 = arith.truncf %0 : vector<16x32xf32> to vector<16x32xbf16>
    %c0_1 = arith.constant 0 : index
    %c0_2 = arith.constant 0 : index
    %2 = vector.load %arg2[%c0_1, %c0_2] : memref<32x4xbf16, #tpu.memory_space<vmem>>, vector<32x4xbf16>
    %cst = arith.constant dense<0.000000e+00> : vector<16x4xf32>
    %3 = tpu.matmul %1, %2, %cst {dimension_numbers = #tpu.dot_dimension_numbers<[1], [0], [0], [1], [0, 0, 1, 1], [], []>} : vector<16x32xbf16>, vector<32x4xbf16>, vector<16x4xf32> -> vector<16x4xf32>
    %c0_3 = arith.constant 0 : index
    %c0_4 = arith.constant 0 : index
    %4 = vector.load %arg3[%c0_3, %c0_4] : memref<1x4xf32, #tpu.memory_space<vmem>>, vector<1x4xf32>
    %5 = vector.broadcast %4 : vector<1x4xf32> to vector<16x4xf32>
    %6 = arith.addf %3, %5 : vector<16x4xf32>
    %cst_5 = arith.constant dense<0xFF800000> : vector<16xf32>
    %7 = vector.multi_reduction <maximumf>, %6, %cst_5 [1] : vector<16x4xf32> to vector<16xf32>
    %8 = vector.shape_cast %7 : vector<16xf32> to vector<16x1xf32>
    %9 = vector.broadcast %8 : vector<16x1xf32> to vector<16x4xf32>
    %10 = arith.subf %6, %9 : vector<16x4xf32>
    %11 = math.exp %10 : vector<16x4xf32>
    %cst_6 = arith.constant dense<0.000000e+00> : vector<16xf32>
    %12 = vector.multi_reduction <add>, %11, %cst_6 [1] : vector<16x4xf32> to vector<16xf32>
    %13 = vector.shape_cast %12 : vector<16xf32> to vector<16x1xf32>
    %14 = tpu.reciprocal %13 {approx = true} : vector<16x1xf32> -> vector<16x1xf32>
    %15 = vector.broadcast %14 : vector<16x1xf32> to vector<16x4xf32>
    %16 = arith.mulf %11, %15 : vector<16x4xf32>
    %c0_7 = arith.constant 0 : index
    %c0_8 = arith.constant 0 : index
    %17 = vector.load %arg4[%c0_7, %c0_8] : memref<16x4xf32, #tpu.memory_space<vmem>>, vector<16x4xf32>
    tpu.vector_store %arg4[%c0_7, %c0_8], %16 {strides = array<i32>} : memref<16x4xf32, #tpu.memory_space<vmem>>, vector<16x4xf32>,
    return
  }
  func.func @transform_0(%arg0: i32) -> (i32, i32) {
    %c0_i32 = arith.constant 0 : i32
    %c0_i32_0 = arith.constant 0 : i32
    return %arg0, %c0_i32 : i32, i32
  }
  func.func @transform_1(%arg0: i32) -> (i32, i32) {
    %c0_i32 = arith.constant 0 : i32
    %c0_i32_0 = arith.constant 0 : i32
    %c0_i32_1 = arith.constant 0 : i32
    return %c0_i32, %c0_i32_0 : i32, i32
  }
  func.func @transform_2(%arg0: i32) -> (i32, i32) {
    %c0_i32 = arith.constant 0 : i32
    %c0_i32_0 = arith.constant 0 : i32
    %c0_i32_1 = arith.constant 0 : i32
    return %c0_i32, %c0_i32_0 : i32, i32
  }
  func.func @transform_3(%arg0: i32) -> (i32, i32) {
    %c0_i32 = arith.constant 0 : i32
    %c0_i32_0 = arith.constant 0 : i32
    return %arg0, %c0_i32 : i32, i32
  }
}

module attributes {stable_mosaic.version = 11 : i64} {
  func.func @_gate_mask_kernel(%arg0: i32, %arg1: memref<2x8x4xf32, #tpu.memory_space<vmem>>, %arg2: memref<2x8x4xf32, #tpu.memory_space<vmem>>, %arg3: memref<1x4xi32, #tpu.memory_space<vmem>>) attributes {dimension_semantics = [#tpu.dimension_semantics<arbitrary>], iteration_bounds = array<i64: 1>, scalar_prefetch = 0 : i64, scratch_operands = 0 : i64, tpu.core_type = #tpu.core_type<tc>, window_params = [{pipeline_mode = #tpu.pipeline_mode<synchronous>, transform_indices = @transform_0, window_bounds = array<i64: 2, 8, 4>}, {pipeline_mode = #tpu.pipeline_mode<synchronous>, transform_indices = @transform_1, window_bounds = array<i64: 2, 8, 4>}, {pipeline_mode = #tpu.pipeline_mode<synchronous>, transform_indices = @transform_2, window_bounds = array<i64: 1, 4>}]} {
    %c0 = arith.constant 0 : index
    %c0_0 = arith.constant 0 : index
    %c0_1 = arith.constant 0 : index
    %0 = vector.load %arg1[%c0, %c0_0, %c0_1] : memref<2x8x4xf32, #tpu.memory_space<vmem>>, vector<2x8x4xf32>
    %cst = arith.constant dense<0xFF800000> : vector<2x8xf32>
    %1 = vector.multi_reduction <maximumf>, %0, %cst [2] : vector<2x8x4xf32> to vector<2x8xf32>
    %2 = vector.shape_cast %1 : vector<2x8xf32> to vector<2x8x1xf32>
    %3 = tpu.iota {dimensions = array<i32: 2>} : vector<2x8x4xi32>
    %4 = vector.broadcast %2 : vector<2x8x1xf32> to vector<2x8x4xf32>
    %5 = arith.cmpf oeq, %0, %4 : vector<2x8x4xf32>
    %c4_i32 = arith.constant 4 : i32
    %6 = vector.broadcast %c4_i32 : i32 to vector<2x8x4xi32>
    %7 = arith.select %5, %3, %6 : vector<2x8x4xi1>, vector<2x8x4xi32>
    %cst_2 = arith.constant dense<2147483647> : vector<2x8xi32>
    %8 = vector.multi_reduction <minsi>, %7, %cst_2 [2] : vector<2x8x4xi32> to vector<2x8xi32>
    %9 = tpu.iota {dimensions = array<i32: 1>} : vector<2x8xi32>
    %cst_3 = arith.constant 0.000000e+00 : f32
    %10 = vector.broadcast %cst_3 : f32 to vector<2x8xf32>
    %c0_i32 = arith.constant 0 : i32
    %11 = vector.broadcast %c0_i32 : i32 to vector<2x8xi32>
    %12 = arith.cmpi eq, %8, %11 : vector<2x8xi32>
    %cst_4 = arith.constant 1.000000e+00 : f32
    %cst_5 = arith.constant 0.000000e+00 : f32
    %13 = vector.broadcast %cst_4 : f32 to vector<2x8xf32>
    %14 = vector.broadcast %cst_5 : f32 to vector<2x8xf32>
    %15 = arith.select %12, %13, %14 : vector<2x8xi1>, vector<2x8xf32>
    %cst_6 = arith.constant dense<0xFF800000> : vector<2xf32>
    %16 = vector.multi_reduction <maximumf>, %15, %cst_6 [1] : vector<2x8xf32> to vector<2xf32>
    %17 = vector.shape_cast %16 : vector<2xf32> to vector<2x1xf32>
    %c0_i32_7 = arith.constant 0 : i32
    %18 = vector.broadcast %c0_i32_7 : i32 to vector<2x8xi32>
    %19 = arith.cmpi eq, %9, %18 : vector<2x8xi32>
    %cst_8 = arith.constant 0.000000e+00 : f32
    %20 = vector.shape_cast %17 : vector<2x1xf32> to vector<2x1xf32>
    %21 = vector.broadcast %20 : vector<2x1xf32> to vector<2x8xf32>
    %22 = vector.broadcast %cst_8 : f32 to vector<2x8xf32>
    %23 = arith.select %19, %21, %22 : vector<2x8xi1>, vector<2x8xf32>
    %24 = arith.addf %10, %23 : vector<2x8xf32>
    %c1_i32 = arith.constant 1 : i32
    %25 = vector.broadcast %c1_i32 : i32 to vector<2x8xi32>
    %26 = arith.cmpi eq, %8, %25 : vector<2x8xi32>
    %cst_9 = arith.constant 1.000000e+00 : f32
    %cst_10 = arith.constant 0.000000e+00 : f32
    %27 = vector.broadcast %cst_9 : f32 to vector<2x8xf32>
    %28 = vector.broadcast %cst_10 : f32 to vector<2x8xf32>
    %29 = arith.select %26, %27, %28 : vector<2x8xi1>, vector<2x8xf32>
    %cst_11 = arith.constant dense<0xFF800000> : vector<2xf32>
    %30 = vector.multi_reduction <maximumf>, %29, %cst_11 [1] : vector<2x8xf32> to vector<2xf32>
    %31 = vector.shape_cast %30 : vector<2xf32> to vector<2x1xf32>
    %c1_i32_12 = arith.constant 1 : i32
    %32 = vector.broadcast %c1_i32_12 : i32 to vector<2x8xi32>
    %33 = arith.cmpi eq, %9, %32 : vector<2x8xi32>
    %cst_13 = arith.constant 0.000000e+00 : f32
    %34 = vector.shape_cast %31 : vector<2x1xf32> to vector<2x1xf32>
    %35 = vector.broadcast %34 : vector<2x1xf32> to vector<2x8xf32>
    %36 = vector.broadcast %cst_13 : f32 to vector<2x8xf32>
    %37 = arith.select %33, %35, %36 : vector<2x8xi1>, vector<2x8xf32>
    %38 = arith.addf %24, %37 : vector<2x8xf32>
    %c2_i32 = arith.constant 2 : i32
    %39 = vector.broadcast %c2_i32 : i32 to vector<2x8xi32>
    %40 = arith.cmpi eq, %8, %39 : vector<2x8xi32>
    %cst_14 = arith.constant 1.000000e+00 : f32
    %cst_15 = arith.constant 0.000000e+00 : f32
    %41 = vector.broadcast %cst_14 : f32 to vector<2x8xf32>
    %42 = vector.broadcast %cst_15 : f32 to vector<2x8xf32>
    %43 = arith.select %40, %41, %42 : vector<2x8xi1>, vector<2x8xf32>
    %cst_16 = arith.constant dense<0xFF800000> : vector<2xf32>
    %44 = vector.multi_reduction <maximumf>, %43, %cst_16 [1] : vector<2x8xf32> to vector<2xf32>
    %45 = vector.shape_cast %44 : vector<2xf32> to vector<2x1xf32>
    %c2_i32_17 = arith.constant 2 : i32
    %46 = vector.broadcast %c2_i32_17 : i32 to vector<2x8xi32>
    %47 = arith.cmpi eq, %9, %46 : vector<2x8xi32>
    %cst_18 = arith.constant 0.000000e+00 : f32
    %48 = vector.shape_cast %45 : vector<2x1xf32> to vector<2x1xf32>
    %49 = vector.broadcast %48 : vector<2x1xf32> to vector<2x8xf32>
    %50 = vector.broadcast %cst_18 : f32 to vector<2x8xf32>
    %51 = arith.select %47, %49, %50 : vector<2x8xi1>, vector<2x8xf32>
    %52 = arith.addf %38, %51 : vector<2x8xf32>
    %c3_i32 = arith.constant 3 : i32
    %53 = vector.broadcast %c3_i32 : i32 to vector<2x8xi32>
    %54 = arith.cmpi eq, %8, %53 : vector<2x8xi32>
    %cst_19 = arith.constant 1.000000e+00 : f32
    %cst_20 = arith.constant 0.000000e+00 : f32
    %55 = vector.broadcast %cst_19 : f32 to vector<2x8xf32>
    %56 = vector.broadcast %cst_20 : f32 to vector<2x8xf32>
    %57 = arith.select %54, %55, %56 : vector<2x8xi1>, vector<2x8xf32>
    %cst_21 = arith.constant dense<0xFF800000> : vector<2xf32>
    %58 = vector.multi_reduction <maximumf>, %57, %cst_21 [1] : vector<2x8xf32> to vector<2xf32>
    %59 = vector.shape_cast %58 : vector<2xf32> to vector<2x1xf32>
    %c3_i32_22 = arith.constant 3 : i32
    %60 = vector.broadcast %c3_i32_22 : i32 to vector<2x8xi32>
    %61 = arith.cmpi eq, %9, %60 : vector<2x8xi32>
    %cst_23 = arith.constant 0.000000e+00 : f32
    %62 = vector.shape_cast %59 : vector<2x1xf32> to vector<2x1xf32>
    %63 = vector.broadcast %62 : vector<2x1xf32> to vector<2x8xf32>
    %64 = vector.broadcast %cst_23 : f32 to vector<2x8xf32>
    %65 = arith.select %61, %63, %64 : vector<2x8xi1>, vector<2x8xf32>
    %66 = arith.addf %52, %65 : vector<2x8xf32>
    %67 = tpu.iota {dimensions = array<i32: 2>} : vector<2x8x4xi32>
    %c0_i32_24 = arith.constant 0 : i32
    %68 = vector.broadcast %c0_i32_24 : i32 to vector<2x8x4xi32>
    %69 = arith.cmpi eq, %67, %68 : vector<2x8x4xi32>
    %70 = vector.shape_cast %66 : vector<2x8xf32> to vector<2x8x1xf32>
    %71 = vector.broadcast %70 : vector<2x8x1xf32> to vector<2x8x4xf32>
    %72 = arith.mulf %0, %71 : vector<2x8x4xf32>
    %cst_25 = arith.constant 0.000000e+00 : f32
    %73 = vector.broadcast %cst_25 : f32 to vector<2x8x4xf32>
    %74 = arith.select %69, %72, %73 : vector<2x8x4xi1>, vector<2x8x4xf32>
    %cst_26 = arith.constant dense<0.000000e+00> : vector<8x4xf32>
    %75 = vector.multi_reduction <add>, %74, %cst_26 [0] : vector<2x8x4xf32> to vector<8x4xf32>
    %76 = vector.shape_cast %75 : vector<8x4xf32> to vector<1x8x4xf32>
    %cst_27 = arith.constant 9.99999997E-7 : f32
    %77 = vector.broadcast %cst_27 : f32 to vector<1x8x4xf32>
    %78 = arith.addf %76, %77 : vector<1x8x4xf32>
    %79 = vector.broadcast %78 : vector<1x8x4xf32> to vector<2x8x4xf32>
    %80 = arith.divf %74, %79 : vector<2x8x4xf32>
    %cst_28 = arith.constant 2.000000e+00 : f32
    %81 = vector.broadcast %cst_28 : f32 to vector<2x8x4xf32>
    %82 = arith.mulf %80, %81 : vector<2x8x4xf32>
    %83 = arith.cmpf one, %82, %82 : vector<2x8x4xf32>
    %cst_29 = arith.constant 0.000000e+00 : f32
    %84 = vector.broadcast %cst_29 : f32 to vector<2x8x4xf32>
    %85 = arith.select %83, %84, %82 : vector<2x8x4xi1>, vector<2x8x4xf32>
    %c0_30 = arith.constant 0 : index
    %c0_31 = arith.constant 0 : index
    %c0_32 = arith.constant 0 : index
    %86 = vector.load %arg2[%c0_30, %c0_31, %c0_32] : memref<2x8x4xf32, #tpu.memory_space<vmem>>, vector<2x8x4xf32>
    tpu.vector_store %arg2[%c0_30, %c0_31, %c0_32], %85 {strides = array<i32>} : memref<2x8x4xf32, #tpu.memory_space<vmem>>, vector<2x8x4xf32>,
    %cst_33 = arith.constant dense<0xFF800000> : vector<8x4xf32>
    %87 = vector.multi_reduction <maximumf>, %85, %cst_33 [0] : vector<2x8x4xf32> to vector<8x4xf32>
    %cst_34 = arith.constant dense<0xFF800000> : vector<4xf32>
    %88 = vector.multi_reduction <maximumf>, %87, %cst_34 [0] : vector<8x4xf32> to vector<4xf32>
    %89 = vector.shape_cast %88 : vector<4xf32> to vector<1x4xf32>
    %cst_35 = arith.constant 0.000000e+00 : f32
    %90 = vector.broadcast %cst_35 : f32 to vector<1x4xf32>
    %91 = arith.cmpf ogt, %89, %90 : vector<1x4xf32>
    %92 = arith.extui %91 : vector<1x4xi1> to vector<1x4xi32>
    %c0_36 = arith.constant 0 : index
    %c0_37 = arith.constant 0 : index
    %93 = vector.load %arg3[%c0_36, %c0_37] : memref<1x4xi32, #tpu.memory_space<vmem>>, vector<1x4xi32>
    tpu.vector_store %arg3[%c0_36, %c0_37], %92 {strides = array<i32>} : memref<1x4xi32, #tpu.memory_space<vmem>>, vector<1x4xi32>,
    return
  }
  func.func @transform_0(%arg0: i32) -> (i32, i32, i32) {
    %c0_i32 = arith.constant 0 : i32
    %c0_i32_0 = arith.constant 0 : i32
    %c0_i32_1 = arith.constant 0 : i32
    %c0_i32_2 = arith.constant 0 : i32
    return %c0_i32, %c0_i32_0, %c0_i32_1 : i32, i32, i32
  }
  func.func @transform_1(%arg0: i32) -> (i32, i32, i32) {
    %c0_i32 = arith.constant 0 : i32
    %c0_i32_0 = arith.constant 0 : i32
    %c0_i32_1 = arith.constant 0 : i32
    %c0_i32_2 = arith.constant 0 : i32
    return %c0_i32, %c0_i32_0, %c0_i32_1 : i32, i32, i32
  }
  func.func @transform_2(%arg0: i32) -> (i32, i32) {
    %c0_i32 = arith.constant 0 : i32
    %c0_i32_0 = arith.constant 0 : i32
    %c0_i32_1 = arith.constant 0 : i32
    return %c0_i32, %c0_i32_0 : i32, i32
  }
}

module attributes {stable_mosaic.version = 11 : i64} {
  func.func @_moe_expert_kernel(%arg0: i32, %arg1: i32, %arg2: memref<4xi32, #tpu.memory_space<smem>>, %arg3: memref<16x32xf32, #tpu.memory_space<vmem>>, %arg4: memref<16x4xf32, #tpu.memory_space<vmem>>, %arg5: memref<1x32x128xbf16, #tpu.memory_space<vmem>>, %arg6: memref<1x1x128xf32, #tpu.memory_space<vmem>>, %arg7: memref<1x128x32xbf16, #tpu.memory_space<vmem>>, %arg8: memref<1x1x32xf32, #tpu.memory_space<vmem>>, %arg9: memref<16x32xf32, #tpu.memory_space<vmem>>) attributes {dimension_semantics = [#tpu.dimension_semantics<parallel>, #tpu.dimension_semantics<arbitrary>], iteration_bounds = array<i64: 1, 4>, scalar_prefetch = 1 : i64, scratch_operands = 0 : i64, tpu.core_type = #tpu.core_type<tc>, window_params = [{transform_indices = @transform_0, window_bounds = array<i64: 16, 32>}, {transform_indices = @transform_1, window_bounds = array<i64: 16, 4>}, {transform_indices = @transform_2, window_bounds = array<i64: 1, 32, 128>}, {transform_indices = @transform_3, window_bounds = array<i64: 1, 1, 128>}, {transform_indices = @transform_4, window_bounds = array<i64: 1, 128, 32>}, {transform_indices = @transform_5, window_bounds = array<i64: 1, 1, 32>}, {transform_indices = @transform_6, window_bounds = array<i64: 16, 32>}]} {
    %c0_i32 = arith.constant 0 : i32
    %0 = arith.cmpi eq, %arg1, %c0_i32 : i32
    %1 = arith.extui %0 : i1 to i32
    %c0_i32_0 = arith.constant 0 : i32
    %2 = arith.cmpi ne, %1, %c0_i32_0 : i32
    scf.if %2 {
      %cst = arith.constant 0.000000e+00 : f32
      %8 = vector.broadcast %cst : f32 to vector<16x32xf32>
      %c0 = arith.constant 0 : index
      %c0_3 = arith.constant 0 : index
      %9 = vector.load %arg9[%c0, %c0_3] : memref<16x32xf32, #tpu.memory_space<vmem>>, vector<16x32xf32>
      tpu.vector_store %arg9[%c0, %c0_3], %8 {strides = array<i32>} : memref<16x32xf32, #tpu.memory_space<vmem>>, vector<16x32xf32>,
    } else {
    }
    %3 = arith.index_cast %arg1 : i32 to index
    %4 = memref.load %arg2[%3] : memref<4xi32, #tpu.memory_space<smem>>
    %c0_i32_1 = arith.constant 0 : i32
    %5 = arith.cmpi sgt, %4, %c0_i32_1 : i32
    %6 = arith.extui %5 : i1 to i32
    %c0_i32_2 = arith.constant 0 : i32
    %7 = arith.cmpi ne, %6, %c0_i32_2 : i32
    scf.if %7 {
      %c0 = arith.constant 0 : index
      %c0_3 = arith.constant 0 : index
      %8 = vector.load %arg3[%c0, %c0_3] : memref<16x32xf32, #tpu.memory_space<vmem>>, vector<16x32xf32>
      %9 = arith.truncf %8 : vector<16x32xf32> to vector<16x32xbf16>
      %c0_4 = arith.constant 0 : index
      %c0_5 = arith.constant 0 : index
      %c0_6 = arith.constant 0 : index
      %10 = vector.load %arg5[%c0_4, %c0_5, %c0_6] : memref<1x32x128xbf16, #tpu.memory_space<vmem>>, vector<1x32x128xbf16>
      %11 = vector.shape_cast %10 : vector<1x32x128xbf16> to vector<32x128xbf16>
      %cst = arith.constant dense<0.000000e+00> : vector<16x128xf32>
      %12 = tpu.matmul %9, %11, %cst {dimension_numbers = #tpu.dot_dimension_numbers<[1], [0], [0], [1], [0, 0, 1, 1], [], []>} : vector<16x32xbf16>, vector<32x128xbf16>, vector<16x128xf32> -> vector<16x128xf32>
      %c0_7 = arith.constant 0 : index
      %c0_8 = arith.constant 0 : index
      %c0_9 = arith.constant 0 : index
      %13 = vector.load %arg6[%c0_7, %c0_8, %c0_9] : memref<1x1x128xf32, #tpu.memory_space<vmem>>, vector<1x1x128xf32>
      %14 = vector.shape_cast %13 : vector<1x1x128xf32> to vector<1x128xf32>
      %15 = vector.broadcast %14 : vector<1x128xf32> to vector<16x128xf32>
      %16 = arith.addf %12, %15 : vector<16x128xf32>
      %cst_10 = arith.constant 5.000000e-01 : f32
      %17 = vector.broadcast %cst_10 : f32 to vector<16x128xf32>
      %18 = arith.mulf %17, %16 : vector<16x128xf32>
      %cst_11 = arith.constant 0.707106769 : f32
      %19 = vector.broadcast %cst_11 : f32 to vector<16x128xf32>
      %20 = arith.mulf %16, %19 : vector<16x128xf32>
      %cst_12 = arith.constant 0.000000e+00 : f32
      %21 = vector.broadcast %cst_12 : f32 to vector<16x128xf32>
      %22 = arith.cmpf oge, %20, %21 : vector<16x128xf32>
      %cst_13 = arith.constant 1.000000e+00 : f32
      %cst_14 = arith.constant -1.000000e+00 : f32
      %23 = vector.broadcast %cst_13 : f32 to vector<16x128xf32>
      %24 = vector.broadcast %cst_14 : f32 to vector<16x128xf32>
      %25 = arith.select %22, %23, %24 : vector<16x128xi1>, vector<16x128xf32>
      %26 = math.absf %20 : vector<16x128xf32>
      %cst_15 = arith.constant 0.327591091 : f32
      %27 = vector.broadcast %cst_15 : f32 to vector<16x128xf32>
      %28 = arith.mulf %27, %26 : vector<16x128xf32>
      %cst_16 = arith.constant 1.000000e+00 : f32
      %29 = vector.broadcast %cst_16 : f32 to vector<16x128xf32>
      %30 = arith.addf %29, %28 : vector<16x128xf32>
      %cst_17 = arith.constant 1.000000e+00 : f32
      %31 = vector.broadcast %cst_17 : f32 to vector<16x128xf32>
      %32 = arith.divf %31, %30 : vector<16x128xf32>
      %cst_18 = arith.constant 1.06140542 : f32
      %33 = vector.broadcast %cst_18 : f32 to vector<16x128xf32>
      %34 = arith.mulf %33, %32 : vector<16x128xf32>
      %cst_19 = arith.constant -1.45315206 : f32
      %35 = vector.broadcast %cst_19 : f32 to vector<16x128xf32>
      %36 = arith.addf %34, %35 : vector<16x128xf32>
      %37 = arith.mulf %36, %32 : vector<16x128xf32>
      %cst_20 = arith.constant 1.42141378 : f32
      %38 = vector.broadcast %cst_20 : f32 to vector<16x128xf32>
      %39 = arith.addf %37, %38 : vector<16x128xf32>
      %40 = arith.mulf %39, %32 : vector<16x128xf32>
      %cst_21 = arith.constant -0.284496725 : f32
      %41 = vector.broadcast %cst_21 : f32 to vector<16x128xf32>
      %42 = arith.addf %40, %41 : vector<16x128xf32>
      %43 = arith.mulf %42, %32 : vector<16x128xf32>
      %cst_22 = arith.constant 0.254829586 : f32
      %44 = vector.broadcast %cst_22 : f32 to vector<16x128xf32>
      %45 = arith.addf %43, %44 : vector<16x128xf32>
      %46 = arith.mulf %45, %32 : vector<16x128xf32>
      %cst_23 = arith.constant 0.000000e+00 : f32
      %47 = vector.broadcast %cst_23 : f32 to vector<16x128xf32>
      %48 = arith.subf %47, %26 : vector<16x128xf32>
      %49 = arith.mulf %48, %26 : vector<16x128xf32>
      %50 = math.exp %49 : vector<16x128xf32>
      %51 = arith.mulf %46, %50 : vector<16x128xf32>
      %cst_24 = arith.constant 1.000000e+00 : f32
      %52 = vector.broadcast %cst_24 : f32 to vector<16x128xf32>
      %53 = arith.subf %52, %51 : vector<16x128xf32>
      %54 = arith.mulf %25, %53 : vector<16x128xf32>
      %cst_25 = arith.constant 1.000000e+00 : f32
      %55 = vector.broadcast %cst_25 : f32 to vector<16x128xf32>
      %56 = arith.addf %55, %54 : vector<16x128xf32>
      %57 = arith.mulf %18, %56 : vector<16x128xf32>
      %58 = arith.truncf %57 : vector<16x128xf32> to vector<16x128xbf16>
      %c0_26 = arith.constant 0 : index
      %c0_27 = arith.constant 0 : index
      %c0_28 = arith.constant 0 : index
      %59 = vector.load %arg7[%c0_26, %c0_27, %c0_28] : memref<1x128x32xbf16, #tpu.memory_space<vmem>>, vector<1x128x32xbf16>
      %60 = vector.shape_cast %59 : vector<1x128x32xbf16> to vector<128x32xbf16>
      %cst_29 = arith.constant dense<0.000000e+00> : vector<16x32xf32>
      %61 = tpu.matmul %58, %60, %cst_29 {dimension_numbers = #tpu.dot_dimension_numbers<[1], [0], [0], [1], [0, 0, 1, 1], [], []>} : vector<16x128xbf16>, vector<128x32xbf16>, vector<16x32xf32> -> vector<16x32xf32>
      %c0_30 = arith.constant 0 : index
      %c0_31 = arith.constant 0 : index
      %c0_32 = arith.constant 0 : index
      %62 = vector.load %arg8[%c0_30, %c0_31, %c0_32] : memref<1x1x32xf32, #tpu.memory_space<vmem>>, vector<1x1x32xf32>
      %63 = vector.shape_cast %62 : vector<1x1x32xf32> to vector<1x32xf32>
      %64 = vector.broadcast %63 : vector<1x32xf32> to vector<16x32xf32>
      %65 = arith.addf %61, %64 : vector<16x32xf32>
      %66 = tpu.iota {dimensions = array<i32: 1>} : vector<16x4xi32>
      %67 = vector.broadcast %arg1 : i32 to vector<16x4xi32>
      %68 = arith.cmpi eq, %66, %67 : vector<16x4xi32>
      %c0_33 = arith.constant 0 : index
      %c0_34 = arith.constant 0 : index
      %69 = vector.load %arg4[%c0_33, %c0_34] : memref<16x4xf32, #tpu.memory_space<vmem>>, vector<16x4xf32>
      %cst_35 = arith.constant 0.000000e+00 : f32
      %70 = vector.broadcast %cst_35 : f32 to vector<16x4xf32>
      %71 = arith.select %68, %69, %70 : vector<16x4xi1>, vector<16x4xf32>
      %cst_36 = arith.constant dense<0.000000e+00> : vector<16xf32>
      %72 = vector.multi_reduction <add>, %71, %cst_36 [1] : vector<16x4xf32> to vector<16xf32>
      %73 = vector.shape_cast %72 : vector<16xf32> to vector<16x1xf32>
      %c0_37 = arith.constant 0 : index
      %c0_38 = arith.constant 0 : index
      %74 = vector.load %arg9[%c0_37, %c0_38] : memref<16x32xf32, #tpu.memory_space<vmem>>, vector<16x32xf32>
      %75 = vector.broadcast %73 : vector<16x1xf32> to vector<16x32xf32>
      %76 = arith.mulf %75, %65 : vector<16x32xf32>
      %77 = arith.addf %74, %76 : vector<16x32xf32>
      %c0_39 = arith.constant 0 : index
      %c0_40 = arith.constant 0 : index
      %78 = vector.load %arg9[%c0_39, %c0_40] : memref<16x32xf32, #tpu.memory_space<vmem>>, vector<16x32xf32>
      tpu.vector_store %arg9[%c0_39, %c0_40], %77 {strides = array<i32>} : memref<16x32xf32, #tpu.memory_space<vmem>>, vector<16x32xf32>,
    } else {
    }
    return
  }
  func.func @transform_0(%arg0: i32, %arg1: i32, %arg2: memref<4xi32, #tpu.memory_space<smem>>) -> (i32, i32) {
    %c0_i32 = arith.constant 0 : i32
    %c0_i32_0 = arith.constant 0 : i32
    return %arg0, %c0_i32 : i32, i32
  }
  func.func @transform_1(%arg0: i32, %arg1: i32, %arg2: memref<4xi32, #tpu.memory_space<smem>>) -> (i32, i32) {
    %c0_i32 = arith.constant 0 : i32
    %c0_i32_0 = arith.constant 0 : i32
    return %arg0, %c0_i32 : i32, i32
  }
  func.func @transform_2(%arg0: i32, %arg1: i32, %arg2: memref<4xi32, #tpu.memory_space<smem>>) -> (i32, i32, i32) {
    %0 = arith.index_cast %arg1 : i32 to index
    %1 = memref.load %arg2[%0] : memref<4xi32, #tpu.memory_space<smem>>
    %2 = arith.muli %arg1, %1 : i32
    %c0_i32 = arith.constant 0 : i32
    %c0_i32_0 = arith.constant 0 : i32
    %c0_i32_1 = arith.constant 0 : i32
    return %2, %c0_i32, %c0_i32_0 : i32, i32, i32
  }
  func.func @transform_3(%arg0: i32, %arg1: i32, %arg2: memref<4xi32, #tpu.memory_space<smem>>) -> (i32, i32, i32) {
    %0 = arith.index_cast %arg1 : i32 to index
    %1 = memref.load %arg2[%0] : memref<4xi32, #tpu.memory_space<smem>>
    %2 = arith.muli %arg1, %1 : i32
    %c0_i32 = arith.constant 0 : i32
    %c0_i32_0 = arith.constant 0 : i32
    %c0_i32_1 = arith.constant 0 : i32
    return %2, %c0_i32, %c0_i32_0 : i32, i32, i32
  }
  func.func @transform_4(%arg0: i32, %arg1: i32, %arg2: memref<4xi32, #tpu.memory_space<smem>>) -> (i32, i32, i32) {
    %0 = arith.index_cast %arg1 : i32 to index
    %1 = memref.load %arg2[%0] : memref<4xi32, #tpu.memory_space<smem>>
    %2 = arith.muli %arg1, %1 : i32
    %c0_i32 = arith.constant 0 : i32
    %c0_i32_0 = arith.constant 0 : i32
    %c0_i32_1 = arith.constant 0 : i32
    return %2, %c0_i32, %c0_i32_0 : i32, i32, i32
  }
  func.func @transform_5(%arg0: i32, %arg1: i32, %arg2: memref<4xi32, #tpu.memory_space<smem>>) -> (i32, i32, i32) {
    %0 = arith.index_cast %arg1 : i32 to index
    %1 = memref.load %arg2[%0] : memref<4xi32, #tpu.memory_space<smem>>
    %2 = arith.muli %arg1, %1 : i32
    %c0_i32 = arith.constant 0 : i32
    %c0_i32_0 = arith.constant 0 : i32
    %c0_i32_1 = arith.constant 0 : i32
    return %2, %c0_i32, %c0_i32_0 : i32, i32, i32
  }
  func.func @transform_6(%arg0: i32, %arg1: i32, %arg2: memref<4xi32, #tpu.memory_space<smem>>) -> (i32, i32) {
    %c0_i32 = arith.constant 0 : i32
    %c0_i32_0 = arith.constant 0 : i32
    return %arg0, %c0_i32 : i32, i32
  }
}

module attributes {stable_mosaic.version = 11 : i64} {
  func.func @_moe_expert_kernel(%arg0: i32, %arg1: i32, %arg2: memref<4xi32, #tpu.memory_space<smem>>, %arg3: memref<16x32xf32, #tpu.memory_space<vmem>>, %arg4: memref<16x4xf32, #tpu.memory_space<vmem>>, %arg5: memref<1x32x128xbf16, #tpu.memory_space<vmem>>, %arg6: memref<1x1x128xf32, #tpu.memory_space<vmem>>, %arg7: memref<1x128x32xbf16, #tpu.memory_space<vmem>>, %arg8: memref<1x1x32xf32, #tpu.memory_space<vmem>>, %arg9: memref<16x32xf32, #tpu.memory_space<vmem>>) attributes {dimension_semantics = [#tpu.dimension_semantics<parallel>, #tpu.dimension_semantics<arbitrary>], iteration_bounds = array<i64: 1, 4>, scalar_prefetch = 1 : i64, scratch_operands = 0 : i64, tpu.core_type = #tpu.core_type<tc>, window_params = [{transform_indices = @transform_0, window_bounds = array<i64: 16, 32>}, {transform_indices = @transform_1, window_bounds = array<i64: 16, 4>}, {transform_indices = @transform_2, window_bounds = array<i64: 1, 32, 128>}, {transform_indices = @transform_3, window_bounds = array<i64: 1, 1, 128>}, {transform_indices = @transform_4, window_bounds = array<i64: 1, 128, 32>}, {transform_indices = @transform_5, window_bounds = array<i64: 1, 1, 32>}, {transform_indices = @transform_6, window_bounds = array<i64: 16, 32>}]} {
    %c0_i32 = arith.constant 0 : i32
    %0 = arith.cmpi eq, %arg1, %c0_i32 : i32
    %1 = arith.extui %0 : i1 to i32
    %c0_i32_0 = arith.constant 0 : i32
    %2 = arith.cmpi ne, %1, %c0_i32_0 : i32
    scf.if %2 {
      %cst = arith.constant 0.000000e+00 : f32
      %8 = vector.broadcast %cst : f32 to vector<16x32xf32>
      %c0 = arith.constant 0 : index
      %c0_3 = arith.constant 0 : index
      %9 = vector.load %arg9[%c0, %c0_3] : memref<16x32xf32, #tpu.memory_space<vmem>>, vector<16x32xf32>
      tpu.vector_store %arg9[%c0, %c0_3], %8 {strides = array<i32>} : memref<16x32xf32, #tpu.memory_space<vmem>>, vector<16x32xf32>,
    } else {
    }
    %3 = arith.index_cast %arg1 : i32 to index
    %4 = memref.load %arg2[%3] : memref<4xi32, #tpu.memory_space<smem>>
    %c0_i32_1 = arith.constant 0 : i32
    %5 = arith.cmpi sgt, %4, %c0_i32_1 : i32
    %6 = arith.extui %5 : i1 to i32
    %c0_i32_2 = arith.constant 0 : i32
    %7 = arith.cmpi ne, %6, %c0_i32_2 : i32
    scf.if %7 {
      %c0 = arith.constant 0 : index
      %c0_3 = arith.constant 0 : index
      %8 = vector.load %arg3[%c0, %c0_3] : memref<16x32xf32, #tpu.memory_space<vmem>>, vector<16x32xf32>
      %9 = arith.truncf %8 : vector<16x32xf32> to vector<16x32xbf16>
      %c0_4 = arith.constant 0 : index
      %c0_5 = arith.constant 0 : index
      %c0_6 = arith.constant 0 : index
      %10 = vector.load %arg5[%c0_4, %c0_5, %c0_6] : memref<1x32x128xbf16, #tpu.memory_space<vmem>>, vector<1x32x128xbf16>
      %11 = vector.shape_cast %10 : vector<1x32x128xbf16> to vector<32x128xbf16>
      %cst = arith.constant dense<0.000000e+00> : vector<16x128xf32>
      %12 = tpu.matmul %9, %11, %cst {dimension_numbers = #tpu.dot_dimension_numbers<[1], [0], [0], [1], [0, 0, 1, 1], [], []>} : vector<16x32xbf16>, vector<32x128xbf16>, vector<16x128xf32> -> vector<16x128xf32>
      %c0_7 = arith.constant 0 : index
      %c0_8 = arith.constant 0 : index
      %c0_9 = arith.constant 0 : index
      %13 = vector.load %arg6[%c0_7, %c0_8, %c0_9] : memref<1x1x128xf32, #tpu.memory_space<vmem>>, vector<1x1x128xf32>
      %14 = vector.shape_cast %13 : vector<1x1x128xf32> to vector<1x128xf32>
      %15 = vector.broadcast %14 : vector<1x128xf32> to vector<16x128xf32>
      %16 = arith.addf %12, %15 : vector<16x128xf32>
      %cst_10 = arith.constant 5.000000e-01 : f32
      %17 = vector.broadcast %cst_10 : f32 to vector<16x128xf32>
      %18 = arith.mulf %17, %16 : vector<16x128xf32>
      %cst_11 = arith.constant 0.707106769 : f32
      %19 = vector.broadcast %cst_11 : f32 to vector<16x128xf32>
      %20 = arith.mulf %16, %19 : vector<16x128xf32>
      %cst_12 = arith.constant 0.000000e+00 : f32
      %21 = vector.broadcast %cst_12 : f32 to vector<16x128xf32>
      %22 = arith.cmpf oge, %20, %21 : vector<16x128xf32>
      %cst_13 = arith.constant 1.000000e+00 : f32
      %cst_14 = arith.constant -1.000000e+00 : f32
      %23 = vector.broadcast %cst_13 : f32 to vector<16x128xf32>
      %24 = vector.broadcast %cst_14 : f32 to vector<16x128xf32>
      %25 = arith.select %22, %23, %24 : vector<16x128xi1>, vector<16x128xf32>
      %26 = math.absf %20 : vector<16x128xf32>
      %cst_15 = arith.constant 0.327591091 : f32
      %27 = vector.broadcast %cst_15 : f32 to vector<16x128xf32>
      %28 = arith.mulf %27, %26 : vector<16x128xf32>
      %cst_16 = arith.constant 1.000000e+00 : f32
      %29 = vector.broadcast %cst_16 : f32 to vector<16x128xf32>
      %30 = arith.addf %29, %28 : vector<16x128xf32>
      %cst_17 = arith.constant 1.000000e+00 : f32
      %31 = vector.broadcast %cst_17 : f32 to vector<16x128xf32>
      %32 = arith.divf %31, %30 : vector<16x128xf32>
      %cst_18 = arith.constant 1.06140542 : f32
      %33 = vector.broadcast %cst_18 : f32 to vector<16x128xf32>
      %34 = arith.mulf %33, %32 : vector<16x128xf32>
      %cst_19 = arith.constant -1.45315206 : f32
      %35 = vector.broadcast %cst_19 : f32 to vector<16x128xf32>
      %36 = arith.addf %34, %35 : vector<16x128xf32>
      %37 = arith.mulf %36, %32 : vector<16x128xf32>
      %cst_20 = arith.constant 1.42141378 : f32
      %38 = vector.broadcast %cst_20 : f32 to vector<16x128xf32>
      %39 = arith.addf %37, %38 : vector<16x128xf32>
      %40 = arith.mulf %39, %32 : vector<16x128xf32>
      %cst_21 = arith.constant -0.284496725 : f32
      %41 = vector.broadcast %cst_21 : f32 to vector<16x128xf32>
      %42 = arith.addf %40, %41 : vector<16x128xf32>
      %43 = arith.mulf %42, %32 : vector<16x128xf32>
      %cst_22 = arith.constant 0.254829586 : f32
      %44 = vector.broadcast %cst_22 : f32 to vector<16x128xf32>
      %45 = arith.addf %43, %44 : vector<16x128xf32>
      %46 = arith.mulf %45, %32 : vector<16x128xf32>
      %cst_23 = arith.constant 0.000000e+00 : f32
      %47 = vector.broadcast %cst_23 : f32 to vector<16x128xf32>
      %48 = arith.subf %47, %26 : vector<16x128xf32>
      %49 = arith.mulf %48, %26 : vector<16x128xf32>
      %50 = math.exp %49 : vector<16x128xf32>
      %51 = arith.mulf %46, %50 : vector<16x128xf32>
      %cst_24 = arith.constant 1.000000e+00 : f32
      %52 = vector.broadcast %cst_24 : f32 to vector<16x128xf32>
      %53 = arith.subf %52, %51 : vector<16x128xf32>
      %54 = arith.mulf %25, %53 : vector<16x128xf32>
      %cst_25 = arith.constant 1.000000e+00 : f32
      %55 = vector.broadcast %cst_25 : f32 to vector<16x128xf32>
      %56 = arith.addf %55, %54 : vector<16x128xf32>
      %57 = arith.mulf %18, %56 : vector<16x128xf32>
      %58 = arith.truncf %57 : vector<16x128xf32> to vector<16x128xbf16>
      %c0_26 = arith.constant 0 : index
      %c0_27 = arith.constant 0 : index
      %c0_28 = arith.constant 0 : index
      %59 = vector.load %arg7[%c0_26, %c0_27, %c0_28] : memref<1x128x32xbf16, #tpu.memory_space<vmem>>, vector<1x128x32xbf16>
      %60 = vector.shape_cast %59 : vector<1x128x32xbf16> to vector<128x32xbf16>
      %cst_29 = arith.constant dense<0.000000e+00> : vector<16x32xf32>
      %61 = tpu.matmul %58, %60, %cst_29 {dimension_numbers = #tpu.dot_dimension_numbers<[1], [0], [0], [1], [0, 0, 1, 1], [], []>} : vector<16x128xbf16>, vector<128x32xbf16>, vector<16x32xf32> -> vector<16x32xf32>
      %c0_30 = arith.constant 0 : index
      %c0_31 = arith.constant 0 : index
      %c0_32 = arith.constant 0 : index
      %62 = vector.load %arg8[%c0_30, %c0_31, %c0_32] : memref<1x1x32xf32, #tpu.memory_space<vmem>>, vector<1x1x32xf32>
      %63 = vector.shape_cast %62 : vector<1x1x32xf32> to vector<1x32xf32>
      %64 = vector.broadcast %63 : vector<1x32xf32> to vector<16x32xf32>
      %65 = arith.addf %61, %64 : vector<16x32xf32>
      %66 = tpu.iota {dimensions = array<i32: 1>} : vector<16x4xi32>
      %67 = vector.broadcast %arg1 : i32 to vector<16x4xi32>
      %68 = arith.cmpi eq, %66, %67 : vector<16x4xi32>
      %c0_33 = arith.constant 0 : index
      %c0_34 = arith.constant 0 : index
      %69 = vector.load %arg4[%c0_33, %c0_34] : memref<16x4xf32, #tpu.memory_space<vmem>>, vector<16x4xf32>
      %cst_35 = arith.constant 0.000000e+00 : f32
      %70 = vector.broadcast %cst_35 : f32 to vector<16x4xf32>
      %71 = arith.select %68, %69, %70 : vector<16x4xi1>, vector<16x4xf32>
      %cst_36 = arith.constant dense<0.000000e+00> : vector<16xf32>
      %72 = vector.multi_reduction <add>, %71, %cst_36 [1] : vector<16x4xf32> to vector<16xf32>
      %73 = vector.shape_cast %72 : vector<16xf32> to vector<16x1xf32>
      %c0_37 = arith.constant 0 : index
      %c0_38 = arith.constant 0 : index
      %74 = vector.load %arg9[%c0_37, %c0_38] : memref<16x32xf32, #tpu.memory_space<vmem>>, vector<16x32xf32>
      %75 = vector.broadcast %73 : vector<16x1xf32> to vector<16x32xf32>
      %76 = arith.mulf %75, %65 : vector<16x32xf32>
      %77 = arith.addf %74, %76 : vector<16x32xf32>
      %c0_39 = arith.constant 0 : index
      %c0_40 = arith.constant 0 : index
      %78 = vector.load %arg9[%c0_39, %c0_40] : memref<16x32xf32, #tpu.memory_space<vmem>>, vector<16x32xf32>
      tpu.vector_store %arg9[%c0_39, %c0_40], %77 {strides = array<i32>} : memref<16x32xf32, #tpu.memory_space<vmem>>, vector<16x32xf32>,
    } else {
    }
    return
  }
  func.func @transform_0(%arg0: i32, %arg1: i32, %arg2: memref<4xi32, #tpu.memory_space<smem>>) -> (i32, i32) {
    %c0_i32 = arith.constant 0 : i32
    %c0_i32_0 = arith.constant 0 : i32
    return %arg0, %c0_i32 : i32, i32
  }
  func.func @transform_1(%arg0: i32, %arg1: i32, %arg2: memref<4xi32, #tpu.memory_space<smem>>) -> (i32, i32) {
    %c0_i32 = arith.constant 0 : i32
    %c0_i32_0 = arith.constant 0 : i32
    return %arg0, %c0_i32 : i32, i32
  }
  func.func @transform_2(%arg0: i32, %arg1: i32, %arg2: memref<4xi32, #tpu.memory_space<smem>>) -> (i32, i32, i32) {
    %0 = arith.index_cast %arg1 : i32 to index
    %1 = memref.load %arg2[%0] : memref<4xi32, #tpu.memory_space<smem>>
    %2 = arith.muli %arg1, %1 : i32
    %c0_i32 = arith.constant 0 : i32
    %c0_i32_0 = arith.constant 0 : i32
    %c0_i32_1 = arith.constant 0 : i32
    return %2, %c0_i32, %c0_i32_0 : i32, i32, i32
  }
  func.func @transform_3(%arg0: i32, %arg1: i32, %arg2: memref<4xi32, #tpu.memory_space<smem>>) -> (i32, i32, i32) {
    %0 = arith.index_cast %arg1 : i32 to index
    %1 = memref.load %arg2[%0] : memref<4xi32, #tpu.memory_space<smem>>
    %2 = arith.muli %arg1, %1 : i32
    %c0_i32 = arith.constant 0 : i32
    %c0_i32_0 = arith.constant 0 : i32
    %c0_i32_1 = arith.constant 0 : i32
    return %2, %c0_i32, %c0_i32_0 : i32, i32, i32
  }
  func.func @transform_4(%arg0: i32, %arg1: i32, %arg2: memref<4xi32, #tpu.memory_space<smem>>) -> (i32, i32, i32) {
    %0 = arith.index_cast %arg1 : i32 to index
    %1 = memref.load %arg2[%0] : memref<4xi32, #tpu.memory_space<smem>>
    %2 = arith.muli %arg1, %1 : i32
    %c0_i32 = arith.constant 0 : i32
    %c0_i32_0 = arith.constant 0 : i32
    %c0_i32_1 = arith.constant 0 : i32
    return %2, %c0_i32, %c0_i32_0 : i32, i32, i32
  }
  func.func @transform_5(%arg0: i32, %arg1: i32, %arg2: memref<4xi32, #tpu.memory_space<smem>>) -> (i32, i32, i32) {
    %0 = arith.index_cast %arg1 : i32 to index
    %1 = memref.load %arg2[%0] : memref<4xi32, #tpu.memory_space<smem>>
    %2 = arith.muli %arg1, %1 : i32
    %c0_i32 = arith.constant 0 : i32
    %c0_i32_0 = arith.constant 0 : i32
    %c0_i32_1 = arith.constant 0 : i32
    return %2, %c0_i32, %c0_i32_0 : i32, i32, i32
  }
  func.func @transform_6(%arg0: i32, %arg1: i32, %arg2: memref<4xi32, #tpu.memory_space<smem>>) -> (i32, i32) {
    %c0_i32 = arith.constant 0 : i32
    %c0_i32_0 = arith.constant 0 : i32
    return %arg0, %c0_i32 : i32, i32
  }
}

</mosaic_0001>

<bundles_post_ra>
// kernel: moe_mamba_block_forward.9
= control target key start
LH: loop header
LB: loop body
LE: loop exit
PB: predicated region body
PF: predicated region fallthrough
CT: control target
= control target key end

     0   :  { %v142_v0 = vmov 0.0   ;;  %vm143_vm0 = vmmov 0   ;;  %vm41_vm1 = vcmask 261120   ;;  %vm86_vm2 = vcmask 31744   ;;  %s191_s1 = inlined_call_operand.vmem [shape: bf16[32,4], index: 1, kind: input, shape index: {}]   ;;  %s192_s0 = inlined_call_operand.vmem [shape: f32[16,32], index: 0, kind: input, shape index: {}]   ;;  %s193_s2 = inlined_call_operand.vmem [shape: f32[1,4], index: 2, kind: input, shape index: {}]   ;;  %s194_s3 = inlined_call_operand.vmem [shape: f32[16,4], index: 3, kind: output, shape index: {}]  }
   0x1   :  { %122 = vmatprep.subr.bf16.mxu0 %v142_v0  ;;  %v132_v1 = vld [vmem:[%s191_s1] sm:$0xff]   ;;  %126 = vmatprep.mubr.msk.bf16.mxu0 %vm143_vm0, %v142_v0  ;;  %v133_v2 = vld [vmem:[%s191_s1 + $0x8] sm:$0xff]  }
   0x2   :  { %123 = vmatpush3.bf16.msra.mxu0 %v132_v1  ;;  %v15_v3 = vld [vmem:[%s192_s0] sm:$0xff]  ;;  %v16_v4 = vld [vmem:[%s192_s0 + $0x8] sm:$0xff] }
   0x3   :  { %124 = vmatprep.subr.bf16.mxu0 %v142_v0  ;;  %v17_v5 = vpack.c.bf16 %v16_v4, %v15_v3  ;;  %v115_v6 = vld [vmem:[%s193_s2] ss:$0 sm:$0xff] }
   0x6   :  { %125 = vmatpush3.bf16.msra.mxu0 %v133_v2 }
   0x9   :  { %127 = vmatmul.mubr.msk.bf16.vlgmr.msra.gmra.mrb[0].mxu0 %vm41_vm1, %v17_v5 }
  0xdc   :  { %v79_v7 = vpop.f32.mrb[0].mxu0 }
  0xdd   :  { %v80_v8 = vadd.f32 %v115_v6, %v79_v7  ;;  %v128_v9 = vpop.f32.mrb[1].mxu0 }
  0xde   :  { %v82_v10 = vpop.f32.mrb[2].mxu0 }
  0xdf   :  { %v83_v11 = vadd.f32 %v115_v6, %v82_v10  ;;  %v129_v12 = vpop.f32.mrb[3].mxu0  ;;  %v87_v13 = vsel %vm86_vm2, %v80_v8, -inf }
  0xe0   :  { %88 = vmax.xlane.f32.xlu0 %v87_v13 }
  0xe1   :  { %v90_v14 = vsel %vm86_vm2, %v83_v11, -inf }
  0xe4   :  { %91 = vmax.xlane.f32.xlu0 %v90_v14 }
 0x16d   :  { %v89_v15 = vpop.xlane.xlu0 %88 }
 0x16e   :  { %v93_v16 = vsub.f32 %v80_v8, %v89_v15 }
 0x170   :  { %v95_v17 = vmul.f32 1.442695, %v93_v16 }
 0x171   :  { %v92_v18 = vpop.xlane.xlu0 %91 }
 0x172   :  { %134 = vpow2.f32 %v95_v17  ;;  %v94_v19 = vsub.f32 %v83_v11, %v92_v18 }
 0x174   :  { %v97_v20 = vmul.f32 1.442695, %v94_v19 }
 0x176   :  { %136 = vpow2.f32 %v97_v20 }
 0x17c   :  { %v135_v21 = vpop.eup %134 }
 0x17d   :  { %v99_v22 = vsel %vm86_vm2, %v135_v21, 0.0 }
 0x17e   :  { %100 = vadd.xlane.f32.xlu1 %v99_v22 }
 0x180   :  { %v137_v23 = vpop.eup %136 }
 0x181   :  { %v102_v24 = vsel %vm86_vm2, %v137_v23, 0.0 }
 0x182   :  { %103 = vadd.xlane.f32.xlu1 %v102_v24 }
 0x20b   :  { %v101_v25 = vpop.xlane.xlu1 %100 }
 0x20c   :  { %138 = vrcp.f32 %v101_v25 }
 0x20f   :  { %v104_v26 = vpop.xlane.xlu1 %103 }
 0x210   :  { %140 = vrcp.f32 %v104_v26 }
 0x216   :  { %v139_v27 = vpop.eup %138 }
 0x217   :  { %v107_v28 = vmul.f32 %v139_v27, %v135_v21 }
 0x219   :  { %109 = vst.msk [vmem:[%s194_s3] sm:$0xff] %vm86_vm2, %v107_v28 }
 0x21a   :  { %v141_v29 = vpop.eup %140 }
 0x21b   :  { %v108_v30 = vmul.f32 %v141_v29, %v137_v23 }
 0x21d   :  { %110 = vst.msk [vmem:[%s194_s3 + $0x8] sm:$0xff] %vm86_vm2, %v108_v30 }

// kernel: moe_mamba_block_forward.10
= control target key start
LH: loop header
LB: loop body
LE: loop exit
PB: predicated region body
PF: predicated region fallthrough
CT: control target
= control target key end

     0   :  { %vm12_vm0 = vcmask 31744   ;;  %v19_v4 = vlaneseq  ;;  %v204_v35 = vmov 0.0   ;;  %vm69_vm9 = vcmask 1041409   ;;  %s285_s0 = inlined_call_operand.vmem [shape: f32[2,8,4], index: 0, kind: input, shape index: {}]   ;;  %s286_s1 = inlined_call_operand.vmem [shape: f32[2,8,4], index: 1, kind: output, shape index: {0}]   ;;  %s287_s2 = inlined_call_operand.vmem [shape: s32[1,4], index: 2, kind: output, shape index: {1}]  }
   0x1   :  { %v224_v0 = vld [vmem:[%s285_s0] sm:$0xff]  ;;  %v229_v1 = vld [vmem:[%s285_s0 + $0x8] sm:$0xff]  ;;  %vm72_vm10 = vcmask 58368  }
   0x2   :  { %v13_v2 = vsel %vm12_vm0, %v224_v0, -inf  ;;  %v16_v3 = vsel %vm12_vm0, %v229_v1, -inf  ;;  %v235_v5 = vand.u32 127, %v19_v4  ;;  %v243_v25 = vshrl.u32 %v19_v4, 7 }
   0x3   :  { %14 = vmax.xlane.f32.xlu0 %v13_v2 }
   0x4   :  { %v63_v31 = vsub.s32 %v235_v5, %v243_v25  ;;  %vm98_vm15 = vcmp.eq.s32.totalorder %v235_v5, 1 }
   0x7   :  { %17 = vmax.xlane.f32.xlu0 %v16_v3 }
  0x90   :  { %v15_v6 = vpop.xlane.xlu0 %14 }
  0x91   :  { %vm21_vm1 = vcmp.eq.f32.partialorder %v224_v0, %v15_v6 }
  0x92   :  { %v23_v7 = vsel %vm21_vm1, %v235_v5, 4  ;;  %vm76_vm1 = vcmp.eq.s32.totalorder %v235_v5, 0 }
  0x93   :  { %v25_v8 = vsel %vm12_vm0, %v23_v7, 2147483647 }
  0x94   :  { %v18_v9 = vpop.xlane.xlu0 %17  ;;  %v27_v10 = vshra.s32 %v25_v8, 16  ;;  %v26_v16 = vand.u32 65535, %v25_v8 }
  0x95   :  { %vm22_vm2 = vcmp.eq.f32.partialorder %v229_v1, %v18_v9  ;;  %v154_v9 = vsub.s32 1, %v243_v25 }
  0x96   :  { %v24_v11 = vsel %vm22_vm2, %v235_v5, 4  ;;  %v29_v12 = vcvt.s32.f32 %v27_v10  ;;  %v28_v18 = vcvt.s32.f32 %v26_v16  ;;  %vm120_vm2 = vcmp.eq.s32.totalorder %v235_v5, 2 }
  0x97   :  { %v40_v13 = vsel %vm12_vm0, %v24_v11, 2147483647  ;;  %v147_v10 = vsub.s32 0, %v243_v25 }
  0x98   :  { %30 = vmin.xlane.f32.xlu1 %v29_v12  ;;  %v42_v14 = vshra.s32 %v40_v13, 16  ;;  %v41_v19 = vand.u32 65535, %v40_v13 }
  0x9a   :  { %v44_v15 = vcvt.s32.f32 %v42_v14  ;;  %v43_v22 = vcvt.s32.f32 %v41_v19 }
  0x9c   :  { %45 = vmin.xlane.f32.xlu1 %v44_v15 }
 0x125   :  { %v31_v17 = vpop.xlane.xlu1 %30 }
 0x126   :  { %vm32_vm3 = vcmp.eq.f32.partialorder %v29_v12, %v31_v17  ;;  %v37_v24 = vcvt.f32.s32 %v31_v17 }
 0x127   :  { %v33_v20 = vsel %vm32_vm3, %v28_v18, inf  ;;  %vm142_vm3 = vcmp.eq.s32.totalorder %v235_v5, 3 }
 0x128   :  { %34 = vmin.xlane.f32.xlu0 %v33_v20  ;;  %v38_v28 = vshll.u32 %v37_v24, 16 }
 0x129   :  { %v46_v21 = vpop.xlane.xlu1 %45 }
 0x12a   :  { %vm47_vm4 = vcmp.eq.f32.partialorder %v44_v15, %v46_v21  ;;  %v52_v26 = vcvt.f32.s32 %v46_v21 }
 0x12b   :  { %v48_v23 = vsel %vm47_vm4, %v43_v22, inf }
 0x12c   :  { %49 = vmin.xlane.f32.xlu1 %v48_v23  ;;  %v53_v32 = vshll.u32 %v52_v26, 16 }
 0x1b5   :  { %v35_v27 = vpop.xlane.xlu0 %34 }
 0x1b6   :  { %v36_v29 = vcvt.f32.s32 %v35_v27 }
 0x1b8   :  { %v39_v30 = vadd.s32 %v38_v28, %v36_v29 }
 0x1b9   :  { %v50_v33 = vpop.xlane.xlu1 %49 }
 0x1ba   :  { %v51_v34 = vcvt.f32.s32 %v50_v33  ;;  %vm79_vm5 = vcmp.eq.s32.totalorder %v39_v30, 1  ;;  %vm55_vm6 = vcmp.eq.s32.totalorder %v39_v30, 0  ;;  %vm123_vm7 = vcmp.eq.s32.totalorder %v39_v30, 3 }
 0x1bb   :  { %v81_v36 = vsel %vm79_vm5, 1.0, %v204_v35  ;;  %vm101_vm8 = vcmp.eq.s32.totalorder %v39_v30, 2  ;;  %v57_v39 = vsel %vm55_vm6, 1.0, %v204_v35  ;;  %v125_v40 = vsel %vm123_vm7, 1.0, %v204_v35 }
 0x1bc   :  { %v54_v37 = vadd.s32 %v53_v32, %v51_v34  ;;  %v88_v38 = vrot.slane %v81_v36, %v63_v31  ;;  %v103_v41 = vsel %vm101_vm8, 1.0, %v204_v35  ;;  %v64_v47 = vrot.slane %v57_v39, %v63_v31 }
 0x1bd   :  { %v132_v53 = vrot.slane %v125_v40, %v63_v31  ;;  %v110_v54 = vrot.slane %v103_v41, %v63_v31  ;;  %vm190_vm6 = vcmask 24576   ;;  %v205_v39 = vmov 0  }
 0x1be   :  { %vm80_vm11 = vcmp.eq.s32.totalorder %v54_v37, 1  ;;  %vm56_vm12 = vcmp.eq.s32.totalorder %v54_v37, 0  ;;  %vm124_vm13 = vcmp.eq.s32.totalorder %v54_v37, 3  ;;  %vm102_vm14 = vcmp.eq.s32.totalorder %v54_v37, 2 }
 0x1bf   :  { %v82_v42 = vsel %vm80_vm11, 1.0, %v204_v35  ;;  %v58_v43 = vsel %vm56_vm12, 1.0, %v204_v35  ;;  %v126_v44 = vsel %vm124_vm13, 1.0, %v204_v35  ;;  %v104_v45 = vsel %vm102_vm14, 1.0, %v204_v35 }
 0x1c0   :  { %v92_v46 = vrot.slane %v82_v42, %v63_v31  ;;  %v68_v48 = vrot.slane %v58_v43, %v63_v31  ;;  %v136_v49 = vrot.slane %v126_v44, %v63_v31  ;;  %v114_v50 = vrot.slane %v104_v45, %v63_v31 }
 0x1c2   :  { %v93_v51 = vsel %vm69_vm9, %v92_v46, %v88_v38  ;;  %v70_v52 = vsel %vm69_vm9, %v68_v48, %v64_v47  ;;  %v137_v57 = vsel %vm69_vm9, %v136_v49, %v132_v53  ;;  %v115_v58 = vsel %vm69_vm9, %v114_v50, %v110_v54 }
 0x1c3   :  { %v95_v55 = vsel %vm72_vm10, %v93_v51, -inf  ;;  %v73_v56 = vsel %vm72_vm10, %v70_v52, -inf  ;;  %v139_v59 = vsel %vm72_vm10, %v137_v57, -inf  ;;  %v117_v60 = vsel %vm72_vm10, %v115_v58, -inf }
 0x1c4   :  { %96 = vmax.xlane.f32.xlu1 %v95_v55  ;;  %74 = vmax.xlane.f32.xlu0 %v73_v56 }
 0x1c8   :  { %140 = vmax.xlane.f32.xlu1 %v139_v59  ;;  %118 = vmax.xlane.f32.xlu0 %v117_v60 }
 0x251   :  { %v97_v61 = vpop.xlane.xlu1 %96  ;;  %v75_v62 = vpop.xlane.xlu0 %74 }
 0x252   :  { %v99_v63 = vsel %vm98_vm15, %v97_v61, 0.0  ;;  %v77_v2 = vsel %vm76_vm1, %v75_v62, 0.0 }
 0x253   :  { %v100_v3 = vadd.f32 %v99_v63, %v77_v2 }
 0x255   :  { %v141_v4 = vpop.xlane.xlu1 %140  ;;  %v119_v6 = vpop.xlane.xlu0 %118 }
 0x256   :  { %v121_v7 = vsel %vm120_vm2, %v119_v6, 0.0  ;;  %v143_v11 = vsel %vm142_vm3, %v141_v4, 0.0 }
 0x257   :  { %v122_v8 = vadd.f32 %v121_v7, %v100_v3 }
 0x259   :  { %v144_v12 = vadd.f32 %v143_v11, %v122_v8 }
 0x25b   :  { %v155_v13 = vrot.slane %v144_v12, %v154_v9  ;;  %v148_v14 = vrot.slane %v144_v12, %v147_v10 }
 0x25d   :  { %157 = vbcast.lane.b32.xlu1 %v155_v13, 256  ;;  %150 = vbcast.lane.b32.xlu0 %v148_v14, 256 }
 0x2cf   :  { %v158_v15 = vpop.permute.xlu1 %157  ;;  %v151_v16 = vpop.permute.xlu0 %150 }
 0x2d0   :  { %v160_v17 = vmul.f32 %v158_v15, %v229_v1  ;;  %v159_v18 = vmul.f32 %v151_v16, %v224_v0 }
 0x2d2   :  { %v162_v19 = vsel %vm76_vm1, %v160_v17, 0.0  ;;  %v161_v20 = vsel %vm76_vm1, %v159_v18, 0.0 }
 0x2d3   :  { %v164_v21 = vsel %vm12_vm0, %v162_v19, 0.0  ;;  %v163_v22 = vsel %vm12_vm0, %v161_v20, 0.0 }
 0x2d4   :  { %v165_v23 = vadd.f32 %v164_v21, %v163_v22 }
 0x2d6   :  { %v166_v24 = vadd.f32 1e-06, %v165_v23 }
 0x2d8   :  { %202 = vrcp.f32 %v166_v24 }
 0x2e2   :  { %v203_v25 = vpop.eup %202 }
 0x2e3   :  { %v168_v26 = vmul.f32 %v203_v25, %v161_v20  ;;  %v169_v27 = vmul.f32 %v203_v25, %v162_v19 }
 0x2e5   :  { %v170_v28 = vmul.f32 2.0, %v168_v26  ;;  %v171_v1 = vmul.f32 2.0, %v169_v27 }
 0x2e7   :  { %vm172_vm4 = vcmp.ne.f32.partialorder %v170_v28, %v170_v28  ;;  %vm173_vm5 = vcmp.ne.f32.partialorder %v171_v1, %v171_v1 }
 0x2e8   :  { %v174_v0 = vsel %vm172_vm4, 0.0, %v170_v28  ;;  %v175_v29 = vsel %vm173_vm5, 0.0, %v171_v1 }
 0x2e9   :  { %176 = vst.msk [vmem:[%s286_s1] sm:$0xff] %vm12_vm0, %v174_v0  ;;  %177 = vst.msk [vmem:[%s286_s1 + $0x8] sm:$0xff] %vm12_vm0, %v175_v29  ;;  %v178_v5 = vsel %vm12_vm0, %v174_v0, -inf  ;;  %v179_v30 = vsel %vm12_vm0, %v175_v29, -inf }
 0x2ea   :  { %v180_v31 = vmax.f32 %v178_v5, %v179_v30 }
 0x2ec   :  { %v181_v32 = vsel %vm12_vm0, %v180_v31, -inf }
 0x2ed   :  { %v182_v33 = vrot.slane %v181_v32, 4 }
 0x2ef   :  { %v183_v34 = vmax.f32 %v181_v32, %v182_v33 }
 0x2f1   :  { %v184_v35 = vrot.slane %v183_v34, 2 }
 0x2f3   :  { %v185_v36 = vmax.f32 %v183_v34, %v184_v35 }
 0x2f5   :  { %v186_v37 = vrot.slane %v185_v36, 1 }
 0x2f7   :  { %v187_v38 = vmax.f32 %v185_v36, %v186_v37 }
 0x2f9   :  { %vm188_vm7 = vcmp.gt.f32.partialorder %v187_v38, 0.0 }
 0x2fa   :  { %v189_v40 = vsel %vm188_vm7, 1, %v205_v39 }
 0x2fb   :  { %191 = vst.msk [vmem:[%s287_s2] sm:$0x1] %vm190_vm6, %v189_v40 }

// kernel: moe_mamba_block_forward.8
= control target key start
LH: loop header
LB: loop body
LE: loop exit
PB: predicated region body
PF: predicated region fallthrough
CT: control target
= control target key end

     0   :  { %s1553_s13 = smov 0   ;;  %s1555_s14 = smov 0   ;;  %s2051_s0 = inlined_call_operand.vmem [shape: f32[16,32], index: 0, kind: input, shape index: {}]   ;;  %s2052_s1 = inlined_call_operand.vmem [shape: bf16[32,128], index: 1, kind: input, shape index: {}]   ;;  %s2053_s2 = inlined_call_operand.vmem [shape: f32[4,64], index: 2, kind: input, shape index: {}]   ;;  %s2054_s3 = inlined_call_operand.vmem [shape: f32[1,64], index: 3, kind: input, shape index: {}]   ;;  %s2055_s4 = inlined_call_operand.vmem [shape: bf16[64,64], index: 4, kind: input, shape index: {}]   ;;  %s2056_s5 = inlined_call_operand.vmem [shape: f32[1,64], index: 5, kind: input, shape index: {}]   ;;  %s2057_s6 = inlined_call_operand.vmem [shape: bf16[64,32], index: 6, kind: input, shape index: {}]   ;;  %s2058_s7 = inlined_call_operand.vmem [shape: f32[16,64], index: 7, kind: input, shape index: {}]   ;;  %s2059_s8 = inlined_call_operand.vmem [shape: f32[1,64], index: 8, kind: input, shape index: {}]   ;;  %s2060_s9 = inlined_call_operand.vmem [shape: bf16[64,32], index: 9, kind: input, shape index: {}]   ;;  %s2061_s10 = inlined_call_operand.vmem [shape: f32[16,32], index: 10, kind: output, shape index: {}]  }
   0x1   :  { %s1557_s15 = smov 0  }
   0x2 LB: > { %s32_s16 = sadd.s32 1, %s1489_s14  ;;  %p1298_p0 = scmp.ge.s32.totalorder %s1493_s15, 1  ;;  %s1493_s15 = sphi %s1557_s15, %s20_s15   ;;  %s1489_s14 = sphi %s1555_s14, %s2071_s14   ;;  %s1485_s13 = sphi %s1553_s13, %s2070_s13  }
   0x3   : > { %p34_p1 = scmp.ge.s32.totalorder %s32_s16, 2  ;;  %p329_p2 = scmp.lt.s32.totalorder %s1493_s15, 3 }
   0x5   : > { %s2073_s16 = smov (%p34_p1, %s32_s16), 0  ;;  %p330_p3 = pnand %p1298_p0, %p329_p2 }
   0x6   : > { %v1413_v0 = vld [vmem:[%s2052_s1] sm:$0xff] (!%p330_p3)   ;;  %v1495_v1 = vmov (!%p330_p3), 0.0   ;;  %v1414_v2 = vld [vmem:[%s2052_s1 + $0x8] sm:$0xff] (!%p330_p3)   ;;  %vm1496_vm0 = vmmov (!%p330_p3), 0   ;;  %p368_p4 = scmp.lt.s32.totalorder (!%p330_p3), %s1485_s13, 1  ;;  %vm387_vm1 = vcmask (!%p330_p3), 518144   ;;  %v458_v13 = vlaneseq (!%p330_p3) }
   0x7   : > { %333 = sbr.rel (%p330_p3) target bundleno = 953 (0x3b9), region = 60  ;;  %1342 = vmatprep.subr.bf16.mxu0 (!%p330_p3), %v1495_v1  ;;  %1350 = vmatprep.subr.bf16.mxu1 (!%p330_p3), %v1495_v1  ;;  %388 = vst.msk [vmem:[#allocation3] sm:$0x7] (!%p330_p3), %vm387_vm1, %v1495_v1  ;;  %vm407_vm2 = vcmask (!%p330_p3), 261120   ;;  %v1415_v5 = vld [vmem:[%s2055_s4] sm:$0xff] (!%p330_p3)   ;;  %vm384_vm3 = vcmask (!%p330_p3), 523264  }
   0x8   : > { %1343 = vmatpush3.bf16.msra.mxu0 (!%p330_p3), %v1413_v0  ;;  %1346 = vmatprep.mubr.msk.bf16.mxu0 (!%p330_p3), %vm1496_vm0, %v1495_v1  ;;  %v1416_v6 = vld [vmem:[%s2057_s6] sm:$0xff] (!%p330_p3)   ;;  %385 = vst.msk [vmem:[#allocation2] sm:$0xff] (!%p330_p3), %vm384_vm3, %v1495_v1  ;;  %386 = vst.msk [vmem:[#allocation2 + $0x8] sm:$0xff] (!%p330_p3), %vm384_vm3, %v1495_v1  ;;  %v1417_v7 = vld [vmem:[%s2055_s4 + $0x8] sm:$0xff] (!%p330_p3)   ;;  %v1633_v14 = vshrl.u32 (!%p330_p3), %v458_v13, 7  ;;  %vm505_vm4 = vcmask (!%p330_p3), 523269  }
   0x9   : > { %1344 = vmatprep.subr.bf16.mxu0 (!%p330_p3), %v1495_v1  ;;  %1358 = vmatprep.mubr.msk.bf16.mxu1 (!%p330_p3), %vm1496_vm0, %v1495_v1  ;;  %v1418_v8 = vld [vmem:[%s2057_s6 + $0x8] sm:$0xff] (!%p330_p3)   ;;  %v1419_v9 = vld [vmem:[%s2055_s4 + $0x10] sm:$0xff] (!%p330_p3)   ;;  %v1421_v11 = vld [vmem:[%s2055_s4 + $0x18] sm:$0xff] (!%p330_p3)   ;;  %vm455_vm5 = vcmask (!%p330_p3), 1042432   ;;  %vm471_vm6 = vcmask (!%p330_p3), 1046528   ;;  %vm485_vm7 = vcmask (!%p330_p3), 1045504  }
   0xa   : > { %1351 = vmatpush3.bf16.msra.mxu1 (!%p330_p3), %v1415_v5  ;;  %v1420_v10 = vld [vmem:[%s2057_s6 + $0x10] sm:$0xff] (!%p330_p3)   ;;  %v1422_v12 = vld [vmem:[%s2057_s6 + $0x18] sm:$0xff] (!%p330_p3)   ;;  %v1636_v15 = vsub.s32 (!%p330_p3), 1, %v1633_v14  ;;  %v1639_v16 = vsub.s32 (!%p330_p3), 2, %v1633_v14  ;;  %v457_v17 = vld [vmem:[%s2053_s2] sm:$0xf] (!%p330_p3) }
   0xb   : > { %1352 = vmatprep.subr.bf16.mxu1 (!%p330_p3), %v1495_v1  ;;  %v1645_v18 = vsub.s32 (!%p330_p3), 3, %v1633_v14  ;;  %v1648_v20 = vsub.s32 (!%p330_p3), 0, %v1633_v14  ;;  %vm499_vm8 = vcmask (!%p330_p3), 1044480   ;;  %v1304_v49 = vld [vmem:[%s2054_s3] ss:$0 sm:$0xff] (!%p330_p3)  ;;  %s1497_s12 = smov (!%p330_p3), 64  }
   0xc   : > { %1345 = vmatpush3.bf16.msra.mxu0 (!%p330_p3), %v1414_v2  ;;  %v466_v21 = vrot.slane (!%p330_p3), %v457_v17, %v1636_v15  ;;  %v480_v22 = vrot.slane (!%p330_p3), %v457_v17, %v1639_v16  ;;  %v1305_v59 = vld [vmem:[%s2056_s5] ss:$0 sm:$0xff] (!%p330_p3)  ;;  %vm1119_vm13 = vcmask (!%p330_p3), 1040384   ;;  %vm1121_vm14 = vcmask (!%p330_p3), 1041408  }
   0xd   : > { %1362 = vmatprep.subr.bf16.mxu0 (!%p330_p3), %v1495_v1  ;;  %v494_v24 = vrot.slane (!%p330_p3), %v457_v17, %v1645_v18  ;;  %v461_v29 = vrot.slane (!%p330_p3), %v457_v17, %v1648_v20  ;;  %vm1124_vm15 = vcmask (!%p330_p3), 1043456  }
   0xe   : > { %s2075_s13 = smov (!%p368_p4, %s1485_s13), 1  ;;  %1353 = vmatpush3.bf16.msra.mxu1 %v1417_v7  ;;  %v451_v19 = vld [vmem:[#allocation3] sm:$0x7]  ;;  %v1681_v7 = vand.u32 127, %v458_v13 }
   0xf   : > { %s1299_s21 = sshll.u32 %s2075_s13, 3  ;;  %1354 = vmatprep.subr.bf16.mxu1 %v1495_v1 }
  0x10   : > { %s371_s24 = scalar_lea.vmem %s2051_s0, %s1299_s21  ;;  %vm1686_vm9 = vcmp.eq.s32.totalorder %v1633_v14, %v1681_v7  ;;  %s377_s18 = scalar_lea.vmem %s2061_s10, %s1299_s21 }
  0x11   : > { %v389_v3 = vld [vmem:[%s371_s24] sm:$0xff] }
  0x12   : > { %v390_v4 = vpack.c.bf16 %v389_v3, %v389_v3  ;;  %1355 = vmatpush3.bf16.msra.mxu1 %v1419_v9  ;;  %v695_v9 = vadd.s32 8, %v1633_v14 }
  0x13   : > { %1356 = vmatprep.subr.bf16.mxu1 %v1495_v1 }
  0x14   : > { %1347 = vmatmul.mubr.msk.bf16.vlgmr.msra.gmra.mrb[0].mxu0 %vm407_vm2, %v390_v4  ;;  %vm1701_vm10 = vcmp.eq.s32.totalorder %v695_v9, %v1681_v7 }
  0x15   : > { %1370 = vmatprep.mubr.msk.bf16.mxu0 %vm1496_vm0, %v1495_v1  ;;  %1363 = vmatpush3.bf16.msra.mxu0 %v1416_v6 }
  0x16   : > { %1364 = vmatprep.subr.bf16.mxu0 %v1495_v1  ;;  %1357 = vmatpush3.bf16.msra.mxu1 %v1421_v11 }
  0x17   : > { %1374 = vmatprep.subr.bf16.mxu1 %v1495_v1 }
  0x19   : > { %1365 = vmatpush3.bf16.msra.mxu0 %v1418_v8 }
  0x1a   : > { %1366 = vmatprep.subr.bf16.mxu0 %v1495_v1 }
  0x1d   : > { %1367 = vmatpush3.bf16.msra.mxu0 %v1420_v10 }
  0x1e   : > { %1368 = vmatprep.subr.bf16.mxu0 %v1495_v1 }
  0x21   : > { %1369 = vmatpush3.bf16.msra.mxu0 %v1422_v12 }
  0xe7   : > { %v1652_v23 = vpop.f32.mrb[0].mxu0 }
  0xe8   : > { %v453_v25 = vrot.slane %v1652_v23, 5  ;;  %506 = vst.msk [vmem:[#allocation3 - $0x5] sm:$0xe0] %vm505_vm4, %v1652_v23  ;;  %v1348_v26 = vpop.f32.mrb[1].mxu0 }
  0xe9   : > { %v448_v27 = vpop.f32.mrb[2].mxu0 }
  0xea   : > { %v456_v28 = vsel %vm455_vm5, %v451_v19, %v453_v25  ;;  %v468_v30 = vmul.f32 %v466_v21, %v453_v25  ;;  %v482_v31 = vmul.f32 %v480_v22, %v453_v25  ;;  %v1349_v32 = vpop.f32.mrb[3].mxu0  ;;  %v496_v36 = vmul.f32 %v494_v24, %v453_v25 }
  0xeb   : > { %v467_v33 = vmul.f32 %v466_v21, %v456_v28  ;;  %v481_v34 = vmul.f32 %v480_v22, %v456_v28  ;;  %v495_v35 = vmul.f32 %v494_v24, %v456_v28  ;;  %v462_v41 = vmul.f32 %v461_v29, %v456_v28 }
  0xec   : > { %v473_v37 = vrot.slane %v468_v30, 1  ;;  %v487_v40 = vrot.slane %v482_v31, 2  ;;  %v501_v44 = vrot.slane %v496_v36, 3 }
  0xed   : > { %v472_v38 = vrot.slane %v467_v33, 1  ;;  %v486_v39 = vrot.slane %v481_v34, 2  ;;  %v500_v43 = vrot.slane %v495_v35, 3  ;;  %v1736_v34 = vsub.s32 4, %v1633_v14 }
  0xef   : > { %v474_v42 = vsel %vm471_vm6, %v472_v38, %v473_v37  ;;  %v488_v46 = vsel %vm485_vm7, %v486_v39, %v487_v40  ;;  %v502_v48 = vsel %vm499_vm8, %v500_v43, %v501_v44 }
  0xf0   : > { %v476_v45 = vadd.f32 %v474_v42, %v462_v41  ;;  %v1751_v42 = vsub.s32 5, %v1633_v14 }
  0xf2   : > { %v490_v47 = vadd.f32 %v488_v46, %v476_v45 }
  0xf4   : > { %v504_v50 = vadd.f32 %v502_v48, %v490_v47  ;;  %v1766_v48 = vsub.s32 6, %v1633_v14 }
  0xf6   : > { %v514_v51 = vadd.f32 %v1304_v49, %v504_v50 }
  0xf8   : > { %v515_v52 = vsub.f32 0.0, %v514_v51 }
  0xfa   : > { %v516_v53 = vmul.f32 1.442695, %v515_v52 }
  0xfc   : > { %1427 = vpow2.f32 %v516_v53 }
 0x106   : > { %v1428_v54 = vpop.eup %1427 }
 0x107   : > { %v518_v55 = vadd.f32 1.0, %v1428_v54  ;;  %v697_v54 = vadd.s32 24, %v1633_v14 }
 0x109   : > { %1429 = vrcp.f32 %v518_v55  ;;  %v696_v55 = vadd.s32 16, %v1633_v14  ;;  %vm1792_vm11 = vcmp.eq.s32.totalorder %v697_v54, %v1681_v7 }
 0x10b   : > { %vm1797_vm12 = vcmp.eq.s32.totalorder %v696_v55, %v1681_v7 }
 0x113   : > { %v1430_v56 = vpop.eup %1429 }
 0x114   : > { %v1665_v57 = vmul.f32 %v1430_v56, %v514_v51 }
 0x116   : > { %v522_v58 = vpack.c.bf16 %v1665_v57, %v1665_v57 }
 0x118   : > { %1359 = vmatmul.mubr.msk.bf16.vlgmr.msra.gmra.mrb[0].mxu1 %vm384_vm3, %v522_v58  ;;  %1371 = vmatmul.mubr.msk.bf16.vlgmr.msra.gmra.mrb[4].mxu0 %vm384_vm3, %v522_v58 }
 0x119   : > { %1382 = vmatprep.mubr.msk.bf16.mxu1 %vm1496_vm0, %v1495_v1 }
 0x1eb   : > { %v600_v60 = vpop.f32.mrb[0].mxu1  ;;  %v681_v61 = vpop.f32.mrb[4].mxu0 }
 0x1ec   : > { %v1676_v62 = vadd.f32 %v1305_v59, %v600_v60  ;;  %690 = vst.msk [vmem:[#allocation6] sm:$0xff] %vm407_vm2, %v681_v61  ;;  %v1360_v63 = vpop.f32.mrb[1].mxu1  ;;  %v1372_v0 = vpop.f32.mrb[5].mxu0 }
 0x1ed   : > { %v603_v2 = vpop.f32.mrb[2].mxu1  ;;  %v684_v3 = vpop.f32.mrb[6].mxu0 }
 0x1ee   : > { %v607_v4 = vand.u32 2147483647, %v1676_v62  ;;  %v1361_v5 = vpop.f32.mrb[3].mxu1  ;;  %v1373_v6 = vpop.f32.mrb[7].mxu0  ;;  %v606_v60 = vmax.f32 %v1676_v62, 0.0  ;;  %v1903_v3 = vld [vmem:[%s2058_s7] sm:$0xff] }
 0x1f0   : > { %v608_v8 = vsub.f32 0.0, %v607_v4 }
 0x1f2   : > { %v609_v10 = vmul.f32 1.442695, %v608_v8 }
 0x1f3   : > { %v1690_v12 = vld [vmem:[#allocation6] sm:$0xff] }
 0x1f4   : > { %1431 = vpow2.f32 %v609_v10  ;;  %v1694_v17 = vrot.slane %v1690_v12, %v1636_v15  ;;  %v1698_v13 = vrot.slane %v1690_v12, %v1648_v20  ;;  %v1721_v28 = vrot.slane %v1690_v12, %v1639_v16 }
 0x1f5   : > { %v1733_v33 = vrot.slane %v1690_v12, %v1645_v18  ;;  %v1748_v41 = vrot.slane %v1690_v12, %v1736_v34  ;;  %v1763_v47 = vrot.slane %v1690_v12, %v1751_v42  ;;  %v1778_v53 = vrot.slane %v1690_v12, %v1766_v48 }
 0x1f6   : > { %v764_v21 = vsel %vm1686_vm9, %v1694_v17, 0.0  ;;  %v713_v22 = vsel %vm1686_vm9, %v1698_v13, 0.0  ;;  %v765_v26 = vsel %vm1701_vm10, %v1694_v17, 0.0  ;;  %v714_v27 = vsel %vm1701_vm10, %v1698_v13, 0.0 }
 0x1f7   : > { %v768_v24 = vsel %vm407_vm2, %v764_v21, 0.0  ;;  %v717_v25 = vsel %vm407_vm2, %v713_v22, 0.0  ;;  %v771_v29 = vsel %vm407_vm2, %v765_v26, 0.0  ;;  %v720_v30 = vsel %vm407_vm2, %v714_v27, 0.0 }
 0x1f8   : > { %769 = vadd.xlane.f32.xlu1 %v768_v24  ;;  %718 = vadd.xlane.f32.xlu0 %v717_v25  ;;  %v816_v31 = vsel %vm1701_vm10, %v1721_v28, 0.0  ;;  %v815_v32 = vsel %vm1686_vm9, %v1721_v28, 0.0  ;;  %v867_v39 = vsel %vm1701_vm10, %v1733_v33, 0.0  ;;  %v866_v40 = vsel %vm1686_vm9, %v1733_v33, 0.0 }
 0x1f9   : > { %v822_v37 = vsel %vm407_vm2, %v816_v31, 0.0  ;;  %v819_v38 = vsel %vm407_vm2, %v815_v32, 0.0  ;;  %v873_v43 = vsel %vm407_vm2, %v867_v39, 0.0  ;;  %v870_v44 = vsel %vm407_vm2, %v866_v40, 0.0 }
 0x1fa   : > { %v918_v45 = vsel %vm1701_vm10, %v1748_v41, 0.0  ;;  %v917_v46 = vsel %vm1686_vm9, %v1748_v41, 0.0  ;;  %v969_v51 = vsel %vm1701_vm10, %v1763_v47, 0.0  ;;  %v968_v52 = vsel %vm1686_vm9, %v1763_v47, 0.0 }
 0x1fb   : > { %v924_v49 = vsel %vm407_vm2, %v918_v45, 0.0  ;;  %v921_v50 = vsel %vm407_vm2, %v917_v46, 0.0  ;;  %v975_v58 = vsel %vm407_vm2, %v969_v51, 0.0  ;;  %v972_v59 = vsel %vm407_vm2, %v968_v52, 0.0 }
 0x1fc   : > { %772 = vadd.xlane.f32.xlu1 %v771_v29  ;;  %721 = vadd.xlane.f32.xlu0 %v720_v30  ;;  %v1020_v63 = vsel %vm1701_vm10, %v1778_v53, 0.0  ;;  %v1019_v0 = vsel %vm1686_vm9, %v1778_v53, 0.0  ;;  %v716_v8 = vsel %vm1792_vm11, %v1698_v13, 0.0  ;;  %v715_v7 = vsel %vm1797_vm12, %v1698_v13, 0.0 }
 0x1fd   : > { %v1026_v4 = vsel %vm407_vm2, %v1020_v63, 0.0  ;;  %v1023_v5 = vsel %vm407_vm2, %v1019_v0, 0.0  ;;  %v726_v9 = vsel %vm407_vm2, %v716_v8, 0.0  ;;  %v723_v10 = vsel %vm407_vm2, %v715_v7, 0.0  ;;  %v1425_v63 = vld [vmem:[%s2060_s9 + $0x10] sm:$0xff]   ;;  %v1426_v0 = vld [vmem:[%s2060_s9 + $0x18] sm:$0xff]  }
 0x1fe   : > { %v1432_v35 = vpop.eup %1431  ;;  %v767_v21 = vsel %vm1792_vm11, %v1694_v17, 0.0  ;;  %v766_v22 = vsel %vm1797_vm12, %v1694_v17, 0.0  ;;  %v818_v25 = vsel %vm1792_vm11, %v1721_v28, 0.0  ;;  %v817_v26 = vsel %vm1797_vm12, %v1721_v28, 0.0 }
 0x1ff   : > { %v611_v36 = vadd.f32 1.0, %v1432_v35  ;;  %v777_v24 = vsel %vm407_vm2, %v767_v21, 0.0  ;;  %v774_v13 = vsel %vm407_vm2, %v766_v22, 0.0  ;;  %v1829_v27 = vsub.s32 7, %v1633_v14 }
 0x200   : > { %823 = vadd.xlane.f32.xlu1 %v822_v37  ;;  %820 = vadd.xlane.f32.xlu0 %v819_v38  ;;  %v828_v29 = vsel %vm407_vm2, %v818_v25, 0.0  ;;  %v825_v17 = vsel %vm407_vm2, %v817_v26, 0.0  ;;  %v869_v30 = vsel %vm1792_vm11, %v1733_v33, 0.0  ;;  %v868_v31 = vsel %vm1797_vm12, %v1733_v33, 0.0 }
 0x201   : > { %1433 = vlog2.f32 %v611_v36  ;;  %v1069_v28 = vrot.slane %v1690_v12, %v1829_v27  ;;  %v879_v14 = vsel %vm407_vm2, %v869_v30, 0.0  ;;  %v876_v32 = vsel %vm407_vm2, %v868_v31, 0.0 }
 0x202   : > { %v1140_v37 = vsub.f32 0.0, %v1652_v23  ;;  %v920_v12 = vsel %vm1792_vm11, %v1748_v41, 0.0  ;;  %v919_v19 = vsel %vm1797_vm12, %v1748_v41, 0.0  ;;  %v1022_v46 = vsel %vm1792_vm11, %v1778_v53, 0.0 }
 0x203   : > { %v1071_v35 = vsel %vm1701_vm10, %v1069_v28, 0.0  ;;  %v1070_v36 = vsel %vm1686_vm9, %v1069_v28, 0.0  ;;  %v930_v11 = vsel %vm407_vm2, %v920_v12, 0.0  ;;  %v927_v40 = vsel %vm407_vm2, %v919_v19, 0.0 }
 0x204   : > { %874 = vadd.xlane.f32.xlu1 %v873_v43  ;;  %871 = vadd.xlane.f32.xlu0 %v870_v44  ;;  %v1077_v38 = vsel %vm407_vm2, %v1071_v35, 0.0  ;;  %v1074_v33 = vsel %vm407_vm2, %v1070_v36, 0.0  ;;  %v1141_v39 = vmul.f32 1.442695, %v1140_v37  ;;  %v971_v43 = vsel %vm1792_vm11, %v1763_v47, 0.0 }
 0x205   : > { %v970_v44 = vsel %vm1797_vm12, %v1763_v47, 0.0  ;;  %v981_v45 = vsel %vm407_vm2, %v971_v43, 0.0  ;;  %v1073_v47 = vsel %vm1792_vm11, %v1069_v28, 0.0  ;;  %v1072_v52 = vsel %vm1797_vm12, %v1069_v28, 0.0 }
 0x206   : > { %1435 = vpow2.f32 %v1141_v39  ;;  %v978_v41 = vsel %vm407_vm2, %v970_v44, 0.0  ;;  %v1083_v54 = vsel %vm407_vm2, %v1073_v47, 0.0  ;;  %v1080_v55 = vsel %vm407_vm2, %v1072_v52, 0.0  ;;  %v708_v44 = vld [vmem:[#allocation2 + $0x8] sm:$0xff] }
 0x208   : > { %925 = vadd.xlane.f32.xlu1 %v924_v49  ;;  %922 = vadd.xlane.f32.xlu0 %v921_v50  ;;  %v1021_v49 = vsel %vm1797_vm12, %v1778_v53, 0.0  ;;  %v1032_v50 = vsel %vm407_vm2, %v1022_v46, 0.0 }
 0x209   : > { %v1029_v51 = vsel %vm407_vm2, %v1021_v49, 0.0 }
 0x20b   : > { %v1434_v56 = vpop.eup %1433 }
 0x20c   : > { %v613_v61 = vmul.f32 0.6931472, %v1434_v56  ;;  %976 = vadd.xlane.f32.xlu1 %v975_v58  ;;  %973 = vadd.xlane.f32.xlu0 %v972_v59 }
 0x20e   : > { %v614_v62 = vadd.f32 %v613_v61, %v606_v60  ;;  %v1423_v60 = vld [vmem:[%s2060_s9] sm:$0xff]   ;;  %v1424_v61 = vld [vmem:[%s2060_s9 + $0x8] sm:$0xff]  }
 0x20f   : > { %1375 = vmatpush3.bf16.msra.mxu1 %v1423_v60 }
 0x210   : > { %687 = vst.msk [vmem:[#allocation4] sm:$0xff] %vm384_vm3, %v614_v62  ;;  %v688_v6 = vmul.f32 %v614_v62, %v1665_v57  ;;  %1027 = vadd.xlane.f32.xlu1 %v1026_v4  ;;  %1024 = vadd.xlane.f32.xlu0 %v1023_v5  ;;  %v1436_v56 = vpop.eup %1435  ;;  %v1909_v4 = vld [vmem:[%s2058_s7 + $0x8] sm:$0xff] }
 0x211   : > { %v1143_v53 = vadd.f32 1.0, %v1436_v56  ;;  %1376 = vmatprep.subr.bf16.mxu1 %v1495_v1 }
 0x212   : > { %689 = vst.msk [vmem:[#allocation5] sm:$0xff] %vm384_vm3, %v688_v6 }
 0x213   : > { %1437 = vrcp.f32 %v1143_v53  ;;  %1377 = vmatpush3.bf16.msra.mxu1 %v1424_v61 }
 0x214   : > { %727 = vadd.xlane.f32.xlu1 %v726_v9  ;;  %724 = vadd.xlane.f32.xlu0 %v723_v10 }
 0x215   : > { %1378 = vmatprep.subr.bf16.mxu1 %v1495_v1 }
 0x217   : > { %1379 = vmatpush3.bf16.msra.mxu1 %v1425_v63 }
 0x218   : > { %778 = vadd.xlane.f32.xlu1 %v777_v24  ;;  %775 = vadd.xlane.f32.xlu0 %v774_v13 }
 0x219   : > { %1380 = vmatprep.subr.bf16.mxu1 %v1495_v1  ;;  %v1925_v30 = vld [vmem:[#allocation5] sm:$0xff] }
 0x21a   : > { %v846_v63 = vrot.slane %v1925_v30, %v1639_v16 }
 0x21b   : > { %1381 = vmatpush3.bf16.msra.mxu1 %v1426_v0 }
 0x21c   : > { %829 = vadd.xlane.f32.xlu1 %v828_v29  ;;  %826 = vadd.xlane.f32.xlu0 %v825_v17 }
 0x21d   : > { %v1438_v58 = vpop.eup %1437 }
 0x21e   : > { %v1146_v59 = vmul.f32 %v1438_v58, %v1652_v23  ;;  %v1892_v23 = vld [vmem:[#allocation4] sm:$0xff] }
 0x21f   : > { %v732_v2 = vrot.slane %v1892_v23, %v1648_v20  ;;  %v783_v5 = vrot.slane %v1892_v23, %v1636_v15  ;;  %v834_v7 = vrot.slane %v1892_v23, %v1639_v16  ;;  %v885_v24 = vrot.slane %v1892_v23, %v1645_v18 }
 0x220   : > { %880 = vadd.xlane.f32.xlu1 %v879_v14  ;;  %877 = vadd.xlane.f32.xlu0 %v876_v32  ;;  %v936_v17 = vrot.slane %v1892_v23, %v1736_v34  ;;  %v707_v32 = vld [vmem:[#allocation2] sm:$0xff]  ;;  %v987_v37 = vrot.slane %v1892_v23, %v1751_v42  ;;  %v1038_v46 = vrot.slane %v1892_v23, %v1766_v48 }
 0x221   : > { %v733_v62 = vmul.f32 %v732_v2, %v1903_v3  ;;  %v734_v1 = vmul.f32 %v732_v2, %v1909_v4  ;;  %v784_v8 = vmul.f32 %v783_v5, %v1903_v3  ;;  %v785_v10 = vmul.f32 %v783_v5, %v1909_v4 }
 0x222   : > { %v835_v22 = vmul.f32 %v834_v7, %v1903_v3  ;;  %v836_v25 = vmul.f32 %v834_v7, %v1909_v4  ;;  %v886_v29 = vmul.f32 %v885_v24, %v1903_v3  ;;  %v887_v31 = vmul.f32 %v885_v24, %v1909_v4 }
 0x223   : > { %v735_v6 = vmul.f32 1.442695, %v733_v62  ;;  %v737_v9 = vmul.f32 1.442695, %v734_v1  ;;  %v786_v21 = vmul.f32 1.442695, %v784_v8  ;;  %v937_v36 = vmul.f32 %v936_v17, %v1903_v3 }
 0x224   : > { %1078 = vadd.xlane.f32.xlu1 %v1077_v38  ;;  %1075 = vadd.xlane.f32.xlu0 %v1074_v33  ;;  %v788_v13 = vmul.f32 1.442695, %v785_v10  ;;  %v837_v26 = vmul.f32 1.442695, %v835_v22  ;;  %v839_v28 = vmul.f32 1.442695, %v836_v25  ;;  %v744_v38 = vrot.slane %v1925_v30, %v1648_v20 }
 0x225   : > { %1439 = vpow2.f32 %v735_v6  ;;  %v888_v35 = vmul.f32 1.442695, %v886_v29  ;;  %v890_v19 = vmul.f32 1.442695, %v887_v31  ;;  %v938_v39 = vmul.f32 %v936_v17, %v1909_v4 }
 0x226   : > { %1441 = vpow2.f32 %v737_v9  ;;  %v795_v20 = vrot.slane %v1925_v30, %v1636_v15  ;;  %v1039_v60 = vmul.f32 %v1038_v46, %v1903_v3  ;;  %v1089_v15 = vrot.slane %v1892_v23, %v1829_v27 }
 0x227   : > { %1443 = vpow2.f32 %v786_v21  ;;  %v941_v52 = vmul.f32 1.442695, %v938_v39  ;;  %v1040_v8 = vmul.f32 %v1038_v46, %v1909_v4  ;;  %v897_v24 = vrot.slane %v1925_v30, %v1645_v18 }
 0x228   : > { %931 = vadd.xlane.f32.xlu1 %v930_v11  ;;  %928 = vadd.xlane.f32.xlu0 %v927_v40  ;;  %1445 = vpow2.f32 %v788_v13  ;;  %v1041_v21 = vmul.f32 1.442695, %v1039_v60  ;;  %v1090_v16 = vmul.f32 %v1089_v15, %v1903_v3 }
 0x229   : > { %1447 = vpow2.f32 %v837_v26  ;;  %v1043_v31 = vmul.f32 1.442695, %v1040_v8 }
 0x22a   : > { %1449 = vpow2.f32 %v839_v28  ;;  %v1092_v18 = vmul.f32 1.442695, %v1090_v16 }
 0x22b   : > { %1451 = vpow2.f32 %v888_v35 }
 0x22c   : > { %982 = vadd.xlane.f32.xlu1 %v981_v45  ;;  %979 = vadd.xlane.f32.xlu0 %v978_v41  ;;  %v939_v45 = vmul.f32 1.442695, %v937_v36  ;;  %v988_v41 = vmul.f32 %v987_v37, %v1903_v3  ;;  %1453 = vpow2.f32 %v890_v19  ;;  %v1091_v36 = vmul.f32 %v1089_v15, %v1909_v4 }
 0x22e   : > { %1455 = vpow2.f32 %v939_v45 }
 0x22f   : > { %v1440_v14 = vpop.eup %1439  ;;  %1457 = vpow2.f32 %v941_v52 }
 0x230   : > { %1033 = vadd.xlane.f32.xlu1 %v1032_v50  ;;  %1030 = vadd.xlane.f32.xlu0 %v1029_v51  ;;  %v739_v40 = vmul.f32 %v1440_v14, %v707_v32  ;;  %v1442_v43 = vpop.eup %1441 }
 0x231   : > { %v1444_v50 = vpop.eup %1443  ;;  %v740_v53 = vmul.f32 %v1442_v43, %v708_v44 }
 0x232   : > { %v1446_v61 = vpop.eup %1445 }
 0x233   : > { %v1448_v62 = vpop.eup %1447 }
 0x234   : > { %1084 = vadd.xlane.f32.xlu1 %v1083_v54  ;;  %1081 = vadd.xlane.f32.xlu0 %v1080_v55  ;;  %v989_v54 = vmul.f32 %v987_v37, %v1909_v4  ;;  %v1450_v22 = vpop.eup %1449  ;;  %v948_v37 = vrot.slane %v1925_v30, %v1736_v34  ;;  %v999_v4 = vrot.slane %v1925_v30, %v1751_v42 }
 0x235   : > { %v1452_v26 = vpop.eup %1451 }
 0x236   : > { %v992_v6 = vmul.f32 1.442695, %v989_v54  ;;  %v1454_v3 = vpop.eup %1453 }
 0x24a   : > { %1148 = vrot.lane.b32.xlu0 %v1146_v59, %s1497_s12  ;;  %v990_v59 = vmul.f32 1.442695, %v988_v41  ;;  %v1094_v41 = vmul.f32 1.442695, %v1091_v36 }
 0x24c   : > { %1459 = vpow2.f32 %v990_v59 }
 0x24d   : > { %1461 = vpow2.f32 %v992_v6 }
 0x24e   : > { %1463 = vpow2.f32 %v1041_v21 }
 0x24f   : > { %1465 = vpow2.f32 %v1043_v31 }
 0x250   : > { %1467 = vpow2.f32 %v1092_v18 }
 0x251   : > { %1469 = vpow2.f32 %v1094_v41  ;;  %v1101_v41 = vrot.slane %v1925_v30, %v1829_v27 }
 0x285   : > { %v770_v33 = vpop.xlane.xlu1 %769  ;;  %v719_v12 = vpop.xlane.xlu0 %718 }
 0x286   : > { %v745_v11 = vmul.f32 %v744_v38, %v719_v12  ;;  %v796_v55 = vmul.f32 %v795_v20, %v770_v33  ;;  %v1456_v12 = vpop.eup %1455 }
 0x287   : > { %v1458_v45 = vpop.eup %1457 }
 0x288   : > { %v1939_v49 = vadd.f32 %v745_v11, %v739_v40 }
 0x289   : > { %v773_v51 = vpop.xlane.xlu1 %772  ;;  %v722_v47 = vpop.xlane.xlu0 %721 }
 0x28a   : > { %v746_v56 = vmul.f32 %v744_v38, %v722_v47  ;;  %v790_v58 = vmul.f32 %v1444_v50, %v1939_v49  ;;  %v797_v7 = vmul.f32 %v795_v20, %v773_v51  ;;  %v1460_v20 = vpop.eup %1459 }
 0x28c   : > { %v1948_v0 = vadd.f32 %v746_v56, %v740_v53  ;;  %v1950_v2 = vadd.f32 %v796_v55, %v790_v58  ;;  %v1462_v56 = vpop.eup %1461  ;;  %v1050_v53 = vrot.slane %v1925_v30, %v1766_v48 }
 0x28d   : > { %v824_v5 = vpop.xlane.xlu1 %823  ;;  %v821_v1 = vpop.xlane.xlu0 %820 }
 0x28e   : > { %v847_v9 = vmul.f32 %v846_v63, %v821_v1  ;;  %v791_v10 = vmul.f32 %v1446_v61, %v1948_v0  ;;  %v841_v23 = vmul.f32 %v1448_v62, %v1950_v2  ;;  %v848_v28 = vmul.f32 %v846_v63, %v824_v5  ;;  %v1464_v42 = vpop.eup %1463 }
 0x28f   : > { %v1466_v1 = vpop.eup %1465 }
 0x290   : > { %v1958_v13 = vadd.f32 %v797_v7, %v791_v10  ;;  %v1960_v25 = vadd.f32 %v847_v9, %v841_v23  ;;  %v1468_v7 = vpop.eup %1467 }
 0x291   : > { %v875_v29 = vpop.xlane.xlu1 %874  ;;  %v872_v17 = vpop.xlane.xlu0 %871 }
 0x292   : > { %v898_v14 = vmul.f32 %v897_v24, %v872_v17  ;;  %v842_v32 = vmul.f32 %v1450_v22, %v1958_v13  ;;  %v892_v35 = vmul.f32 %v1452_v26, %v1960_v25  ;;  %v899_v11 = vmul.f32 %v897_v24, %v875_v29  ;;  %v1470_v22 = vpop.eup %1469 }
 0x294   : > { %v850_v38 = vadd.f32 %v848_v28, %v842_v32  ;;  %v1967_v33 = vadd.f32 %v898_v14, %v892_v35 }
 0x295   : > { %v926_v19 = vpop.xlane.xlu1 %925  ;;  %v923_v39 = vpop.xlane.xlu0 %922 }
 0x296   : > { %v949_v40 = vmul.f32 %v948_v37, %v923_v39  ;;  %v893_v43 = vmul.f32 %v1454_v3, %v850_v38  ;;  %v943_v44 = vmul.f32 %v1456_v12, %v1967_v33  ;;  %v950_v47 = vmul.f32 %v948_v37, %v926_v19 }
 0x298   : > { %v901_v46 = vadd.f32 %v899_v11, %v893_v43  ;;  %v1972_v34 = vadd.f32 %v949_v40, %v943_v44 }
 0x299   : > { %v977_v50 = vpop.xlane.xlu1 %976  ;;  %v974_v51 = vpop.xlane.xlu0 %973 }
 0x29a   : > { %v1000_v52 = vmul.f32 %v999_v4, %v974_v51  ;;  %v944_v54 = vmul.f32 %v1458_v45, %v901_v46  ;;  %v994_v55 = vmul.f32 %v1460_v20, %v1972_v34  ;;  %v1001_v61 = vmul.f32 %v999_v4, %v977_v50 }
 0x29c   : > { %v1977_v58 = vadd.f32 %v950_v47, %v944_v54  ;;  %v1979_v59 = vadd.f32 %v1000_v52, %v994_v55 }
 0x29d   : > { %v1028_v60 = vpop.xlane.xlu1 %1027  ;;  %v1025_v15 = vpop.xlane.xlu0 %1024 }
 0x29e   : > { %v1051_v63 = vmul.f32 %v1050_v53, %v1025_v15  ;;  %v995_v62 = vmul.f32 %v1462_v56, %v1977_v58  ;;  %v1045_v5 = vmul.f32 %v1464_v42, %v1979_v59  ;;  %v1052_v10 = vmul.f32 %v1050_v53, %v1028_v60 }
 0x2a0   : > { %v1983_v6 = vadd.f32 %v1001_v61, %v995_v62  ;;  %v1985_v8 = vadd.f32 %v1051_v63, %v1045_v5 }
 0x2a1   : > { %v728_v48 = vpop.xlane.xlu1 %727  ;;  %v725_v9 = vpop.xlane.xlu0 %724 }
 0x2a2   : > { %v1046_v23 = vmul.f32 %v1466_v1, %v1983_v6  ;;  %v1096_v21 = vmul.f32 %v1468_v7, %v1985_v8  ;;  %v750_v24 = vmul.f32 %v1948_v0, %v728_v48  ;;  %v749_v26 = vmul.f32 %v1939_v49, %v725_v9 }
 0x2a4   : > { %v1989_v16 = vadd.f32 %v1052_v10, %v1046_v23  ;;  %v752_v3 = vsel %vm384_vm3, %v750_v24, 0.0  ;;  %v751_v36 = vsel %vm384_vm3, %v749_v26, 0.0 }
 0x2a5   : > { %v779_v29 = vpop.xlane.xlu1 %778  ;;  %v776_v17 = vpop.xlane.xlu0 %775  ;;  %v753_v19 = vadd.f32 %v752_v3, %v751_v36 }
 0x2a6   : > { %v801_v31 = vmul.f32 %v1958_v13, %v779_v29  ;;  %v800_v28 = vmul.f32 %v1950_v2, %v776_v17  ;;  %v1097_v14 = vmul.f32 %v1470_v22, %v1989_v16 }
 0x2a7   : > { %v754_v4 = vrot.slane %v753_v19, 4 }
 0x2a8   : > { %v803_v32 = vsel %vm384_vm3, %v801_v31, 0.0  ;;  %v802_v35 = vsel %vm384_vm3, %v800_v28, 0.0 }
 0x2a9   : > { %v830_v18 = vpop.xlane.xlu1 %829  ;;  %v827_v0 = vpop.xlane.xlu0 %826  ;;  %v804_v12 = vadd.f32 %v803_v32, %v802_v35 }
 0x2aa   : > { %v852_v37 = vmul.f32 %v850_v38, %v830_v18  ;;  %v851_v49 = vmul.f32 %v1960_v25, %v827_v0 }
 0x2ab   : > { %v805_v45 = vrot.slane %v804_v12, 4 }
 0x2ac   : > { %v854_v13 = vsel %vm384_vm3, %v852_v37, 0.0  ;;  %v853_v2 = vsel %vm384_vm3, %v851_v49, 0.0 }
 0x2ad   : > { %v855_v39 = vadd.f32 %v854_v13, %v853_v2  ;;  %v881_v11 = vpop.xlane.xlu1 %880  ;;  %v878_v40 = vpop.xlane.xlu0 %877  ;;  %v806_v55 = vadd.f32 %v805_v45, %v804_v12 }
 0x2ae   : > { %v903_v43 = vmul.f32 %v901_v46, %v881_v11  ;;  %v902_v44 = vmul.f32 %v1967_v33, %v878_v40  ;;  %v755_v46 = vadd.f32 %v754_v4, %v753_v19 }
 0x2af   : > { %v856_v38 = vrot.slane %v855_v39, 4  ;;  %v807_v63 = vrot.slane %v806_v55, 2 }
 0x2b0   : > { %v905_v25 = vsel %vm384_vm3, %v903_v43, 0.0  ;;  %v904_v20 = vsel %vm384_vm3, %v902_v44, 0.0  ;;  %v756_v62 = vrot.slane %v755_v46, 2 }
 0x2b1   : > { %v906_v50 = vadd.f32 %v905_v25, %v904_v20  ;;  %v1079_v51 = vpop.xlane.xlu1 %1078  ;;  %v1076_v47 = vpop.xlane.xlu0 %1075  ;;  %v857_v53 = vadd.f32 %v856_v38, %v855_v39 }
 0x2b2   : > { %v1103_v52 = vmul.f32 %v1101_v41, %v1079_v51  ;;  %v1102_v54 = vmul.f32 %v1101_v41, %v1076_v47  ;;  %v757_v24 = vadd.f32 %v756_v62, %v755_v46 }
 0x2b3   : > { %v907_v56 = vrot.slane %v906_v50, 4  ;;  %v858_v5 = vrot.slane %v857_v53, 2 }
 0x2b4   : > { %v1105_v33 = vadd.f32 %v1103_v52, %v1097_v14  ;;  %v1104_v42 = vadd.f32 %v1102_v54, %v1096_v21  ;;  %v758_v0 = vrot.slane %v757_v24, 1 }
 0x2b5   : > { %v908_v60 = vadd.f32 %v907_v56, %v906_v50  ;;  %v932_v15 = vpop.xlane.xlu1 %931  ;;  %v929_v27 = vpop.xlane.xlu0 %928  ;;  %v859_v26 = vadd.f32 %v858_v5, %v857_v53 }
 0x2b6   : > { %v954_v30 = vmul.f32 %v1977_v58, %v932_v15  ;;  %v953_v61 = vmul.f32 %v1972_v34, %v929_v27  ;;  %1118 = vst.msk [vmem:[#allocation2 + $0x8] sm:$0xff] %vm384_vm3, %v1105_v33  ;;  %1117 = vst.msk [vmem:[#allocation2] sm:$0xff] %vm384_vm3, %v1104_v42  ;;  %v808_v34 = vadd.f32 %v807_v63, %v806_v55 }
 0x2b7   : > { %v909_v48 = vrot.slane %v908_v60, 2  ;;  %v860_v37 = vrot.slane %v859_v26, 1  ;;  %v759_v4 = vadd.f32 %v758_v0, %v757_v24 }
 0x2b8   : > { %v956_v1 = vsel %vm384_vm3, %v954_v30, 0.0  ;;  %v955_v7 = vsel %vm384_vm3, %v953_v61, 0.0 }
 0x2b9   : > { %v957_v9 = vadd.f32 %v956_v1, %v955_v7  ;;  %v983_v10 = vpop.xlane.xlu1 %982  ;;  %v980_v23 = vpop.xlane.xlu0 %979  ;;  %v910_v31 = vadd.f32 %v909_v48, %v908_v60  ;;  %v861_v38 = vadd.f32 %v860_v37, %v859_v26 }
 0x2ba   : > { %v1005_v21 = vmul.f32 %v1983_v6, %v983_v10  ;;  %v1004_v58 = vmul.f32 %v1979_v59, %v980_v23  ;;  %v809_v6 = vrot.slane %v808_v34, 1  ;;  %v1316_v23 = vld [vmem:[%s2059_s8] ss:$0 sm:$0xff] }
 0x2bb   : > { %v958_v22 = vrot.slane %v957_v9, 4  ;;  %v911_v19 = vrot.slane %v910_v31, 1 }
 0x2bc   : > { %v1007_v29 = vsel %vm384_vm3, %v1005_v21, 0.0  ;;  %v1006_v17 = vsel %vm384_vm3, %v1004_v58, 0.0  ;;  %v1138_v21 = vmul.f32 %v1316_v23, %v1665_v57 }
 0x2bd   : > { %v959_v28 = vadd.f32 %v958_v22, %v957_v9  ;;  %v1008_v14 = vadd.f32 %v1007_v29, %v1006_v17  ;;  %v1034_v32 = vpop.xlane.xlu1 %1033  ;;  %v1031_v35 = vpop.xlane.xlu0 %1030  ;;  %v912_v50 = vadd.f32 %v911_v19, %v910_v31 }
 0x2be   : > { %v1056_v3 = vmul.f32 %v1989_v16, %v1034_v32  ;;  %v1055_v36 = vmul.f32 %v1985_v8, %v1031_v35  ;;  %v810_v8 = vadd.f32 %v809_v6, %v808_v34 }
 0x2bf   : > { %v960_v18 = vrot.slane %v959_v28, 2  ;;  %v1009_v59 = vrot.slane %v1008_v14, 4 }
 0x2c0   : > { %v1058_v49 = vsel %vm384_vm3, %v1056_v3, 0.0  ;;  %v1057_v12 = vsel %vm384_vm3, %v1055_v36, 0.0  ;;  %v1120_v55 = vsel %vm1119_vm13, %v759_v4, %v810_v8 }
 0x2c1   : > { %v961_v13 = vadd.f32 %v960_v18, %v959_v28  ;;  %v1010_v2 = vadd.f32 %v1009_v59, %v1008_v14  ;;  %v1059_v39 = vadd.f32 %v1058_v49, %v1057_v12  ;;  %v1085_v11 = vpop.xlane.xlu1 %1084  ;;  %v1082_v40 = vpop.xlane.xlu0 %1081 }
 0x2c2   : > { %v1107_v16 = vmul.f32 %v1105_v33, %v1085_v11  ;;  %v1106_v43 = vmul.f32 %v1104_v42, %v1082_v40  ;;  %v1122_v33 = vsel %vm1121_vm14, %v1120_v55, %v861_v38 }
 0x2c3   : > { %v962_v44 = vrot.slane %v961_v13, 1  ;;  %v1011_v45 = vrot.slane %v1010_v2, 2  ;;  %v1060_v41 = vrot.slane %v1059_v39, 4  ;;  %v1123_v42 = vsel %vm455_vm5, %v1122_v33, %v912_v50 }
 0x2c4   : > { %v1109_v25 = vsel %vm384_vm3, %v1107_v16, 0.0  ;;  %v1108_v20 = vsel %vm384_vm3, %v1106_v43, 0.0 }
 0x2c5   : > { %v1012_v51 = vadd.f32 %v1011_v45, %v1010_v2  ;;  %v1061_v47 = vadd.f32 %v1060_v41, %v1059_v39  ;;  %v1110_v52 = vadd.f32 %v1109_v25, %v1108_v20  ;;  %v963_v54 = vadd.f32 %v962_v44, %v961_v13  ;;  %v1149_v22 = vpop.permute.xlu0 %1148 }
 0x2c7   : > { %v1013_v56 = vrot.slane %v1012_v51, 1  ;;  %v1062_v46 = vrot.slane %v1061_v47, 2  ;;  %v1111_v53 = vrot.slane %v1110_v52, 4  ;;  %v1125_v30 = vsel %vm1124_vm15, %v1123_v42, %v963_v54 }
 0x2c9   : > { %v1014_v60 = vadd.f32 %v1013_v56, %v1012_v51  ;;  %v1063_v15 = vadd.f32 %v1062_v46, %v1061_v47  ;;  %v1112_v27 = vadd.f32 %v1111_v53, %v1110_v52 }
 0x2cb   : > { %v1126_v61 = vsel %vm499_vm8, %v1125_v30, %v1014_v60  ;;  %v1064_v63 = vrot.slane %v1063_v15, 1  ;;  %v1113_v62 = vrot.slane %v1112_v27, 2 }
 0x2cd   : > { %v1065_v5 = vadd.f32 %v1064_v63, %v1063_v15  ;;  %v1114_v1 = vadd.f32 %v1113_v62, %v1112_v27 }
 0x2cf   : > { %v1127_v7 = vsel %vm485_vm7, %v1126_v61, %v1065_v5  ;;  %v1115_v48 = vrot.slane %v1114_v1, 1 }
 0x2d1   : > { %v1116_v9 = vadd.f32 %v1115_v48, %v1114_v1 }
 0x2d3   : > { %v1128_v10 = vsel %vm471_vm6, %v1127_v7, %v1116_v9 }
 0x2d4   : > { %1129 = vst.msk [vmem:[#allocation7] sm:$0xff] %vm384_vm3, %v1128_v10 }
 0x2db   : > { %v1130_v58 = vld [vmem:[#allocation7] sm:$0xff] }
 0x2dc   : > { %v1139_v34 = vadd.f32 %v1138_v21, %v1130_v58 }
 0x2de   : > { %v1151_v24 = vmul.f32 %v1149_v22, %v1139_v34 }
 0x2e0   : > { %v1152_v26 = vpack.c.bf16 %v1151_v24, %v1151_v24 }
 0x2e2   : > { %1383 = vmatmul.mubr.msk.bf16.vlgmr.msra.gmra.mrb[4].mxu1 %vm384_vm3, %v1152_v26 }
 0x3b5   : > { %v1222_v29 = vpop.f32.mrb[4].mxu1 }
 0x3b6   : > { %1228 = vst.msk [vmem:[%s377_s18] sm:$0xff] %vm407_vm2, %v1222_v29  ;;  %v1384_v17 = vpop.f32.mrb[5].mxu1 }
 0x3b7   : > { %v1225_v31 = vpop.f32.mrb[6].mxu1 }
 0x3b8   : > { %v1385_v28 = vpop.f32.mrb[7].mxu1 }
 0x3b9 PF: > { %s20_s15 = sadd.s32 1, %s1493_s15   ;;  %s2070_s13 = smov %s1489_s14 }
 0x3ba   : > { %p17_p5 = scmp.ge.s32.totalorder %s20_s15, 4   ;;  %s2071_s14 = smov %s2073_s16 }
 0x3bc   :  { %19 = sbr.rel (!%p17_p5) target bundleno = 2 (0x2), region = 94 }

// kernel: moe_mamba_block_forward.11
= control target key start
LH: loop header
LB: loop body
LE: loop exit
PB: predicated region body
PF: predicated region fallthrough
CT: control target
= control target key end

     0   :  { %s1131_s0 = inlined_call_operand.vmem [shape: s32[4], index: 0, kind: input, shape index: {}]   ;;  %s1132_s1 = inlined_call_operand.vmem [shape: f32[16,32], index: 1, kind: input, shape index: {}]   ;;  %s1133_s2 = inlined_call_operand.vmem [shape: f32[16,4], index: 2, kind: input, shape index: {}]   ;;  %s1134_s3 = inlined_call_operand.vmem [shape: bf16[4,32,128], index: 3, kind: input, shape index: {}]   ;;  %s1135_s4 = inlined_call_operand.vmem [shape: f32[4,1,128], index: 4, kind: input, shape index: {}]   ;;  %s1136_s5 = inlined_call_operand.vmem [shape: bf16[4,128,32], index: 5, kind: input, shape index: {}]   ;;  %s1137_s6 = inlined_call_operand.vmem [shape: f32[4,1,32], index: 6, kind: input, shape index: {}]   ;;  %s1138_s7 = inlined_call_operand.vmem [shape: f32[16,32], index: 7, kind: output, shape index: {}]  }
   0x1   :  { %s12_s26 = sshll.u32 %s1131_s0, 4  ;;  %s13_s26 = int_to_ptr.vmem [resolvable:$true] %s12_s26 }
   0x2   :  { %s934_s27 = scalar_lea.vmem %s13_s26, 16  ;;  %p939_p1 = scmp.lt.s32.totalorder %s13_s26, %s13_s26 }
   0x3   :  { %p935_p0 = scmp.ne.s32.totalorder %s13_s26, %s934_s27  ;;  %p940_p2 = scmp.lt.s32.totalorder %s934_s27, %s934_s27 }
   0x5   :  { %p941_p3 = por %p940_p2, %p939_p1 }
   0x7   :  { %p942_p4 = pnand %p941_p3, %p935_p0 }
   0x9   :  { %945 = shalt.err (!%p942_p4)  }
   0xa   :  { %s972_s28 = smov [#allocation3]  }
   0xb   :  { %15 = dma.vmem_to_smem %s13_s26, 16, %s972_s28, [#allocation2] }
   0xc   :  { %958 = dma.done.wait [#allocation2], 16 }
   0xd   :  { %959 = vsyncadd [#allocation2], 4294967280 }
   0xe   :  { %17 = sfence }
   0xf   :  { %s1020_s29 = smov 0   ;;  %s1022_s30 = smov 0  }
  0x10   :  { %s1024_s8 = smov 0  }
  0x11 LB: > { %s32_s0 = sadd.s32 1, %s966_s30  ;;  %p821_p5 = scmp.ge.s32.totalorder %s970_s8, 1  ;;  %s970_s8 = sphi %s1024_s8, %s23_s8   ;;  %s966_s30 = sphi %s1022_s30, %s1140_s30   ;;  %s962_s29 = sphi %s1020_s29, %s1139_s29  }
  0x12   : > { %p33_p6 = scmp.ge.s32.totalorder %s32_s0, 4  ;;  %p311_p7 = scmp.lt.s32.totalorder %s970_s8, 5 }
  0x14   : > { %s1142_s0 = smov (%p33_p6, %s32_s0), 0  ;;  %p312_p8 = pnand %p821_p5, %p311_p7 }
  0x15   : > { %s382_s9 = sld [smem:[#allocation3 + %s962_s29]] (!%p312_p8)  ;;  %p826_p13 = scmp.ne.s32.totalorder (!%p312_p8), %s962_s29, 0 }
  0x16   : > { %315 = sbr.rel (%p312_p8) target bundleno = 544 (0x220), region = 44  ;;  %s391_s10 = sld [smem:[#allocation3 + %s962_s29]] (!%p312_p8) }
  0x17   : > { %s398_s11 = sld [smem:[#allocation3 + %s962_s29]] (!%p312_p8) }
  0x18   : > { %s407_s12 = sld [smem:[#allocation3 + %s962_s29]] (!%p312_p8) }
  0x1b   : > { %s383_s13 = smul.u32 (!%p312_p8), %s962_s29, %s382_s9 }
  0x1c   : > { %s392_s14 = smul.u32 (!%p312_p8), %s962_s29, %s391_s10 }
  0x1d   : > { %p384_p9 = scmp.lt.s32.totalorder %s383_s13, 3  ;;  %s399_s15 = smul.u32 %s962_s29, %s398_s11  ;;  %vm425_vm0 = vcmask (!%p826_p13), 261120   ;;  %v973_v0 = vmov (!%p826_p13), 0.0  }
  0x1e   : > { %p393_p10 = scmp.lt.s32.totalorder %s392_s14, 3  ;;  %s408_s16 = smul.u32 %s962_s29, %s407_s12  ;;  %426 = vst.msk [vmem:[%s1138_s7] sm:$0xff] (!%p826_p13), %vm425_vm0, %v973_v0  ;;  %427 = vst.msk [vmem:[%s1138_s7 + $0x8] sm:$0xff] (!%p826_p13), %vm425_vm0, %v973_v0 }
  0x1f   : > { %s1144_s13 = smov (!%p384_p9, %s383_s13), 3  ;;  %p400_p11 = scmp.lt.s32.totalorder %s399_s15, 3 }
  0x20   : > { %s1146_s14 = smov (!%p393_p10, %s392_s14), 3  ;;  %s845_s17 = sshll.u32 %s1144_s13, 4 }
  0x21   : > { %s388_s20 = scalar_lea.vmem %s1134_s3, %s845_s17  ;;  %s395_s23 = scalar_lea.vmem %s1135_s4, %s1146_s14 }
  0x22   : > { %s1148_s15 = smov (!%p400_p11, %s399_s15), 3  ;;  %p409_p12 = scmp.lt.s32.totalorder %s408_s16, 3 }
  0x23   : > { %s846_s24 = sshll.u32 %s1148_s15, 6  ;;  %424 = sbr.rel (%p826_p13) target bundleno = 42 (0x2a), region = 48 }
  0x24   : > { %s1060_s27 = scalar_lea.vmem %s1136_s5, %s846_s24  ;;  %s1150_s16 = smov (!%p409_p12, %s408_s16), 3 }
  0x25   : > { %s411_s10 = scalar_lea.vmem %s1137_s6, %s1150_s16 }
  0x2a PF: > { %s428_s17 = sld [smem:[#allocation3 + %s962_s29]] }
  0x30   : > { %p827_p0 = scmp.le.s32.totalorder %s428_s17, 0 }
  0x31   : > { %v916_v1 = vld [vmem:[%s388_s20] sm:$0xff] (!%p827_p0)   ;;  %v974_v2 = vmov (!%p827_p0), 0.0   ;;  %v917_v3 = vld [vmem:[%s388_s20 + $0x8] sm:$0xff] (!%p827_p0)   ;;  %vm975_vm1 = vmmov (!%p827_p0), 0   ;;  %vm459_vm2 = vcmask (!%p827_p0), 261120   ;;  %v920_v9 = vld [vmem:[%s1060_s27 + $0x10] sm:$0xff] (!%p827_p0)   ;;  %v671_v15 = vlaneseq (!%p827_p0) }
  0x32   : > { %432 = sbr.rel (%p827_p0) target bundleno = 544 (0x220), region = 52  ;;  %859 = vmatprep.subr.bf16.mxu0 (!%p827_p0), %v974_v2  ;;  %867 = vmatprep.subr.bf16.mxu1 (!%p827_p0), %v974_v2  ;;  %v433_v4 = vld [vmem:[%s1132_s1] sm:$0xff] (!%p827_p0)  ;;  %v434_v5 = vld [vmem:[%s1132_s1 + $0x8] sm:$0xff] (!%p827_p0)  ;;  %v921_v10 = vld [vmem:[%s1060_s27 + $0x18] sm:$0xff] (!%p827_p0)   ;;  %v673_v16 = vstv (!%p827_p0), %s962_s29  ;;  %vm679_vm3 = vcmask (!%p827_p0), 31744  }
  0x33   : > { %860 = vmatpush3.bf16.msra.mxu0 (!%p827_p0), %v916_v1  ;;  %863 = vmatprep.mubr.msk.bf16.mxu0 (!%p827_p0), %vm975_vm1, %v974_v2  ;;  %v435_v6 = vpack.c.bf16 (!%p827_p0), %v434_v5, %v433_v4  ;;  %v918_v7 = vld [vmem:[%s1060_s27] sm:$0xff] (!%p827_p0)   ;;  %v919_v8 = vld [vmem:[%s1060_s27 + $0x8] sm:$0xff] (!%p827_p0)   ;;  %v924_v13 = vld [vmem:[%s1060_s27 + $0x30] sm:$0xff] (!%p827_p0)   ;;  %v672_v17 = vand.u32 (!%p827_p0), 127, %v671_v15  ;;  %v976_v5 = vmov (!%p827_p0), -1.0  }
  0x34   : > { %861 = vmatprep.subr.bf16.mxu0 (!%p827_p0), %v974_v2  ;;  %883 = vmatprep.mubr.msk.bf16.mxu1 (!%p827_p0), %vm975_vm1, %v974_v2  ;;  %v922_v11 = vld [vmem:[%s1060_s27 + $0x20] sm:$0xff] (!%p827_p0)   ;;  %v923_v12 = vld [vmem:[%s1060_s27 + $0x28] sm:$0xff] (!%p827_p0)   ;;  %v925_v14 = vld [vmem:[%s1060_s27 + $0x38] sm:$0xff] (!%p827_p0)  }
  0x35   : > { %868 = vmatpush3.bf16.msra.mxu1 (!%p827_p0), %v918_v7  ;;  %v675_v18 = vld [vmem:[%s1133_s2] sm:$0xff] (!%p827_p0)  ;;  %v676_v19 = vld [vmem:[%s1133_s2 + $0x8] sm:$0xff] (!%p827_p0)  ;;  %vm674_vm4 = vcmp.eq.s32.totalorder (!%p827_p0), %v672_v17, %v673_v16 }
  0x36   : > { %869 = vmatprep.subr.bf16.mxu1 (!%p827_p0), %v974_v2  ;;  %v677_v20 = vsel (!%p827_p0), %vm674_vm4, %v675_v18, 0.0  ;;  %v678_v21 = vsel (!%p827_p0), %vm674_vm4, %v676_v19, 0.0  ;;  %v828_v24 = vld [vmem:[%s395_s23] ss:$0 sm:$0xff] (!%p827_p0) }
  0x37   : > { %862 = vmatpush3.bf16.msra.mxu0 (!%p827_p0), %v917_v3  ;;  %v680_v22 = vsel (!%p827_p0), %vm679_vm3, %v677_v20, 0.0  ;;  %v683_v23 = vsel (!%p827_p0), %vm679_vm3, %v678_v21, 0.0  ;;  %v832_v20 = vld [vmem:[%s411_s10] ss:$0 sm:$0xff] (!%p827_p0) }
  0x38   : > { %681 = vadd.xlane.f32.xlu0 (!%p827_p0), %v680_v22 }
  0x39   : > { %870 = vmatpush3.bf16.msra.mxu1 %v919_v8 }
  0x3a   : > { %864 = vmatmul.mubr.msk.bf16.vlgmr.msra.gmra.mrb[0].mxu0 %vm459_vm2, %v435_v6  ;;  %871 = vmatprep.subr.bf16.mxu1 %v974_v2 }
  0x3c   : > { %684 = vadd.xlane.f32.xlu0 %v683_v23 }
  0x3d   : > { %872 = vmatpush3.bf16.msra.mxu1 %v920_v9 }
  0x3e   : > { %873 = vmatprep.subr.bf16.mxu1 %v974_v2 }
  0x41   : > { %874 = vmatpush3.bf16.msra.mxu1 %v921_v10 }
  0x42   : > { %875 = vmatprep.subr.bf16.mxu1 %v974_v2 }
  0x45   : > { %876 = vmatpush3.bf16.msra.mxu1 %v922_v11 }
  0x46   : > { %877 = vmatprep.subr.bf16.mxu1 %v974_v2 }
  0x49   : > { %878 = vmatpush3.bf16.msra.mxu1 %v923_v12 }
  0x4a   : > { %879 = vmatprep.subr.bf16.mxu1 %v974_v2 }
  0x4d   : > { %880 = vmatpush3.bf16.msra.mxu1 %v924_v13 }
  0x4e   : > { %881 = vmatprep.subr.bf16.mxu1 %v974_v2 }
  0x51   : > { %882 = vmatpush3.bf16.msra.mxu1 %v925_v14 }
  0xc5   : > { %v682_v19 = vpop.xlane.xlu0 %681 }
 0x10d   : > { %v497_v25 = vpop.f32.mrb[0].mxu0 }
 0x10e   : > { %v498_v26 = vadd.f32 %v828_v24, %v497_v25  ;;  %v865_v27 = vpop.f32.mrb[1].mxu0 }
 0x10f   : > { %v500_v28 = vpop.f32.mrb[2].mxu0 }
 0x110   : > { %v506_v29 = vmul.f32 0.70710677, %v498_v26  ;;  %v501_v30 = vadd.f32 %v828_v24, %v500_v28  ;;  %v866_v31 = vpop.f32.mrb[3].mxu0  ;;  %v504_v13 = vmul.f32 0.5, %v498_v26  ;;  %v686_v24 = vld [vmem:[%s1138_s7] sm:$0xff]  ;;  %v685_v26 = vpop.xlane.xlu0 %684 }
 0x112   : > { %v512_v32 = vand.u32 2147483647, %v506_v29  ;;  %v507_v33 = vmul.f32 0.70710677, %v501_v30  ;;  %vm508_vm5 = vcmp.ge.f32.partialorder %v506_v29, 0.0  ;;  %v505_v14 = vmul.f32 0.5, %v501_v30 }
 0x113   : > { %v510_v6 = vsel %vm508_vm5, 1.0, %v976_v5  ;;  %v687_v30 = vld [vmem:[%s1138_s7 + $0x8] sm:$0xff] }
 0x114   : > { %v514_v34 = vmul.f32 0.3275911, %v512_v32  ;;  %v513_v35 = vand.u32 2147483647, %v507_v33  ;;  %v540_v39 = vsub.f32 0.0, %v512_v32  ;;  %vm509_vm6 = vcmp.ge.f32.partialorder %v507_v33, 0.0 }
 0x115   : > { %v511_v10 = vsel %vm509_vm6, 1.0, %v976_v5 }
 0x116   : > { %v516_v36 = vadd.f32 1.0, %v514_v34  ;;  %v515_v37 = vmul.f32 0.3275911, %v513_v35  ;;  %v541_v40 = vsub.f32 0.0, %v513_v35  ;;  %v542_v42 = vmul.f32 %v540_v39, %v512_v32 }
 0x118   : > { %926 = vrcp.f32 %v516_v36  ;;  %v517_v38 = vadd.f32 1.0, %v515_v37  ;;  %v543_v46 = vmul.f32 %v541_v40, %v513_v35  ;;  %v544_v47 = vmul.f32 1.442695, %v542_v42 }
 0x11a   : > { %928 = vrcp.f32 %v517_v38  ;;  %v546_v52 = vmul.f32 1.442695, %v543_v46 }
 0x11b   : > { %930 = vpow2.f32 %v544_v47 }
 0x11c   : > { %932 = vpow2.f32 %v546_v52 }
 0x122   : > { %v927_v41 = vpop.eup %926 }
 0x123   : > { %v522_v43 = vmul.f32 1.0614054, %v927_v41 }
 0x124   : > { %v929_v44 = vpop.eup %928 }
 0x125   : > { %v524_v45 = vadd.f32 -1.4531521, %v522_v43  ;;  %v523_v48 = vmul.f32 1.0614054, %v929_v44  ;;  %v931_v63 = vpop.eup %930 }
 0x126   : > { %v933_v3 = vpop.eup %932 }
 0x127   : > { %v526_v49 = vmul.f32 %v927_v41, %v524_v45  ;;  %v525_v50 = vadd.f32 -1.4531521, %v523_v48 }
 0x129   : > { %v528_v51 = vadd.f32 1.4214138, %v526_v49  ;;  %v527_v53 = vmul.f32 %v929_v44, %v525_v50 }
 0x12b   : > { %v530_v54 = vmul.f32 %v927_v41, %v528_v51  ;;  %v529_v55 = vadd.f32 1.4214138, %v527_v53 }
 0x12d   : > { %v532_v56 = vadd.f32 -0.28449672, %v530_v54  ;;  %v531_v57 = vmul.f32 %v929_v44, %v529_v55 }
 0x12f   : > { %v534_v58 = vmul.f32 %v927_v41, %v532_v56  ;;  %v533_v59 = vadd.f32 -0.28449672, %v531_v57 }
 0x131   : > { %v536_v60 = vadd.f32 0.2548296, %v534_v58  ;;  %v535_v61 = vmul.f32 %v929_v44, %v533_v59 }
 0x133   : > { %v538_v62 = vmul.f32 %v927_v41, %v536_v60  ;;  %v537_v0 = vadd.f32 0.2548296, %v535_v61 }
 0x135   : > { %v548_v1 = vmul.f32 %v931_v63, %v538_v62  ;;  %v539_v2 = vmul.f32 %v929_v44, %v537_v0 }
 0x137   : > { %v550_v4 = vsub.f32 1.0, %v548_v1  ;;  %v549_v7 = vmul.f32 %v933_v3, %v539_v2 }
 0x139   : > { %v552_v8 = vmul.f32 %v550_v4, %v510_v6  ;;  %v551_v9 = vsub.f32 1.0, %v549_v7 }
 0x13b   : > { %v554_v11 = vadd.f32 1.0, %v552_v8  ;;  %v553_v12 = vmul.f32 %v551_v9, %v511_v10 }
 0x13d   : > { %v555_v15 = vadd.f32 1.0, %v553_v12  ;;  %v556_v16 = vmul.f32 %v554_v11, %v504_v13 }
 0x13f   : > { %v557_v17 = vmul.f32 %v555_v15, %v505_v14 }
 0x141   : > { %v558_v18 = vpack.c.bf16 %v557_v17, %v556_v16 }
 0x143   : > { %884 = vmatmul.mubr.bf16.vlgmr.msra.gmra.mrb[0].mxu1 %v558_v18 }
 0x216   : > { %v664_v21 = vpop.f32.mrb[0].mxu1 }
 0x217   : > { %v665_v22 = vadd.f32 %v832_v20, %v664_v21  ;;  %v885_v23 = vpop.f32.mrb[1].mxu1 }
 0x218   : > { %v667_v25 = vpop.f32.mrb[2].mxu1 }
 0x219   : > { %v688_v27 = vmul.f32 %v682_v19, %v665_v22  ;;  %v668_v28 = vadd.f32 %v832_v20, %v667_v25  ;;  %v886_v29 = vpop.f32.mrb[3].mxu1 }
 0x21b   : > { %v690_v31 = vadd.f32 %v688_v27, %v686_v24  ;;  %v689_v32 = vmul.f32 %v685_v26, %v668_v28 }
 0x21d   : > { %692 = vst.msk [vmem:[%s1138_s7] sm:$0xff] %vm459_vm2, %v690_v31  ;;  %v691_v33 = vadd.f32 %v689_v32, %v687_v30 }
 0x21f   : > { %693 = vst.msk [vmem:[%s1138_s7 + $0x8] sm:$0xff] %vm459_vm2, %v691_v33 }
 0x220 PF: > { %s23_s8 = sadd.s32 1, %s970_s8   ;;  %s1139_s29 = smov %s966_s30 }
 0x221   : > { %p20_p1 = scmp.ge.s32.totalorder %s23_s8, 6   ;;  %s1140_s30 = smov %s1142_s0 }
 0x223   :  { %22 = sbr.rel (!%p20_p1) target bundleno = 17 (0x11), region = 97 }

// kernel: moe_mamba_block_forward.15
= control target key start
LH: loop header
LB: loop body
LE: loop exit
PB: predicated region body
PF: predicated region fallthrough
CT: control target
= control target key end

     0   :  { %s1175_s0 = inlined_call_operand.vmem [shape: s32[4], index: 0, kind: input, shape index: {}]   ;;  %s1176_s1 = inlined_call_operand.vmem [shape: f32[16,32], index: 1, kind: input, shape index: {}]   ;;  %s1177_s2 = inlined_call_operand.vmem [shape: f32[16,4], index: 2, kind: input, shape index: {}]   ;;  %s1178_s3 = inlined_call_operand.vmem [shape: bf16[4,32,128], index: 3, kind: input, shape index: {}]   ;;  %s1179_s4 = inlined_call_operand.vmem [shape: f32[4,1,128], index: 4, kind: input, shape index: {}]   ;;  %s1180_s5 = inlined_call_operand.vmem [shape: bf16[4,128,32], index: 5, kind: input, shape index: {}]   ;;  %s1181_s6 = inlined_call_operand.vmem [shape: f32[4,1,32], index: 6, kind: input, shape index: {}]   ;;  %s1182_s7 = inlined_call_operand.hbm [shape: f32[16,32], index: 7, kind: output, shape index: {}]  }
   0x1   :  { %s12_s26 = sshll.u32 %s1175_s0, 4  ;;  %s13_s26 = int_to_ptr.vmem [resolvable:$true] %s12_s26 }
   0x2   :  { %s934_s27 = scalar_lea.vmem %s13_s26, 16  ;;  %p939_p1 = scmp.lt.s32.totalorder %s13_s26, %s13_s26 }
   0x3   :  { %p935_p0 = scmp.ne.s32.totalorder %s13_s26, %s934_s27  ;;  %p940_p2 = scmp.lt.s32.totalorder %s934_s27, %s934_s27 }
   0x5   :  { %p941_p3 = por %p940_p2, %p939_p1 }
   0x7   :  { %p942_p4 = pnand %p941_p3, %p935_p0 }
   0x9   :  { %945 = shalt.err (!%p942_p4)  }
   0xa   :  { %s1002_s28 = smov [#allocation3]  }
   0xb   :  { %15 = dma.vmem_to_smem %s13_s26, 16, %s1002_s28, [#allocation2] }
   0xc   :  { %984 = dma.done.wait [#allocation2], 16 }
   0xd   :  { %985 = vsyncadd [#allocation2], 4294967280 }
   0xe   :  { %17 = sfence }
   0xf   :  { %18 = vsyncpa [#allocation5], 0  ;;  %s1053_s29 = smov 0   ;;  %s1055_s30 = smov 0  }
  0x10   :  { %s1057_s8 = smov 0  }
  0x11 LB: > { %s807_s0 = sadd.s32 4294967295, %s1000_s8   ;;  %s33_s9 = sadd.s32 1, %s996_s30  ;;  %s1000_s8 = sphi %s1057_s8, %s24_s8   ;;  %s996_s30 = sphi %s1055_s30, %s1185_s30   ;;  %s992_s29 = sphi %s1053_s29, %s1184_s29  }
  0x12   : > { %p34_p5 = scmp.ge.s32.totalorder %s33_s9, 4  ;;  %p812_p6 = scmp.ge.s32.totalorder %s1000_s8, 1 }
  0x13   : > { %p312_p7 = scmp.lt.s32.totalorder %s1000_s8, 5 }
  0x14   : > { %s1187_s9 = smov (%p34_p5, %s33_s9), 0 }
  0x15   : > { %p313_p8 = pnand %p812_p6, %p312_p7 }
  0x16   : > { %s378_s10 = sld [smem:[#allocation3 + %s992_s29]] (!%p313_p8)  ;;  %p817_p13 = scmp.ne.s32.totalorder (!%p313_p8), %s992_s29, 0 }
  0x17   : > { %316 = sbr.rel (%p313_p8) target bundleno = 571 (0x23b), region = 44  ;;  %s387_s11 = sld [smem:[#allocation3 + %s992_s29]] (!%p313_p8) }
  0x18   : > { %s394_s12 = sld [smem:[#allocation3 + %s992_s29]] (!%p313_p8) }
  0x19   : > { %s403_s13 = sld [smem:[#allocation3 + %s992_s29]] (!%p313_p8) }
  0x1c   : > { %s379_s14 = smul.u32 (!%p313_p8), %s992_s29, %s378_s10 }
  0x1d   : > { %s388_s15 = smul.u32 (!%p313_p8), %s992_s29, %s387_s11 }
  0x1e   : > { %p380_p9 = scmp.lt.s32.totalorder %s379_s14, 3  ;;  %s395_s16 = smul.u32 %s992_s29, %s394_s12  ;;  %vm416_vm0 = vcmask (!%p817_p13), 261120   ;;  %v1003_v0 = vmov (!%p817_p13), 0.0  }
  0x1f   : > { %p389_p10 = scmp.lt.s32.totalorder %s388_s15, 3  ;;  %s404_s17 = smul.u32 %s992_s29, %s403_s13  ;;  %417 = vst.msk [vmem:[#allocation4] sm:$0xff] (!%p817_p13), %vm416_vm0, %v1003_v0  ;;  %418 = vst.msk [vmem:[#allocation4 + $0x8] sm:$0xff] (!%p817_p13), %vm416_vm0, %v1003_v0 }
  0x20   : > { %s1189_s14 = smov (!%p380_p9, %s379_s14), 3  ;;  %p396_p11 = scmp.lt.s32.totalorder %s395_s16, 3 }
  0x21   : > { %s1191_s15 = smov (!%p389_p10, %s388_s15), 3  ;;  %s836_s18 = sshll.u32 %s1189_s14, 4 }
  0x22   : > { %s384_s21 = scalar_lea.vmem %s1178_s3, %s836_s18  ;;  %s391_s24 = scalar_lea.vmem %s1179_s4, %s1191_s15 }
  0x23   : > { %s1193_s16 = smov (!%p396_p11, %s395_s16), 3  ;;  %p405_p12 = scmp.lt.s32.totalorder %s404_s17, 3 }
  0x24   : > { %s837_s25 = sshll.u32 %s1193_s16, 6  ;;  %415 = sbr.rel (%p817_p13) target bundleno = 43 (0x2b), region = 48 }
  0x25   : > { %s1094_s28 = scalar_lea.vmem %s1180_s5, %s837_s25  ;;  %s1195_s17 = smov (!%p405_p12, %s404_s17), 3 }
  0x26   : > { %s407_s12 = scalar_lea.vmem %s1181_s6, %s1195_s17 }
  0x2b PF: > { %s419_s13 = sld [smem:[#allocation3 + %s992_s29]] }
  0x31   : > { %p818_p0 = scmp.le.s32.totalorder %s419_s13, 0 }
  0x32   : > { %v916_v1 = vld [vmem:[%s384_s21] sm:$0xff] (!%p818_p0)   ;;  %v1004_v2 = vmov (!%p818_p0), 0.0   ;;  %v917_v3 = vld [vmem:[%s384_s21 + $0x8] sm:$0xff] (!%p818_p0)   ;;  %vm1005_vm1 = vmmov (!%p818_p0), 0   ;;  %vm450_vm2 = vcmask (!%p818_p0), 261120   ;;  %v920_v9 = vld [vmem:[%s1094_s28 + $0x10] sm:$0xff] (!%p818_p0)   ;;  %v662_v15 = vlaneseq (!%p818_p0) }
  0x33   : > { %423 = sbr.rel (%p818_p0) target bundleno = 545 (0x221), region = 52  ;;  %850 = vmatprep.subr.bf16.mxu0 (!%p818_p0), %v1004_v2  ;;  %858 = vmatprep.subr.bf16.mxu1 (!%p818_p0), %v1004_v2  ;;  %v424_v4 = vld [vmem:[%s1176_s1] sm:$0xff] (!%p818_p0)  ;;  %v425_v5 = vld [vmem:[%s1176_s1 + $0x8] sm:$0xff] (!%p818_p0)  ;;  %v921_v10 = vld [vmem:[%s1094_s28 + $0x18] sm:$0xff] (!%p818_p0)   ;;  %v664_v16 = vstv (!%p818_p0), %s992_s29  ;;  %vm670_vm3 = vcmask (!%p818_p0), 31744  }
  0x34   : > { %851 = vmatpush3.bf16.msra.mxu0 (!%p818_p0), %v916_v1  ;;  %854 = vmatprep.mubr.msk.bf16.mxu0 (!%p818_p0), %vm1005_vm1, %v1004_v2  ;;  %v426_v6 = vpack.c.bf16 (!%p818_p0), %v425_v5, %v424_v4  ;;  %v918_v7 = vld [vmem:[%s1094_s28] sm:$0xff] (!%p818_p0)   ;;  %v919_v8 = vld [vmem:[%s1094_s28 + $0x8] sm:$0xff] (!%p818_p0)   ;;  %v924_v13 = vld [vmem:[%s1094_s28 + $0x30] sm:$0xff] (!%p818_p0)   ;;  %v663_v17 = vand.u32 (!%p818_p0), 127, %v662_v15  ;;  %v1006_v5 = vmov (!%p818_p0), -1.0  }
  0x35   : > { %852 = vmatprep.subr.bf16.mxu0 (!%p818_p0), %v1004_v2  ;;  %874 = vmatprep.mubr.msk.bf16.mxu1 (!%p818_p0), %vm1005_vm1, %v1004_v2  ;;  %v922_v11 = vld [vmem:[%s1094_s28 + $0x20] sm:$0xff] (!%p818_p0)   ;;  %v923_v12 = vld [vmem:[%s1094_s28 + $0x28] sm:$0xff] (!%p818_p0)   ;;  %v925_v14 = vld [vmem:[%s1094_s28 + $0x38] sm:$0xff] (!%p818_p0)  }
  0x36   : > { %859 = vmatpush3.bf16.msra.mxu1 (!%p818_p0), %v918_v7  ;;  %v666_v18 = vld [vmem:[%s1177_s2] sm:$0xff] (!%p818_p0)  ;;  %v667_v19 = vld [vmem:[%s1177_s2 + $0x8] sm:$0xff] (!%p818_p0)  ;;  %vm665_vm4 = vcmp.eq.s32.totalorder (!%p818_p0), %v663_v17, %v664_v16 }
  0x37   : > { %860 = vmatprep.subr.bf16.mxu1 (!%p818_p0), %v1004_v2  ;;  %v668_v20 = vsel (!%p818_p0), %vm665_vm4, %v666_v18, 0.0  ;;  %v669_v21 = vsel (!%p818_p0), %vm665_vm4, %v667_v19, 0.0  ;;  %v819_v24 = vld [vmem:[%s391_s24] ss:$0 sm:$0xff] (!%p818_p0) }
  0x38   : > { %853 = vmatpush3.bf16.msra.mxu0 (!%p818_p0), %v917_v3  ;;  %v671_v22 = vsel (!%p818_p0), %vm670_vm3, %v668_v20, 0.0  ;;  %v674_v23 = vsel (!%p818_p0), %vm670_vm3, %v669_v21, 0.0  ;;  %v823_v20 = vld [vmem:[%s407_s12] ss:$0 sm:$0xff] (!%p818_p0) }
  0x39   : > { %672 = vadd.xlane.f32.xlu0 (!%p818_p0), %v671_v22 }
  0x3a   : > { %861 = vmatpush3.bf16.msra.mxu1 %v919_v8 }
  0x3b   : > { %855 = vmatmul.mubr.msk.bf16.vlgmr.msra.gmra.mrb[0].mxu0 %vm450_vm2, %v426_v6  ;;  %862 = vmatprep.subr.bf16.mxu1 %v1004_v2 }
  0x3d   : > { %675 = vadd.xlane.f32.xlu0 %v674_v23 }
  0x3e   : > { %863 = vmatpush3.bf16.msra.mxu1 %v920_v9 }
  0x3f   : > { %864 = vmatprep.subr.bf16.mxu1 %v1004_v2 }
  0x42   : > { %865 = vmatpush3.bf16.msra.mxu1 %v921_v10 }
  0x43   : > { %866 = vmatprep.subr.bf16.mxu1 %v1004_v2 }
  0x46   : > { %867 = vmatpush3.bf16.msra.mxu1 %v922_v11 }
  0x47   : > { %868 = vmatprep.subr.bf16.mxu1 %v1004_v2 }
  0x4a   : > { %869 = vmatpush3.bf16.msra.mxu1 %v923_v12 }
  0x4b   : > { %870 = vmatprep.subr.bf16.mxu1 %v1004_v2 }
  0x4e   : > { %871 = vmatpush3.bf16.msra.mxu1 %v924_v13 }
  0x4f   : > { %872 = vmatprep.subr.bf16.mxu1 %v1004_v2 }
  0x52   : > { %873 = vmatpush3.bf16.msra.mxu1 %v925_v14 }
  0xc6   : > { %v673_v19 = vpop.xlane.xlu0 %672 }
 0x10e   : > { %v488_v25 = vpop.f32.mrb[0].mxu0 }
 0x10f   : > { %v489_v26 = vadd.f32 %v819_v24, %v488_v25  ;;  %v856_v27 = vpop.f32.mrb[1].mxu0 }
 0x110   : > { %v491_v28 = vpop.f32.mrb[2].mxu0  ;;  %v676_v27 = vpop.xlane.xlu0 %675 }
 0x111   : > { %v497_v29 = vmul.f32 0.70710677, %v489_v26  ;;  %v492_v30 = vadd.f32 %v819_v24, %v491_v28  ;;  %v857_v31 = vpop.f32.mrb[3].mxu0  ;;  %v495_v13 = vmul.f32 0.5, %v489_v26  ;;  %v677_v24 = vld [vmem:[#allocation4] sm:$0xff] }
 0x113   : > { %v503_v32 = vand.u32 2147483647, %v497_v29  ;;  %v498_v33 = vmul.f32 0.70710677, %v492_v30  ;;  %vm499_vm5 = vcmp.ge.f32.partialorder %v497_v29, 0.0  ;;  %v496_v14 = vmul.f32 0.5, %v492_v30 }
 0x114   : > { %v501_v6 = vsel %vm499_vm5, 1.0, %v1006_v5  ;;  %v678_v30 = vld [vmem:[#allocation4 + $0x8] sm:$0xff] }
 0x115   : > { %v505_v34 = vmul.f32 0.3275911, %v503_v32  ;;  %v504_v35 = vand.u32 2147483647, %v498_v33  ;;  %v531_v39 = vsub.f32 0.0, %v503_v32  ;;  %vm500_vm6 = vcmp.ge.f32.partialorder %v498_v33, 0.0 }
 0x116   : > { %v502_v10 = vsel %vm500_vm6, 1.0, %v1006_v5 }
 0x117   : > { %v507_v36 = vadd.f32 1.0, %v505_v34  ;;  %v506_v37 = vmul.f32 0.3275911, %v504_v35  ;;  %v532_v40 = vsub.f32 0.0, %v504_v35  ;;  %v533_v42 = vmul.f32 %v531_v39, %v503_v32 }
 0x119   : > { %926 = vrcp.f32 %v507_v36  ;;  %v508_v38 = vadd.f32 1.0, %v506_v37  ;;  %v534_v46 = vmul.f32 %v532_v40, %v504_v35  ;;  %v535_v47 = vmul.f32 1.442695, %v533_v42 }
 0x11b   : > { %928 = vrcp.f32 %v508_v38  ;;  %v537_v52 = vmul.f32 1.442695, %v534_v46 }
 0x11c   : > { %930 = vpow2.f32 %v535_v47 }
 0x11d   : > { %932 = vpow2.f32 %v537_v52 }
 0x123   : > { %v927_v41 = vpop.eup %926 }
 0x124   : > { %v513_v43 = vmul.f32 1.0614054, %v927_v41 }
 0x125   : > { %v929_v44 = vpop.eup %928 }
 0x126   : > { %v515_v45 = vadd.f32 -1.4531521, %v513_v43  ;;  %v514_v48 = vmul.f32 1.0614054, %v929_v44  ;;  %v931_v63 = vpop.eup %930 }
 0x127   : > { %v933_v3 = vpop.eup %932 }
 0x128   : > { %v517_v49 = vmul.f32 %v927_v41, %v515_v45  ;;  %v516_v50 = vadd.f32 -1.4531521, %v514_v48 }
 0x12a   : > { %v519_v51 = vadd.f32 1.4214138, %v517_v49  ;;  %v518_v53 = vmul.f32 %v929_v44, %v516_v50 }
 0x12c   : > { %v521_v54 = vmul.f32 %v927_v41, %v519_v51  ;;  %v520_v55 = vadd.f32 1.4214138, %v518_v53 }
 0x12e   : > { %v523_v56 = vadd.f32 -0.28449672, %v521_v54  ;;  %v522_v57 = vmul.f32 %v929_v44, %v520_v55 }
 0x130   : > { %v525_v58 = vmul.f32 %v927_v41, %v523_v56  ;;  %v524_v59 = vadd.f32 -0.28449672, %v522_v57 }
 0x132   : > { %v527_v60 = vadd.f32 0.2548296, %v525_v58  ;;  %v526_v61 = vmul.f32 %v929_v44, %v524_v59 }
 0x134   : > { %v529_v62 = vmul.f32 %v927_v41, %v527_v60  ;;  %v528_v0 = vadd.f32 0.2548296, %v526_v61 }
 0x136   : > { %v539_v1 = vmul.f32 %v931_v63, %v529_v62  ;;  %v530_v2 = vmul.f32 %v929_v44, %v528_v0 }
 0x138   : > { %v541_v4 = vsub.f32 1.0, %v539_v1  ;;  %v540_v7 = vmul.f32 %v933_v3, %v530_v2 }
 0x13a   : > { %v543_v8 = vmul.f32 %v541_v4, %v501_v6  ;;  %v542_v9 = vsub.f32 1.0, %v540_v7 }
 0x13c   : > { %v545_v11 = vadd.f32 1.0, %v543_v8  ;;  %v544_v12 = vmul.f32 %v542_v9, %v502_v10 }
 0x13e   : > { %v546_v15 = vadd.f32 1.0, %v544_v12  ;;  %v547_v16 = vmul.f32 %v545_v11, %v495_v13 }
 0x140   : > { %v548_v17 = vmul.f32 %v546_v15, %v496_v14 }
 0x142   : > { %v549_v18 = vpack.c.bf16 %v548_v17, %v547_v16 }
 0x144   : > { %875 = vmatmul.mubr.bf16.vlgmr.msra.gmra.mrb[0].mxu1 %v549_v18 }
 0x217   : > { %v655_v21 = vpop.f32.mrb[0].mxu1 }
 0x218   : > { %v656_v22 = vadd.f32 %v823_v20, %v655_v21  ;;  %v876_v23 = vpop.f32.mrb[1].mxu1 }
 0x219   : > { %v658_v25 = vpop.f32.mrb[2].mxu1 }
 0x21a   : > { %v679_v28 = vmul.f32 %v673_v19, %v656_v22  ;;  %v659_v26 = vadd.f32 %v823_v20, %v658_v25  ;;  %v877_v29 = vpop.f32.mrb[3].mxu1 }
 0x21c   : > { %v681_v31 = vadd.f32 %v679_v28, %v677_v24  ;;  %v680_v32 = vmul.f32 %v676_v27, %v659_v26 }
 0x21e   : > { %683 = vst.msk [vmem:[#allocation4] sm:$0xff] %vm450_vm2, %v681_v31  ;;  %v682_v33 = vadd.f32 %v680_v32, %v678_v30 }
 0x220   : > { %684 = vst.msk [vmem:[#allocation4 + $0x8] sm:$0xff] %vm450_vm2, %v682_v33 }
 0x221 PF: > { %p1140_p1 = scmp.eq.s32.totalorder %s807_s0, 3  ;;  %s1007_s24 = smov [#allocation4]  }
 0x222   : > { %s694_s27 = sshll.u32 %s1007_s24, 4  ;;  %s695_s27 = int_to_ptr.vmem [resolvable:$true] %s694_s27 }
 0x223   : > { %s946_s28 = scalar_lea.vmem %s695_s27, 256  ;;  %p953_p5 = scmp.lt.s32.totalorder %s695_s27, %s695_s27 }
 0x224   : > { %p947_p2 = scmp.ne.s32.totalorder %s695_s27, %s946_s28  ;;  %p954_p6 = scmp.lt.s32.totalorder %s946_s28, %s946_s28 }
 0x226   : > { %p948_p3 = pnand %p947_p2, %p1140_p1  ;;  %p955_p7 = por %p954_p6, %p953_p5 }
 0x228   : > { %p949_p4 = pneg %p948_p3 }
 0x22a   : > { %p956_p8 = pnand %p955_p7, %p949_p4 }
 0x22c   : > { %959 = shalt.err (!%p956_p8)
}
 0x22d   : > { %s960_s0 = scalar_lea.hbm %s1182_s7, 256 }
 0x22e   : > { %p961_p9 = scmp.ne.s32.totalorder %s1182_s7, %s960_s0  ;;  %p966_p12 = scmp.lt.u32.totalorder %s960_s0, %s1182_s7 }
 0x230   : > { %p962_p10 = pnand %p961_p9, %p1140_p1 }
 0x232   : > { %p963_p11 = pneg %p962_p10 }
 0x234   : > { %p968_p13 = pnand %p966_p12, %p963_p11 }
 0x236   : > { %971 = shalt.err (!%p968_p13)
}
 0x237   : > { %s1008_s18 = smov 128   ;;  %s1009_s19 = smov 8  }
 0x238   : > { %879 = dma.vmem_to_hbm [thread:$0]  (%p1140_p1), %s695_s27, 256, %s1182_s7, [#allocation5], %s1008_s18, %s1008_s18, %s1009_s19  }
 0x239   : > { %987 = dma.done.wait (%p1140_p1), [#allocation5], 256  }
 0x23a   : > { %989 = vsyncadd (%p1140_p1), [#allocation5], 4294967040 }
 0x23b PF: > { %s24_s8 = sadd.s32 1, %s1000_s8   ;;  %s1184_s29 = smov %s996_s30 }
 0x23c   : > { %p21_p0 = scmp.ge.s32.totalorder %s24_s8, 6   ;;  %s1185_s30 = smov %s1187_s9 }
 0x23e   :  { %23 = sbr.rel (!%p21_p0) target bundleno = 17 (0x11), region = 95 }
 0x245   :  { %710 = vsyncpa [#allocation5], 1 }
 0x246   :  { %712 = vsyncpa [#allocation5 + $0x1], 1 }

</bundles_post_ra>
